<compile_context>
chip_gen: v6e
topology: v6e:2x2x1
jax: 0.10.0
libtpu: 0.0.40
codegen_flags: <defaults>
</compile_context>

<pallas_src>
import math

import jax
import jax.numpy as jnp
from jax import lax
from jax.experimental import pallas as pl
from jax.experimental.pallas import tpu as pltpu

# ---------------- problem sizes (small, consistent with the module) ----------
HIST = 8                # hist_steps
PRED_STEPS = 8          # predictions_steps (T)
NUM_AGENT = 4           # agents per sample group
SAMPLE_BATCH = 4        # CEM sample batch (S)
N_TOTAL = NUM_AGENT * SAMPLE_BATCH          # N = 16 agent rows per call
HID = 32                # surrogate-generator hidden width
COLLISION_DIST = 0.2    # robot_params_dict['collision_dist']
COLL_SHARPNESS = 15.0
DT = 0.4
HALF_LOG_2PI = 0.5 * math.log(2.0 * math.pi)

BPG = 8                                     # forward calls fused per grid step
R_ROWS = BPG * N_TOTAL                      # 128 agent rows / grid step
S_ROWS = BPG * SAMPLE_BATCH                 # 32 sample rows / grid step

# ---- packed data-slab column layout (per agent row, DCOLS lanes) ------------
C_HIST = 0                                  # [0, 2H+1): [flattened rel history | 1.0]
C_Z = 2 * HIST + 1                          # [C_Z, C_Z+2T): z   (x-times | y-times)
C_LAST = C_Z + 2 * PRED_STEPS               # cols C_LAST, C_LAST+1: last observed pos
C_GOAL = C_LAST + 2                         # cols C_GOAL, C_GOAL+1: own sample's goal
DCOLS = C_GOAL + 2                          # 37

# ---- packed weight-slab layout -----------------------------------------------
WROWS = max(HID, 2 * HIST + 1)              # 32
WCOLS = HID + 4 * PRED_STEPS                # [0,HID): [w1; b1] padded, then [w_mu | w_sc]

OUT_COLS = 2 * PRED_STEPS + 3               # [robot rel (x|y) | goal_cost | coll_cost | nll]


# ------------------------- shared elementwise helpers ------------------------
def _softplus(x):
    return jnp.maximum(x, 0.0) + jnp.log(1.0 + jnp.exp(-jnp.abs(x)))


def _sigmoid(x):
    return 1.0 / (1.0 + jnp.exp(-x))


# ------------------------------- Pallas kernel -------------------------------
def _cost_kernel(data_ref, wts_ref, u2_ref, rob_ref, red_ref, out_ref):
    f32 = jnp.float32
    T, H, SB = PRED_STEPS, HIST, S_ROWS

    dat = data_ref[...]                                   # (R_ROWS, DCOLS)
    wts = wts_ref[...]                                    # (WROWS, WCOLS)

    inp_aug = dat[:, : 2 * H + 1]                         # (R, 2H+1)  [history | 1]
    zz = dat[:, C_Z: C_Z + 2 * T]                         # (R, 2T)
    last_x = dat[:, C_LAST: C_LAST + 1]                   # (R, 1)
    last_y = dat[:, C_LAST + 1: C_LAST + 2]               # (R, 1)
    goal_x = dat[:, C_GOAL: C_GOAL + 1]                   # (R, 1)
    goal_y = dat[:, C_GOAL + 1: C_GOAL + 2]               # (R, 1)

    w1b = wts[: 2 * H + 1, :HID]                          # (2H+1, HID)
    wheads = wts[:HID, HID: HID + 4 * T]                  # (HID, 4T)  [w_mu | w_sc]

    # ---- surrogate IAR generator (bias folded into the matmul) ----
    h = jnp.tanh(jnp.dot(inp_aug, w1b, preferred_element_type=f32))      # (R, HID)
    heads = jnp.dot(h, wheads, preferred_element_type=f32)               # (R, 4T)
    mu = heads[:, : 2 * T]                                               # (R, 2T)
    sc = _softplus(heads[:, 2 * T:]) + 1e-3                              # (R, 2T)
    rel = mu + sc * zz                                                   # pred_traj_rel

    # ---- pred_traj_abs = cumsum_t(rel) + obs_last (x & y halves, one matmul) ----
    cums = jnp.dot(rel, u2_ref[...], preferred_element_type=f32)         # (R, 2T)
    abs_x = cums[:, :T] + last_x
    abs_y = cums[:, T:] + last_y

    # ---- goal distance per agent row (each row carries its sample's goal) ----
    dgx = goal_x - abs_x
    dgy = goal_y - abs_y
    goal_d = jnp.sqrt(dgx * dgx + dgy * dgy)                             # (R, T)

    # ---- smoothed collision: every agent vs. its OWN sample's robot ----
    abs_xy = jnp.concatenate([abs_x, abs_y], axis=1)                     # (R, 2T)
    robb = jnp.dot(rob_ref[...], abs_xy, preferred_element_type=f32)     # (R, 2T)
    ddx = abs_x - robb[:, :T]
    ddy = abs_y - robb[:, T:]
    dist = jnp.sqrt(ddx * ddx + ddy * ddy)                               # (R, T)
    sig = _sigmoid((COLLISION_DIST - dist) * COLL_SHARPNESS)             # (R, T)

    # ---- Gaussian NLL per agent (x + y, all steps) ----
    zq = (rel - mu) / sc
    nll_xy = HALF_LOG_2PI + jnp.log(sc) + 0.5 * zq * zq                  # (R, 2T)
    nll_t = nll_xy[:, :T] + nll_xy[:, T:]                                # (R, T)

    # ---- one reduction matmul for everything per-sample:
    #      rows [0:SB)   (robot selector)       -> rel_rob, goal, nll
    #      rows [SB:2SB) (group minus robot)    -> collision sum over other agents
    cols = jnp.concatenate([rel, goal_d, sig, nll_t], axis=1)            # (R, 5T)
    red = jnp.dot(red_ref[...], cols, preferred_element_type=f32)        # (2SB, 5T)

    rel_rob = red[:SB, : 2 * T]                                          # (SB, 2T)
    goal_cost = jnp.sum(red[:SB, 2 * T: 3 * T], axis=1, keepdims=True)   # (SB, 1)
    coll_cost = jnp.sum(red[SB:, 3 * T: 4 * T], axis=1, keepdims=True)   # (SB, 1)
    nll_cost = jnp.sum(red[:SB, 4 * T: 5 * T], axis=1, keepdims=True)    # (SB, 1)

    out_ref[...] = jnp.concatenate(
        [rel_rob, goal_cost, coll_cost, nll_cost], axis=1)               # (SB, 2T+3)


def _run_cost_kernel(data_slab, wts, u2, rob_bcast, red_sel):
    nb = data_slab.shape[0]
    return pl.pallas_call(
        _cost_kernel,
        grid=(nb,),
        in_specs=[
            pl.BlockSpec((None, R_ROWS, DCOLS), lambda b: (b, 0, 0)),
            pl.BlockSpec((WROWS, WCOLS), lambda b: (0, 0)),                   # grid-invariant
            pl.BlockSpec((2 * PRED_STEPS, 2 * PRED_STEPS), lambda b: (0, 0)),  # grid-invariant
            pl.BlockSpec((R_ROWS, R_ROWS), lambda b: (0, 0)),                 # grid-invariant
            pl.BlockSpec((2 * S_ROWS, R_ROWS), lambda b: (0, 0)),             # grid-invariant
        ],
        out_specs=pl.BlockSpec((None, S_ROWS, OUT_COLS), lambda b: (b, 0, 0)),
        out_shape=jax.ShapeDtypeStruct((nb, S_ROWS, OUT_COLS), jnp.float32),
        compiler_params=pltpu.CompilerParams(
            dimension_semantics=("parallel",)),
    )(data_slab, wts, u2, rob_bcast, red_sel)


# ----------------------------- glue / parameters ------------------------------
def init_params(key):
    k1, k2, k3, k4 = jax.random.split(key, 4)
    # head column layout: [x_t0 .. x_t{T-1} | y_t0 .. y_t{T-1}]
    return {
        "w1": jax.random.normal(k1, (2 * HIST, HID), jnp.float32) * 0.2,
        "b1": jax.random.normal(k4, (HID,), jnp.float32) * 0.1,
        "w_mu": jax.random.normal(k2, (HID, 2 * PRED_STEPS), jnp.float32) * 0.1,
        "w_sc": jax.random.normal(k3, (HID, 2 * PRED_STEPS), jnp.float32) * 0.1,
    }


def prediction_model_forward(params, data, z, goal):
    """Batched Prediction_Model.forward (minus host-side costmap / plotting).

    Leading axis B = independent forward calls.  BPG of them are fused into
    the agent-row axis of each Pallas grid step (128 rows = a full sublane
    tile); the grid axis itself is 'parallel' so v7x spreads blocks over both
    TensorCores."""
    obs_traj_pos, traj_rel, robot_idx, r_goal, r_pose = data
    del r_pose  # TODO(synk): only used by the real checkpointed generator / DWA branch
    f32 = jnp.float32
    B = traj_rel.shape[0]
    T, S, A, N, H = PRED_STEPS, SAMPLE_BATCH, NUM_AGENT, N_TOTAL, HIST

    goal = goal.at[:, robot_idx].set(r_goal)
    obs_last = obs_traj_pos[:, -1]                                       # (B, N, 2)

    # goal clamping: cart2pol -> clamp(max=3.0) -> pol2cart (tiny (B,S,2) glue)
    gdiff = goal[:, robot_idx] - obs_last[:, robot_idx]
    v_g = jnp.minimum(jnp.sqrt(gdiff[..., 0] ** 2 + gdiff[..., 1] ** 2), 3.0)
    yaw_g = jnp.arctan2(gdiff[..., 1], gdiff[..., 0])
    goal_cl = jnp.stack([v_g * jnp.cos(yaw_g), v_g * jnp.sin(yaw_g)], axis=-1) \
        + obs_last[:, robot_idx]                                         # (B, S, 2)

    agent = jnp.arange(N)
    group = agent // A                                                   # (N,)

    # ---- per-call data slab (B, N, DCOLS); goal broadcast to every agent row ----
    inp = traj_rel.transpose(0, 2, 1, 3).reshape(B, N, 2 * H)            # (B, N, 2H)
    z_xy = jnp.concatenate([z[..., 0].transpose(0, 2, 1),
                            z[..., 1].transpose(0, 2, 1)], axis=-1)      # (B, N, 2T)
    goal_agent = goal_cl[:, group, :]                                    # (B, N, 2)
    data_slab = jnp.concatenate(
        [inp, jnp.ones((B, N, 1), f32), z_xy, obs_last, goal_agent], axis=-1)

    # pad B to a multiple of BPG and fold BPG instances into the row axis
    nb = (B + BPG - 1) // BPG
    B_pad = nb * BPG
    pad = B_pad - B
    if pad:
        data_slab = jnp.concatenate(
            [data_slab, jnp.zeros((pad, N, DCOLS), f32)], axis=0)
    data_slab = data_slab.reshape(nb, R_ROWS, DCOLS)

    # ---- grid-invariant generator weights (bias folded as an extra row) ----
    w1b = jnp.concatenate([params["w1"], params["b1"][None, :]], axis=0)       # (2H+1, HID)
    w1b = jnp.zeros((WROWS, HID), f32).at[: 2 * H + 1].set(w1b)
    wheads = jnp.concatenate([params["w_mu"], params["w_sc"]], axis=1)         # (HID, 4T)
    wheads = jnp.zeros((WROWS, 4 * T), f32).at[:HID].set(wheads)
    wts = jnp.concatenate([w1b, wheads], axis=1)                               # (WROWS, WCOLS)

    # ---- grid-invariant operators (block-diagonal across the BPG fused calls) ----
    t = jnp.arange(2 * T)
    u2 = ((t[:, None] <= t[None, :]) &
          ((t[:, None] // T) == (t[None, :] // T))).astype(f32)                # (2T, 2T)

    inst = jnp.arange(BPG)
    row_id = jnp.arange(R_ROWS)
    rob_of_agent = robot_idx[group]                                            # (N,)
    rob_row = (inst[:, None] * N + rob_of_agent[None, :]).reshape(R_ROWS)
    rob_bcast = (rob_row[:, None] == row_id[None, :]).astype(f32)              # (R, R)

    samp_inst = jnp.repeat(inst, S)                                            # (SB,)
    samp_id = jnp.tile(jnp.arange(S), BPG)                                     # (SB,)
    rob_col = samp_inst * N + robot_idx[samp_id]                               # (SB,)
    rsel = (rob_col[:, None] == row_id[None, :]).astype(f32)                   # (SB, R)
    col_inst = row_id // N
    col_grp = (row_id % N) // A
    grp = ((samp_inst[:, None] == col_inst[None, :]) &
           (samp_id[:, None] == col_grp[None, :])).astype(f32)                 # (SB, R)
    red_sel = jnp.concatenate([rsel, grp - rsel], axis=0)                      # (2SB, R)

    out = _run_cost_kernel(data_slab, wts, u2, rob_bcast, red_sel)       # (nb, SB, 2T+3)
    out = out.reshape(B_pad, S, OUT_COLS)[:B]                            # drop padding

    rel_rob = jnp.stack([out[..., :T], out[..., T: 2 * T]], axis=-1)     # (B, S, T, 2)
    rel_rob = rel_rob.transpose(0, 2, 1, 3)                              # (B, T, S, 2)
    goal_cost = out[..., 2 * T]
    coll_cost = out[..., 2 * T + 1]
    nll = out[..., 2 * T + 2]
    # TODO(synk): external occupancy-costmap lookup has no Pallas equivalent
    costmap_cost = jnp.zeros((B, S), f32)
    return goal_cost, coll_cost, nll, 0, costmap_cost, rel_rob


# --------------------------- pure-JAX reference check -------------------------
def reference_forward(params, data, z, goal):
    obs_traj_pos, traj_rel, robot_idx, r_goal, _ = data
    B = traj_rel.shape[0]
    T, S, A, N, H = PRED_STEPS, SAMPLE_BATCH, NUM_AGENT, N_TOTAL, HIST
    hp = lax.Precision.HIGHEST

    goal = goal.at[:, robot_idx].set(r_goal)
    obs_last = obs_traj_pos[:, -1]

    inp = traj_rel.transpose(0, 2, 1, 3).reshape(B, N, 2 * H)
    h = jnp.tanh(jnp.einsum("bnc,ch->bnh", inp, params["w1"], precision=hp)
                 + params["b1"])
    mu_xy = jnp.einsum("bnh,ht->bnt", h, params["w_mu"], precision=hp)
    sc_xy = _softplus(jnp.einsum("bnh,ht->bnt", h, params["w_sc"], precision=hp)) + 1e-3
    z_xy = jnp.concatenate([z[..., 0].transpose(0, 2, 1),
                            z[..., 1].transpose(0, 2, 1)], axis=-1)
    rel_xy = mu_xy + sc_xy * z_xy

    def to_tn2(a):                                   # (B, N, 2T) -> (B, T, N, 2)
        return jnp.stack([a[..., :T], a[..., T:]], axis=-1).transpose(0, 2, 1, 3)

    rel, mu, sc = to_tn2(rel_xy), to_tn2(mu_xy), to_tn2(sc_xy)
    pred_abs = jnp.cumsum(rel, axis=1) + obs_last[:, None]               # (B, T, N, 2)

    gdiff = goal[:, robot_idx] - obs_last[:, robot_idx]
    v = jnp.minimum(jnp.sqrt((gdiff ** 2).sum(-1)), 3.0)
    yaw = jnp.arctan2(gdiff[..., 1], gdiff[..., 0])
    goal_cl = jnp.stack([v * jnp.cos(yaw), v * jnp.sin(yaw)], -1) + obs_last[:, robot_idx]

    goal_cost = jnp.sqrt(((goal_cl[:, None] - pred_abs[:, :, robot_idx]) ** 2)
                         .sum(-1)).sum(1)                                # (B, S)

    group = jnp.arange(N) // A
    rob_abs = pred_abs[:, :, robot_idx]                                  # (B, T, S, 2)
    rob_per_agent = rob_abs[:, :, group]                                 # (B, T, N, 2)
    d = jnp.sqrt(((pred_abs - rob_per_agent) ** 2).sum(-1))              # (B, T, N)
    sig = _sigmoid((COLLISION_DIST - d) * COLL_SHARPNESS)
    nonrob = ((group[None, :] == jnp.arange(S)[:, None])
              & (jnp.arange(N)[None, :] != robot_idx[:, None])).astype(jnp.float32)
    coll_cost = (sig[:, :, None, :] * nonrob[None, None]).sum(-1).sum(1)  # (B, S)

    mu_r, sc_r, rel_r = mu[:, :, robot_idx], sc[:, :, robot_idx], rel[:, :, robot_idx]
    zq = (rel_r - mu_r) / sc_r
    nll = (HALF_LOG_2PI + jnp.log(sc_r) + 0.5 * zq * zq).sum(-1).sum(1)   # (B, S)
    return goal_cost, coll_cost, nll, rel_r                               # rel_r: (B,T,S,2)


# ------------------------------------ main ------------------------------------
if __name__ == "__main__":
    import numpy as np

    key = jax.random.PRNGKey(0)
    kp, kh, kz, kg, kr, kc, kj = jax.random.split(key, 7)
    B = 10                                    # -> 2 grid steps, 6 padded instances
    T, S, A, N, H = PRED_STEPS, SAMPLE_BATCH, NUM_AGENT, N_TOTAL, HIST

    params = init_params(kp)

    # instance 1: agents start clustered ~0.15 m around their group's robot and
    # both the histories and z are tiny, so the smoothed collision term is
    # strongly exercised (regression test for the robot-broadcast operator).
    traj_rel = jax.random.normal(kh, (B, H, N, 2), jnp.float32) * 0.05
    traj_rel = traj_rel.at[1].multiply(0.1)
    z = jax.random.normal(kz, (B, T, N, 2), jnp.float32)
    z = z.at[1].multiply(0.02)

    pos = jax.random.normal(kg, (B, N, 2), jnp.float32) * 2.0
    centers = jax.random.normal(kc, (S, 2), jnp.float32)
    offsets = jnp.array([[0.0, 0.0], [0.12, 0.0], [0.0, 0.12], [-0.1, -0.1]],
                        jnp.float32)
    clustered = (centers[:, None, :] + offsets[None, :, :]).reshape(N, 2) \
        + jax.random.normal(kj, (N, 2), jnp.float32) * 0.01
    pos = pos.at[1].set(clustered)
    obs_traj_pos = jnp.broadcast_to(pos[:, None], (B, H, N, 2)) + 0.0

    goal = jax.random.normal(kr, (B, N, 2), jnp.float32) * 3.0
    robot_idx = jnp.arange(S) * A
    r_goal = goal[:, robot_idx] + 1.0
    r_pose = jnp.zeros((B, S, 3), jnp.float32)
    data = (obs_traj_pos, traj_rel, robot_idx, r_goal, r_pose)

    fwd = jax.jit(prediction_model_forward)
    goal_cost, coll_cost, nll, _zero, costmap_cost, rel_rob = fwd(params, data, z, goal)
    jax.block_until_ready((goal_cost, coll_cost, nll, costmap_cost, rel_rob))

    ref_goal, ref_coll, ref_nll, ref_rel_rob = reference_forward(params, data, z, goal)

    # the clustered instance must actually produce a non-trivial collision cost
    assert float(jnp.min(ref_coll[1])) > 0.5, "collision term not exercised by the test"

    np.testing.assert_allclose(np.asarray(goal_cost), np.asarray(ref_goal),
                               rtol=2e-3, atol=2e-3)
    np.testing.assert_allclose(np.asarray(coll_cost), np.asarray(ref_coll),
                               rtol=2e-3, atol=2e-3)
    np.testing.assert_allclose(np.asarray(nll), np.asarray(ref_nll),
                               rtol=2e-3, atol=2e-3)
    np.testing.assert_allclose(np.asarray(rel_rob), np.asarray(ref_rel_rob),
                               rtol=2e-3, atol=2e-3)
    print("KERNEL_OK")
</pallas_src>

<mosaic_0001>
module attributes {stable_mosaic.version = 11 : i64} {
  func.func @_cost_kernel(%arg0: i32, %arg1: memref<1x128x37xf32, #tpu.memory_space<vmem>>, %arg2: memref<32x64xf32, #tpu.memory_space<vmem>>, %arg3: memref<16x16xf32, #tpu.memory_space<vmem>>, %arg4: memref<128x128xf32, #tpu.memory_space<vmem>>, %arg5: memref<64x128xf32, #tpu.memory_space<vmem>>, %arg6: memref<1x32x19xf32, #tpu.memory_space<vmem>>) attributes {dimension_semantics = [#tpu.dimension_semantics<parallel>], iteration_bounds = array<i64: 2>, scalar_prefetch = 0 : i64, scratch_operands = 0 : i64, tpu.core_type = #tpu.core_type<tc>, window_params = [{transform_indices = @transform_0, window_bounds = array<i64: 1, 128, 37>}, {pipeline_mode = #tpu.pipeline_mode<synchronous>, transform_indices = @transform_1, window_bounds = array<i64: 32, 64>}, {pipeline_mode = #tpu.pipeline_mode<synchronous>, transform_indices = @transform_2, window_bounds = array<i64: 16, 16>}, {pipeline_mode = #tpu.pipeline_mode<synchronous>, transform_indices = @transform_3, window_bounds = array<i64: 128, 128>}, {pipeline_mode = #tpu.pipeline_mode<synchronous>, transform_indices = @transform_4, window_bounds = array<i64: 64, 128>}, {transform_indices = @transform_5, window_bounds = array<i64: 1, 32, 19>}]} {
    %c0 = arith.constant 0 : index
    %c0_0 = arith.constant 0 : index
    %c0_1 = arith.constant 0 : index
    %0 = vector.load %arg1[%c0, %c0_0, %c0_1] : memref<1x128x37xf32, #tpu.memory_space<vmem>>, vector<1x128x37xf32>
    %1 = vector.shape_cast %0 : vector<1x128x37xf32> to vector<128x37xf32>
    %c0_2 = arith.constant 0 : index
    %c0_3 = arith.constant 0 : index
    %2 = vector.load %arg2[%c0_2, %c0_3] : memref<32x64xf32, #tpu.memory_space<vmem>>, vector<32x64xf32>
    %3 = vector.extract_strided_slice %1 {offsets = [0, 0], sizes = [128, 17], strides = [1, 1]} : vector<128x37xf32> to vector<128x17xf32>
    %4 = vector.extract_strided_slice %1 {offsets = [0, 17], sizes = [128, 16], strides = [1, 1]} : vector<128x37xf32> to vector<128x16xf32>
    %5 = vector.extract_strided_slice %1 {offsets = [0, 33], sizes = [128, 1], strides = [1, 1]} : vector<128x37xf32> to vector<128x1xf32>
    %6 = vector.extract_strided_slice %1 {offsets = [0, 34], sizes = [128, 1], strides = [1, 1]} : vector<128x37xf32> to vector<128x1xf32>
    %7 = vector.extract_strided_slice %1 {offsets = [0, 35], sizes = [128, 1], strides = [1, 1]} : vector<128x37xf32> to vector<128x1xf32>
    %8 = vector.extract_strided_slice %1 {offsets = [0, 36], sizes = [128, 1], strides = [1, 1]} : vector<128x37xf32> to vector<128x1xf32>
    %9 = vector.extract_strided_slice %2 {offsets = [0, 0], sizes = [17, 32], strides = [1, 1]} : vector<32x64xf32> to vector<17x32xf32>
    %10 = vector.extract_strided_slice %2 {offsets = [0, 32], sizes = [32, 32], strides = [1, 1]} : vector<32x64xf32> to vector<32x32xf32>
    %cst = arith.constant dense<0.000000e+00> : vector<128x32xf32>
    %11 = tpu.matmul %3, %9, %cst {dimension_numbers = #tpu.dot_dimension_numbers<[1], [0], [0], [1], [0, 0, 1, 1], [], []>} : vector<128x17xf32>, vector<17x32xf32>, vector<128x32xf32> -> vector<128x32xf32>
    %12 = math.tanh %11 : vector<128x32xf32>
    %cst_4 = arith.constant dense<0.000000e+00> : vector<128x32xf32>
    %13 = tpu.matmul %12, %10, %cst_4 {dimension_numbers = #tpu.dot_dimension_numbers<[1], [0], [0], [1], [0, 0, 1, 1], [], []>} : vector<128x32xf32>, vector<32x32xf32>, vector<128x32xf32> -> vector<128x32xf32>
    %14 = vector.extract_strided_slice %13 {offsets = [0, 0], sizes = [128, 16], strides = [1, 1]} : vector<128x32xf32> to vector<128x16xf32>
    %15 = vector.extract_strided_slice %13 {offsets = [0, 16], sizes = [128, 16], strides = [1, 1]} : vector<128x32xf32> to vector<128x16xf32>
    %cst_5 = arith.constant 0.000000e+00 : f32
    %16 = vector.broadcast %cst_5 : f32 to vector<128x16xf32>
    %17 = arith.maximumf %15, %16 : vector<128x16xf32>
    %18 = math.absf %15 : vector<128x16xf32>
    %cst_6 = arith.constant 0.000000e+00 : f32
    %19 = vector.broadcast %cst_6 : f32 to vector<128x16xf32>
    %20 = arith.subf %19, %18 : vector<128x16xf32>
    %21 = math.exp %20 : vector<128x16xf32>
    %cst_7 = arith.constant 1.000000e+00 : f32
    %22 = vector.broadcast %cst_7 : f32 to vector<128x16xf32>
    %23 = arith.addf %22, %21 : vector<128x16xf32>
    %24 = math.log %23 : vector<128x16xf32>
    %25 = arith.addf %17, %24 : vector<128x16xf32>
    %cst_8 = arith.constant 1.000000e-03 : f32
    %26 = vector.broadcast %cst_8 : f32 to vector<128x16xf32>
    %27 = arith.addf %25, %26 : vector<128x16xf32>
    %28 = arith.mulf %27, %4 : vector<128x16xf32>
    %29 = arith.addf %14, %28 : vector<128x16xf32>
    %c0_9 = arith.constant 0 : index
    %c0_10 = arith.constant 0 : index
    %30 = vector.load %arg3[%c0_9, %c0_10] : memref<16x16xf32, #tpu.memory_space<vmem>>, vector<16x16xf32>
    %cst_11 = arith.constant dense<0.000000e+00> : vector<128x16xf32>
    %31 = tpu.matmul %29, %30, %cst_11 {dimension_numbers = #tpu.dot_dimension_numbers<[1], [0], [0], [1], [0, 0, 1, 1], [], []>} : vector<128x16xf32>, vector<16x16xf32>, vector<128x16xf32> -> vector<128x16xf32>
    %32 = vector.extract_strided_slice %31 {offsets = [0, 0], sizes = [128, 8], strides = [1, 1]} : vector<128x16xf32> to vector<128x8xf32>
    %33 = vector.broadcast %5 : vector<128x1xf32> to vector<128x8xf32>
    %34 = arith.addf %32, %33 : vector<128x8xf32>
    %35 = vector.extract_strided_slice %31 {offsets = [0, 8], sizes = [128, 8], strides = [1, 1]} : vector<128x16xf32> to vector<128x8xf32>
    %36 = vector.broadcast %6 : vector<128x1xf32> to vector<128x8xf32>
    %37 = arith.addf %35, %36 : vector<128x8xf32>
    %38 = vector.broadcast %7 : vector<128x1xf32> to vector<128x8xf32>
    %39 = arith.subf %38, %34 : vector<128x8xf32>
    %40 = vector.broadcast %8 : vector<128x1xf32> to vector<128x8xf32>
    %41 = arith.subf %40, %37 : vector<128x8xf32>
    %42 = arith.mulf %39, %39 : vector<128x8xf32>
    %43 = arith.mulf %41, %41 : vector<128x8xf32>
    %44 = arith.addf %42, %43 : vector<128x8xf32>
    %45 = math.sqrt %44 : vector<128x8xf32>
    %46 = tpu.concatenate %34, %37 in 1 : vector<128x8xf32>, vector<128x8xf32> -> vector<128x16xf32>
    %c0_12 = arith.constant 0 : index
    %c0_13 = arith.constant 0 : index
    %47 = vector.load %arg4[%c0_12, %c0_13] : memref<128x128xf32, #tpu.memory_space<vmem>>, vector<128x128xf32>
    %cst_14 = arith.constant dense<0.000000e+00> : vector<128x16xf32>
    %48 = tpu.matmul %47, %46, %cst_14 {dimension_numbers = #tpu.dot_dimension_numbers<[1], [0], [0], [1], [0, 0, 1, 1], [], []>} : vector<128x128xf32>, vector<128x16xf32>, vector<128x16xf32> -> vector<128x16xf32>
    %49 = vector.extract_strided_slice %48 {offsets = [0, 0], sizes = [128, 8], strides = [1, 1]} : vector<128x16xf32> to vector<128x8xf32>
    %50 = arith.subf %34, %49 : vector<128x8xf32>
    %51 = vector.extract_strided_slice %48 {offsets = [0, 8], sizes = [128, 8], strides = [1, 1]} : vector<128x16xf32> to vector<128x8xf32>
    %52 = arith.subf %37, %51 : vector<128x8xf32>
    %53 = arith.mulf %50, %50 : vector<128x8xf32>
    %54 = arith.mulf %52, %52 : vector<128x8xf32>
    %55 = arith.addf %53, %54 : vector<128x8xf32>
    %56 = math.sqrt %55 : vector<128x8xf32>
    %cst_15 = arith.constant 2.000000e-01 : f32
    %57 = vector.broadcast %cst_15 : f32 to vector<128x8xf32>
    %58 = arith.subf %57, %56 : vector<128x8xf32>
    %cst_16 = arith.constant 1.500000e+01 : f32
    %59 = vector.broadcast %cst_16 : f32 to vector<128x8xf32>
    %60 = arith.mulf %58, %59 : vector<128x8xf32>
    %cst_17 = arith.constant 0.000000e+00 : f32
    %61 = vector.broadcast %cst_17 : f32 to vector<128x8xf32>
    %62 = arith.subf %61, %60 : vector<128x8xf32>
    %63 = math.exp %62 : vector<128x8xf32>
    %cst_18 = arith.constant 1.000000e+00 : f32
    %64 = vector.broadcast %cst_18 : f32 to vector<128x8xf32>
    %65 = arith.addf %64, %63 : vector<128x8xf32>
    %cst_19 = arith.constant 1.000000e+00 : f32
    %66 = vector.broadcast %cst_19 : f32 to vector<128x8xf32>
    %67 = arith.divf %66, %65 : vector<128x8xf32>
    %68 = arith.subf %29, %14 : vector<128x16xf32>
    %69 = arith.divf %68, %27 : vector<128x16xf32>
    %70 = math.log %27 : vector<128x16xf32>
    %cst_20 = arith.constant 0.918938517 : f32
    %71 = vector.broadcast %cst_20 : f32 to vector<128x16xf32>
    %72 = arith.addf %71, %70 : vector<128x16xf32>
    %cst_21 = arith.constant 5.000000e-01 : f32
    %73 = vector.broadcast %cst_21 : f32 to vector<128x16xf32>
    %74 = arith.mulf %73, %69 : vector<128x16xf32>
    %75 = arith.mulf %74, %69 : vector<128x16xf32>
    %76 = arith.addf %72, %75 : vector<128x16xf32>
    %77 = vector.extract_strided_slice %76 {offsets = [0, 0], sizes = [128, 8], strides = [1, 1]} : vector<128x16xf32> to vector<128x8xf32>
    %78 = vector.extract_strided_slice %76 {offsets = [0, 8], sizes = [128, 8], strides = [1, 1]} : vector<128x16xf32> to vector<128x8xf32>
    %79 = arith.addf %77, %78 : vector<128x8xf32>
    %80 = tpu.concatenate %29, %45, %67, %79 in 1 : vector<128x16xf32>, vector<128x8xf32>, vector<128x8xf32>, vector<128x8xf32> -> vector<128x40xf32>
    %c0_22 = arith.constant 0 : index
    %c0_23 = arith.constant 0 : index
    %81 = vector.load %arg5[%c0_22, %c0_23] : memref<64x128xf32, #tpu.memory_space<vmem>>, vector<64x128xf32>
    %cst_24 = arith.constant dense<0.000000e+00> : vector<64x40xf32>
    %82 = tpu.matmul %81, %80, %cst_24 {dimension_numbers = #tpu.dot_dimension_numbers<[1], [0], [0], [1], [0, 0, 1, 1], [], []>} : vector<64x128xf32>, vector<128x40xf32>, vector<64x40xf32> -> vector<64x40xf32>
    %83 = vector.extract_strided_slice %82 {offsets = [0, 0], sizes = [32, 16], strides = [1, 1]} : vector<64x40xf32> to vector<32x16xf32>
    %84 = vector.extract_strided_slice %82 {offsets = [0, 16], sizes = [32, 8], strides = [1, 1]} : vector<64x40xf32> to vector<32x8xf32>
    %cst_25 = arith.constant dense<0.000000e+00> : vector<32xf32>
    %85 = vector.multi_reduction <add>, %84, %cst_25 [1] : vector<32x8xf32> to vector<32xf32>
    %86 = vector.shape_cast %85 : vector<32xf32> to vector<32x1xf32>
    %87 = vector.extract_strided_slice %82 {offsets = [32, 24], sizes = [32, 8], strides = [1, 1]} : vector<64x40xf32> to vector<32x8xf32>
    %cst_26 = arith.constant dense<0.000000e+00> : vector<32xf32>
    %88 = vector.multi_reduction <add>, %87, %cst_26 [1] : vector<32x8xf32> to vector<32xf32>
    %89 = vector.shape_cast %88 : vector<32xf32> to vector<32x1xf32>
    %90 = vector.extract_strided_slice %82 {offsets = [0, 32], sizes = [32, 8], strides = [1, 1]} : vector<64x40xf32> to vector<32x8xf32>
    %cst_27 = arith.constant dense<0.000000e+00> : vector<32xf32>
    %91 = vector.multi_reduction <add>, %90, %cst_27 [1] : vector<32x8xf32> to vector<32xf32>
    %92 = vector.shape_cast %91 : vector<32xf32> to vector<32x1xf32>
    %93 = tpu.concatenate %83, %86, %89, %92 in 1 : vector<32x16xf32>, vector<32x1xf32>, vector<32x1xf32>, vector<32x1xf32> -> vector<32x19xf32>
    %c0_28 = arith.constant 0 : index
    %c0_29 = arith.constant 0 : index
    %c0_30 = arith.constant 0 : index
    %94 = vector.load %arg6[%c0_28, %c0_29, %c0_30] : memref<1x32x19xf32, #tpu.memory_space<vmem>>, vector<1x32x19xf32>
    %95 = vector.shape_cast %94 : vector<1x32x19xf32> to vector<32x19xf32>
    %96 = vector.shape_cast %93 : vector<32x19xf32> to vector<1x32x19xf32>
    tpu.vector_store %arg6[%c0_28, %c0_29, %c0_30], %96 {strides = array<i32>} : memref<1x32x19xf32, #tpu.memory_space<vmem>>, vector<1x32x19xf32>,
    return
  }
  func.func @transform_0(%arg0: i32) -> (i32, i32, i32) {
    %c0_i32 = arith.constant 0 : i32
    %c0_i32_0 = arith.constant 0 : i32
    %c0_i32_1 = arith.constant 0 : i32
    return %arg0, %c0_i32, %c0_i32_0 : i32, i32, i32
  }
  func.func @transform_1(%arg0: i32) -> (i32, i32) {
    %c0_i32 = arith.constant 0 : i32
    %c0_i32_0 = arith.constant 0 : i32
    %c0_i32_1 = arith.constant 0 : i32
    return %c0_i32, %c0_i32_0 : i32, i32
  }
  func.func @transform_2(%arg0: i32) -> (i32, i32) {
    %c0_i32 = arith.constant 0 : i32
    %c0_i32_0 = arith.constant 0 : i32
    %c0_i32_1 = arith.constant 0 : i32
    return %c0_i32, %c0_i32_0 : i32, i32
  }
  func.func @transform_3(%arg0: i32) -> (i32, i32) {
    %c0_i32 = arith.constant 0 : i32
    %c0_i32_0 = arith.constant 0 : i32
    %c0_i32_1 = arith.constant 0 : i32
    return %c0_i32, %c0_i32_0 : i32, i32
  }
  func.func @transform_4(%arg0: i32) -> (i32, i32) {
    %c0_i32 = arith.constant 0 : i32
    %c0_i32_0 = arith.constant 0 : i32
    %c0_i32_1 = arith.constant 0 : i32
    return %c0_i32, %c0_i32_0 : i32, i32
  }
  func.func @transform_5(%arg0: i32) -> (i32, i32, i32) {
    %c0_i32 = arith.constant 0 : i32
    %c0_i32_0 = arith.constant 0 : i32
    %c0_i32_1 = arith.constant 0 : i32
    return %arg0, %c0_i32, %c0_i32_0 : i32, i32, i32
  }
}

</mosaic_0001>

<bundles_post_ra>
// kernel: eq.66
= control target key start
LH: loop header
LB: loop body
LE: loop exit
PB: predicated region body
PF: predicated region fallthrough
CT: control target
= control target key end

     0   :  { %s69_s10 = smov 28   ;;  %s70_s11 = smov 20   ;;  %vm3_vm0 = vcmask 31744   ;;  %vm9_vm1 = vcmask 261344   ;;  %vm15_vm2 = vcmask 228544   ;;  %vm21_vm3 = vcmask 195744   ;;  %s113_s0 = inlined_call_operand.vmem [shape: s32[8,4], index: 0, kind: input, shape index: {}]   ;;  %s114_s1 = inlined_call_operand.vmem [shape: s32[32], index: 1, kind: output, shape index: {}]  }
   0x1   :  { %v55_v0 = vld [vmem:[%s113_s0 + $0x7] sm:$0x1]   ;;  %v57_v1 = vld [vmem:[%s113_s0 + $0x5] sm:$0x1]   ;;  %v56_v2 = vld [vmem:[%s113_s0 + $0x6] sm:$0x1]  }
   0x2   :  { %7 = vrot.lane.b32.xlu0 %v55_v0, %s69_s10  ;;  %19 = vrot.lane.b32.xlu1 %v57_v1, %s70_s11  ;;  %v58_v3 = vld [vmem:[%s113_s0 + $0x4] sm:$0x1]   ;;  %v2_v4 = vld [vmem:[%s113_s0] sm:$0x1]   ;;  %s71_s18 = smov 24   ;;  %s72_s19 = smov 16  }
   0x3   :  { %4 = vst.msk [vmem:[#allocation0] sm:$0x1] %vm3_vm0, %v2_v4   ;;  %v59_v5 = vld [vmem:[%s113_s0 + $0x3] sm:$0x1]   ;;  %v60_v6 = vld [vmem:[%s113_s0 + $0x2] sm:$0x1]  }
   0x4   :  { %s73_s24 = smov 12   ;;  %s74_s25 = smov 8   ;;  %v61_v7 = vld [vmem:[%s113_s0 + $0x1] sm:$0x1]   ;;  %vm27_vm4 = vcmask 162944   ;;  %vm33_vm5 = vcmask 130144  }
   0x5   :  { %s75_s0 = smov 4   ;;  %vm39_vm6 = vcmask 97344   ;;  %vm45_vm7 = vcmask 64544  }
   0x6   :  { %13 = vrot.lane.b32.xlu0 %v56_v2, %s71_s18  ;;  %25 = vrot.lane.b32.xlu1 %v58_v3, %s72_s19 }
   0xa   :  { %31 = vrot.lane.b32.xlu0 %v59_v5, %s73_s24  ;;  %37 = vrot.lane.b32.xlu1 %v60_v6, %s74_s25 }
   0xe   :  { %43 = vrot.lane.b32.xlu0 %v61_v7, %s75_s0 }
  0x74   :  { %v8_v8 = vpop.permute.xlu0 %7   ;;  %v20_v9 = vpop.permute.xlu1 %19  }
  0x75   :  { %10 = vst.msk [vmem:[#allocation0] sm:$0x1] %vm9_vm1, %v8_v8  }
  0x78   :  { %v14_v10 = vpop.permute.xlu0 %13   ;;  %v26_v11 = vpop.permute.xlu1 %25  }
  0x79   :  { %16 = vst.msk [vmem:[#allocation0] sm:$0x1] %vm15_vm2, %v14_v10  }
  0x7a   :  { %22 = vst.msk [vmem:[#allocation0] sm:$0x1] %vm21_vm3, %v20_v9  }
  0x7b   :  { %28 = vst.msk [vmem:[#allocation0] sm:$0x1] %vm27_vm4, %v26_v11  }
  0x7c   :  { %v32_v12 = vpop.permute.xlu0 %31   ;;  %v38_v13 = vpop.permute.xlu1 %37  }
  0x7d   :  { %34 = vst.msk [vmem:[#allocation0] sm:$0x1] %vm33_vm5, %v32_v12  }
  0x7e   :  { %40 = vst.msk [vmem:[#allocation0] sm:$0x1] %vm39_vm6, %v38_v13  }
  0x80   :  { %v44_v14 = vpop.permute.xlu0 %43  }
  0x81   :  { %46 = vst.msk [vmem:[#allocation0] sm:$0x1] %vm45_vm7, %v44_v14  }
  0x88   :  { %v51_v15 = vld [vmem:[#allocation0] sm:$0x1] }
  0x89   :  { %54 = vst [vmem:[%s114_s1] sm:$0x1] %v51_v15 }

// kernel: prediction_model_forward.1
= control target key start
LH: loop header
LB: loop body
LE: loop exit
PB: predicated region body
PF: predicated region fallthrough
CT: control target
= control target key end

     0   :  { %s3896_s18 = smov 0   ;;  %s5679_s0 = inlined_call_operand.vmem [shape: f32[2,128,37], index: 0, kind: input, shape index: {}]   ;;  %s5680_s1 = inlined_call_operand.vmem [shape: f32[32,64], index: 1, kind: input, shape index: {}]   ;;  %s5681_s2 = inlined_call_operand.vmem [shape: f32[16,16], index: 2, kind: input, shape index: {}]   ;;  %s5682_s3 = inlined_call_operand.vmem [shape: f32[128,128], index: 3, kind: input, shape index: {}]   ;;  %s5683_s4 = inlined_call_operand.vmem [shape: f32[64,128], index: 4, kind: input, shape index: {}]   ;;  %s5684_s5 = inlined_call_operand.vmem [shape: f32[2,32,19], index: 5, kind: output, shape index: {}]  }
   0x1 LB: > { %s3133_s19 = sadd.s32 4294967295, %s3853_s18   ;;  %p3137_p0 = scmp.ge.s32.totalorder %s3853_s18, 1  ;;  %s3853_s18 = sphi %s3896_s18, %s15_s18  }
   0x2   : > { %p187_p1 = scmp.lt.s32.totalorder %s3853_s18, 3 }
   0x4   : > { %p188_p2 = pnand %p3137_p0, %p187_p1 }
   0x6   : > { %191 = sbr.rel (%p188_p2) target bundleno = 1917 (0x77d), region = 40 }
   0xb   : > { %v243_v0 = vld [vmem:[%s5680_s1 + $0x10] sm:$0xff]  ;;  %vm294_vm0 = vcmask 1040384   ;;  %v242_v1 = vld [vmem:[%s5680_s1 + $0x8] sm:$0xff]  ;;  %p215_p3 = scmp.lt.s32.totalorder %s3133_s19, 1  ;;  %v241_v2 = vld [vmem:[%s5680_s1] sm:$0xff]  ;;  %vm245_vm1 = vcmask 138240  }
   0xc   : > { %3308 = vmatprep.subr.msk.mxu0 %vm294_vm0, %v243_v0  ;;  %3498 = vmatprep.subr.msk.mxu1 %vm294_vm0, %v243_v0  ;;  %v244_v3 = vld [vmem:[%s5680_s1 + $0x18] sm:$0xff]  ;;  %s3855_s7 = smov 96   ;;  %s3856_s8 = smov 127   ;;  %vm474_vm2 = vcmask 261120   ;;  %v5685_v56 = vmov 34   ;;  %vm974_vm3 = vcmask 130048  }
   0xd   : > { %3309 = vmatpush3.msk.msra.mxu0 %vm294_vm0, %v243_v0  ;;  %s5922_s19 = smov (!%p215_p3, %s3133_s19), 1  ;;  %3501 = vmatpush3.msk.msra.mxu1 %vm294_vm0, %v243_v0  ;;  %s3858_s13 = smov 112   ;;  %vm1712_vm4 = vcmask 64512  }
   0xe   : > { %3310 = vmatprep.subr.mxu0 %v242_v1  ;;  %3499 = vmatprep.subr.mxu1 %v242_v1  ;;  %s3193_s26 = sshll.u32 %s5922_s19, 7  ;;  %s3862_s16 = smov 16  }
   0xf   : > { %3311 = vmatpush3.msra.mxu0 %v242_v1  ;;  %3502 = vmatpush3.msra.mxu1 %v242_v1  ;;  %s3922_s6 = scalar_lea.vmem %s5679_s0, %s3193_s26  ;;  %s3863_s17 = smov 120  }
  0x10   : > { %3312 = vmatprep.subr.mxu0 %v241_v2  ;;  %3500 = vmatprep.subr.mxu1 %v241_v2  ;;  %v3925_v4 = vld [vmem:[%s3922_s6] sm:$0xff]  ;;  %v3928_v5 = vld [vmem:[%s3922_s6 + $0x8] sm:$0xff]  ;;  %v3931_v6 = vld [vmem:[%s3922_s6 + $0x10] sm:$0xff]  ;;  %s3865_s28 = smov 104  }
  0x11   : > { %3313 = vmatpush3.msra.mxu0 %v241_v2  ;;  %3503 = vmatpush3.msra.mxu1 %v241_v2  ;;  %v3942_v7 = vld [vmem:[%s3922_s6 + $0x18] sm:$0xff]  ;;  %v3945_v8 = vld [vmem:[%s3922_s6 + $0x20] sm:$0xff]  ;;  %v3951_v10 = vld [vmem:[%s3922_s6 + $0x68] sm:$0xff] }
  0x12   : > { %3314 = vmatprep.mubr.msk.f32.mxu0 %vm245_vm1, %v3925_v4  ;;  %468 = vrot.lane.b32.xlu0 %v244_v3, %s3855_s7  ;;  %v3948_v9 = vld [vmem:[%s3922_s6 + $0x60] sm:$0xff]  ;;  %v3954_v11 = vld [vmem:[%s3922_s6 + $0x70] sm:$0xff]  ;;  %v3966_v12 = vld [vmem:[%s3922_s6 + $0x28] sm:$0xff] }
  0x13   : > { %3315 = vmatmul.mubr.msk.f32.vlgmr.msra.gmra.mxu0 %vm245_vm1, %v3928_v5  ;;  %464 = vrot.lane.b32.xlu1 %v242_v1, %s3855_s7  ;;  %v3971_v13 = vld [vmem:[%s3922_s6 + $0x78] sm:$0xff]  ;;  %v3974_v14 = vld [vmem:[%s3922_s6 + $0x30] sm:$0xff]  ;;  %v3987_v16 = vld [vmem:[%s3922_s6 + $0x40] sm:$0xff] }
  0x14   : > { %3317 = vmatprep.mubr.msk.f32.mxu0 %vm245_vm1, %v3931_v6  ;;  %3332 = vmatprep.mubr.msk.f32.mxu1 %vm245_vm1, %v3948_v9  ;;  %v3984_v15 = vld [vmem:[%s3922_s6 + $0x38] sm:$0xff]  ;;  %v3994_v17 = vld [vmem:[%s3922_s6 + $0x48] sm:$0xff]  ;;  %v3997_v18 = vld [vmem:[%s3922_s6 + $0x50] sm:$0xff] }
  0x15   : > { %3333 = vmatmul.mubr.msk.f32.vlgmr.msra.gmra.mxu1 %vm245_vm1, %v3951_v10  ;;  %v4004_v19 = vld [vmem:[%s3922_s6 + $0x58] sm:$0xff]  ;;  %3523 = vset.pattern.permute.xlu1 %v5685_v56 }
  0x16   : > { %466 = vrot.lane.b32.xlu0 %v243_v0, %s3855_s7  ;;  %3335 = vmatprep.mubr.msk.f32.mxu1 %vm245_vm1, %v3954_v11 }
  0x17   : > { %3318 = vmatmul.mubr.msk.f32.gmra.mxu0 %vm245_vm1, %v3942_v7  ;;  %462 = vrot.lane.b32.xlu1 %v241_v2, %s3855_s7 }
  0x18   : > { %3320 = vmatprep.mubr.msk.f32.mxu0 %vm245_vm1, %v3945_v8  ;;  %3525 = vset.pattern.permute.xlu0 %v5685_v56 }
  0x19   : > { %3336 = vmatmul.mubr.msk.f32.gmra.mxu1 %vm245_vm1, %v3971_v13 }
  0x1a   : > { %828 = vrot.lane.b32.xlu0 %v3925_v4, %s3856_s8 }
  0x1b   : > { %3321 = vmatmul.mubr.msk.f32.gmra.mxu0 %vm245_vm1, %v3966_v12  ;;  %830 = vrot.lane.b32.xlu1 %v3928_v5, %s3856_s8 }
  0x1c   : > { %3323 = vmatprep.mubr.msk.f32.mxu0 %vm245_vm1, %v3974_v14 }
  0x1e   : > { %832 = vrot.lane.b32.xlu0 %v3931_v6, %s3856_s8 }
  0x1f   : > { %3324 = vmatmul.mubr.msk.f32.gmra.mxu0 %vm245_vm1, %v3984_v15  ;;  %834 = vrot.lane.b32.xlu1 %v3942_v7, %s3856_s8 }
  0x20   : > { %3326 = vmatprep.mubr.msk.f32.mxu0 %vm245_vm1, %v3987_v16 }
  0x22   : > { %836 = vrot.lane.b32.xlu0 %v3945_v8, %s3856_s8 }
  0x23   : > { %3327 = vmatmul.mubr.msk.f32.gmra.mxu0 %vm245_vm1, %v3994_v17  ;;  %838 = vrot.lane.b32.xlu1 %v3966_v12, %s3856_s8 }
  0x24   : > { %3329 = vmatprep.mubr.msk.f32.mxu0 %vm245_vm1, %v3997_v18 }
  0x26   : > { %840 = vrot.lane.b32.xlu0 %v3974_v14, %s3856_s8 }
  0x27   : > { %3330 = vmatmul.mubr.msk.f32.gmra.mxu0 %vm245_vm1, %v4004_v19  ;;  %842 = vrot.lane.b32.xlu1 %v3984_v15, %s3856_s8 }
  0x2a   : > { %844 = vrot.lane.b32.xlu0 %v3987_v16, %s3856_s8 }
  0x2b   : > { %846 = vrot.lane.b32.xlu1 %v3994_v17, %s3856_s8 }
  0x2e   : > { %848 = vrot.lane.b32.xlu0 %v3997_v18, %s3856_s8 }
  0x2f   : > { %850 = vrot.lane.b32.xlu1 %v4004_v19, %s3856_s8 }
  0x32   : > { %852 = vrot.lane.b32.xlu0 %v3948_v9, %s3856_s8 }
  0x33   : > { %854 = vrot.lane.b32.xlu1 %v3951_v10, %s3856_s8 }
  0x36   : > { %856 = vrot.lane.b32.xlu0 %v3954_v11, %s3856_s8 }
  0x37   : > { %858 = vrot.lane.b32.xlu1 %v3971_v13, %s3856_s8 }
  0x84   : > { %v469_v20 = vpop.permute.xlu0 %468 }
  0x85   : > { %3338 = vmatprep.subr.mxu1 %v469_v20  ;;  %v465_v21 = vpop.permute.xlu1 %464 }
  0x86   : > { %3339 = vmatpush3.msra.mxu1 %v469_v20 }
  0x88   : > { %v467_v22 = vpop.permute.xlu0 %466 }
  0x89   : > { %3340 = vmatprep.subr.mxu1 %v467_v22  ;;  %v463_v23 = vpop.permute.xlu1 %462 }
  0x8a   : > { %3341 = vmatpush3.msra.mxu1 %v467_v22 }
  0x8b   : > { %3342 = vmatprep.subr.mxu1 %v465_v21 }
  0x8c   : > { %3343 = vmatpush3.msra.mxu1 %v465_v21 }
  0x8d   : > { %3344 = vmatprep.subr.mxu1 %v463_v23 }
  0x8e   : > { %3345 = vmatpush3.msra.mxu1 %v463_v23 }
  0xd3   : > { %v3316_v24 = vpop.f32.mrf.mxu0 }
  0xd5   : > { %v364_v25 = vpop.f32.mrf.mxu0  ;;  %v3334_v31 = vpop.f32.mrf.mxu1 }
  0xd6   : > { %3543 = vtanh.f32 %v364_v25 }
  0xd7   : > { %3545 = vtanh.f32 %v3316_v24  ;;  %v3319_v26 = vpop.f32.mrf.mxu0  ;;  %v424_v35 = vpop.f32.mrf.mxu1 }
  0xd9   : > { %v374_v27 = vpop.f32.mrf.mxu0  ;;  %v3337_v40 = vpop.f32.mrf.mxu1 }
  0xda   : > { %3547 = vtanh.f32 %v374_v27 }
  0xdb   : > { %3549 = vtanh.f32 %v3319_v26  ;;  %v3322_v28 = vpop.f32.mrf.mxu0  ;;  %v434_v44 = vpop.f32.mrf.mxu1 }
  0xdd   : > { %v384_v29 = vpop.f32.mrf.mxu0 }
  0xde   : > { %3551 = vtanh.f32 %v384_v29 }
  0xdf   : > { %3553 = vtanh.f32 %v3322_v28  ;;  %v3325_v30 = vpop.f32.mrf.mxu0 }
  0xe1   : > { %v394_v32 = vpop.f32.mrf.mxu0 }
  0xe2   : > { %3555 = vtanh.f32 %v394_v32 }
  0xe3   : > { %v3544_v33 = vpop.eup %3543  ;;  %3557 = vtanh.f32 %v3325_v30  ;;  %v3328_v34 = vpop.f32.mrf.mxu0 }
  0xe4   : > { %v3546_v36 = vpop.eup %3545  ;;  %3346 = vmatprep.mubr.msk.f32.mxu1 %vm474_vm2, %v3544_v33 }
  0xe5   : > { %v404_v37 = vpop.f32.mrf.mxu0  ;;  %3347 = vmatmul.mubr.msk.f32.vlgmr.msra.gmra.mxu1 %vm474_vm2, %v3546_v36 }
  0xe6   : > { %3559 = vtanh.f32 %v404_v37  ;;  %v973_v37 = vld [vmem:[%s5681_s2 + $0x8] sm:$0xff] }
  0xe7   : > { %v3548_v38 = vpop.eup %3547  ;;  %3561 = vtanh.f32 %v3328_v34  ;;  %v3331_v39 = vpop.f32.mrf.mxu0  ;;  %3370 = vmatprep.subr.mxu0 %v973_v37 }
  0xe8   : > { %v3550_v41 = vpop.eup %3549  ;;  %3349 = vmatprep.mubr.msk.f32.mxu1 %vm474_vm2, %v3548_v38  ;;  %3563 = vtanh.f32 %v424_v35  ;;  %3371 = vmatpush3.msra.mxu0 %v973_v37 }
  0xe9   : > { %v414_v42 = vpop.f32.mrf.mxu0  ;;  %3350 = vmatmul.mubr.msk.f32.gmra.mxu1 %vm474_vm2, %v3550_v41 }
  0xea   : > { %3565 = vtanh.f32 %v414_v42 }
  0xeb   : > { %v3552_v43 = vpop.eup %3551  ;;  %3567 = vtanh.f32 %v3331_v39 }
  0xec   : > { %v3554_v45 = vpop.eup %3553  ;;  %3352 = vmatprep.mubr.msk.f32.mxu1 %vm474_vm2, %v3552_v43  ;;  %3569 = vtanh.f32 %v434_v44 }
  0xed   : > { %3353 = vmatmul.mubr.msk.f32.gmra.mxu1 %vm474_vm2, %v3554_v45  ;;  %3571 = vtanh.f32 %v3334_v31 }
  0xee   : > { %3573 = vtanh.f32 %v3337_v40 }
  0xef   : > { %v3556_v46 = vpop.eup %3555 }
  0xf0   : > { %v3558_v47 = vpop.eup %3557  ;;  %3355 = vmatprep.mubr.msk.f32.mxu1 %vm474_vm2, %v3556_v46 }
  0xf1   : > { %3356 = vmatmul.mubr.msk.f32.gmra.mxu1 %vm474_vm2, %v3558_v47 }
  0xf3   : > { %v3560_v48 = vpop.eup %3559 }
  0xf4   : > { %v3562_v49 = vpop.eup %3561  ;;  %3358 = vmatprep.mubr.msk.f32.mxu1 %vm474_vm2, %v3560_v48 }
  0xf5   : > { %3359 = vmatmul.mubr.msk.f32.gmra.mxu1 %vm474_vm2, %v3562_v49  ;;  %v3564_v50 = vpop.eup %3563 }
  0xf7   : > { %v3566_v51 = vpop.eup %3565 }
  0xf8   : > { %v3568_v52 = vpop.eup %3567  ;;  %3361 = vmatprep.mubr.msk.f32.mxu1 %vm474_vm2, %v3566_v51 }
  0xf9   : > { %3362 = vmatmul.mubr.msk.f32.gmra.mxu1 %vm474_vm2, %v3568_v52  ;;  %v3570_v53 = vpop.eup %3569 }
  0xfa   : > { %3364 = vmatprep.mubr.msk.f32.mxu1 %vm474_vm2, %v3564_v50  ;;  %v3572_v54 = vpop.eup %3571 }
  0xfb   : > { %v3574_v55 = vpop.eup %3573 }
  0xfd   : > { %3365 = vmatmul.mubr.msk.f32.gmra.mxu1 %vm474_vm2, %v3572_v54 }
  0xfe   : > { %3367 = vmatprep.mubr.msk.f32.mxu1 %vm474_vm2, %v3570_v53 }
 0x101   : > { %3368 = vmatmul.mubr.msk.f32.gmra.mxu1 %vm474_vm2, %v3574_v55 }
 0x1a5   : > { %v4042_v57 = vpop.f32.mrf.mxu1 }
 0x1a6   : > { %v685_v58 = vand.u32 2147483647, %v4042_v57 }
 0x1a7   : > { %v4045_v59 = vpop.f32.mrf.mxu1 }
 0x1a8   : > { %v701_v60 = vsub.f32 0.0, %v685_v58  ;;  %v684_v61 = vand.u32 2147483647, %v4045_v59 }
 0x1a9   : > { %v4048_v62 = vpop.f32.mrf.mxu1 }
 0x1aa   : > { %v718_v63 = vmul.f32 1.442695, %v701_v60  ;;  %v700_v0 = vsub.f32 0.0, %v684_v61  ;;  %v687_v1 = vand.u32 2147483647, %v4048_v62 }
 0x1ab   : > { %v4051_v2 = vpop.f32.mrf.mxu1 }
 0x1ac   : > { %3575 = vpow2.f32 %v718_v63  ;;  %v716_v3 = vmul.f32 1.442695, %v700_v0  ;;  %v703_v20 = vsub.f32 0.0, %v687_v1  ;;  %v686_v21 = vand.u32 2147483647, %v4051_v2 }
 0x1ad   : > { %v4054_v22 = vpop.f32.mrf.mxu1 }
 0x1ae   : > { %3577 = vpow2.f32 %v716_v3  ;;  %v722_v23 = vmul.f32 1.442695, %v703_v20  ;;  %v689_v24 = vand.u32 2147483647, %v4054_v22  ;;  %v702_v25 = vsub.f32 0.0, %v686_v21  ;;  %v972_v20 = vld [vmem:[%s5681_s2] sm:$0xff] }
 0x1af   : > { %v4057_v26 = vpop.f32.mrf.mxu1  ;;  %3372 = vmatprep.subr.mxu0 %v972_v20 }
 0x1b0   : > { %3579 = vpow2.f32 %v722_v23  ;;  %v705_v27 = vsub.f32 0.0, %v689_v24  ;;  %v688_v28 = vand.u32 2147483647, %v4057_v26  ;;  %v720_v29 = vmul.f32 1.442695, %v702_v25  ;;  %3373 = vmatpush3.msra.mxu0 %v972_v20 }
 0x1b1   : > { %v4060_v30 = vpop.f32.mrf.mxu1  ;;  %v669_v20 = vmax.f32 %v4042_v57, 0.0 }
 0x1b2   : > { %v726_v31 = vmul.f32 1.442695, %v705_v27  ;;  %v704_v32 = vsub.f32 0.0, %v688_v28  ;;  %v691_v33 = vand.u32 2147483647, %v4060_v30  ;;  %3581 = vpow2.f32 %v720_v29 }
 0x1b3   : > { %v4063_v34 = vpop.f32.mrf.mxu1 }
 0x1b4   : > { %3583 = vpow2.f32 %v726_v31  ;;  %v724_v35 = vmul.f32 1.442695, %v704_v32  ;;  %v707_v36 = vsub.f32 0.0, %v691_v33  ;;  %v690_v38 = vand.u32 2147483647, %v4063_v34 }
 0x1b5   : > { %v4069_v39 = vpop.f32.mrf.mxu1 }
 0x1b6   : > { %3585 = vpow2.f32 %v724_v35  ;;  %v730_v40 = vmul.f32 1.442695, %v707_v36  ;;  %v693_v41 = vand.u32 2147483647, %v4069_v39  ;;  %v706_v42 = vsub.f32 0.0, %v690_v38  ;;  %v831_v35 = vpop.permute.xlu1 %830 }
 0x1b7   : > { %v4072_v43 = vpop.f32.mrf.mxu1 }
 0x1b8   : > { %3587 = vpow2.f32 %v730_v40  ;;  %v709_v44 = vsub.f32 0.0, %v693_v41  ;;  %v692_v45 = vand.u32 2147483647, %v4072_v43  ;;  %v728_v47 = vmul.f32 1.442695, %v706_v42 }
 0x1b9   : > { %v3576_v46 = vpop.eup %3575  ;;  %v4075_v48 = vpop.f32.mrf.mxu1 }
 0x1ba   : > { %v749_v49 = vadd.f32 1.0, %v3576_v46  ;;  %v734_v50 = vmul.f32 1.442695, %v709_v44  ;;  %v708_v51 = vsub.f32 0.0, %v692_v45  ;;  %3589 = vpow2.f32 %v728_v47  ;;  %v829_v44 = vpop.permute.xlu0 %828 }
 0x1bb   : > { %v3578_v52 = vpop.eup %3577  ;;  %v695_v53 = vand.u32 2147483647, %v4075_v48  ;;  %v4078_v54 = vpop.f32.mrf.mxu1 }
 0x1bc   : > { %3591 = vlog2.f32 %v749_v49  ;;  %v748_v55 = vadd.f32 1.0, %v3578_v52  ;;  %v732_v58 = vmul.f32 1.442695, %v708_v51  ;;  %v694_v63 = vand.u32 2147483647, %v4078_v54 }
 0x1bd   : > { %v3580_v60 = vpop.eup %3579  ;;  %3593 = vpow2.f32 %v734_v50  ;;  %v711_v61 = vsub.f32 0.0, %v695_v53  ;;  %v4081_v0 = vpop.f32.mrf.mxu1 }
 0x1be   : > { %3595 = vlog2.f32 %v748_v55  ;;  %v751_v1 = vadd.f32 1.0, %v3580_v60  ;;  %v697_v3 = vand.u32 2147483647, %v4081_v0  ;;  %v710_v23 = vsub.f32 0.0, %v694_v63  ;;  %v835_v55 = vpop.permute.xlu1 %834 }
 0x1bf   : > { %3597 = vpow2.f32 %v732_v58  ;;  %v738_v21 = vmul.f32 1.442695, %v711_v61  ;;  %v4087_v24 = vpop.f32.mrf.mxu1  ;;  %v3582_v25 = vpop.eup %3581 }
 0x1c0   : > { %3599 = vlog2.f32 %v751_v1  ;;  %v713_v27 = vsub.f32 0.0, %v697_v3  ;;  %v696_v28 = vand.u32 2147483647, %v4087_v24  ;;  %v750_v31 = vadd.f32 1.0, %v3582_v25  ;;  %v4096_v1 = vpop.permute.xlu0 %832 }
 0x1c1   : > { %v3584_v29 = vpop.eup %3583  ;;  %3601 = vpow2.f32 %v738_v21  ;;  %v736_v32 = vmul.f32 1.442695, %v710_v23  ;;  %v4090_v33 = vpop.f32.mrf.mxu1 }
 0x1c2   : > { %v753_v36 = vadd.f32 1.0, %v3584_v29  ;;  %v712_v37 = vsub.f32 0.0, %v696_v28  ;;  %3603 = vlog2.f32 %v750_v31  ;;  %v742_v40 = vmul.f32 1.442695, %v713_v27 }
 0x1c3   : > { %v3586_v38 = vpop.eup %3585  ;;  %v699_v41 = vand.u32 2147483647, %v4090_v33  ;;  %v4093_v42 = vpop.f32.mrf.mxu1  ;;  %v668_v28 = vmax.f32 %v4045_v59, 0.0 }
 0x1c4   : > { %3605 = vlog2.f32 %v753_v36  ;;  %v752_v45 = vadd.f32 1.0, %v3586_v38  ;;  %v740_v47 = vmul.f32 1.442695, %v712_v37  ;;  %v698_v50 = vand.u32 2147483647, %v4093_v42  ;;  %v839_v37 = vpop.permute.xlu1 %838 }
 0x1c5   : > { %v3588_v46 = vpop.eup %3587  ;;  %3607 = vpow2.f32 %v736_v32  ;;  %v715_v49 = vsub.f32 0.0, %v699_v41 }
 0x1c6   : > { %3609 = vlog2.f32 %v752_v45  ;;  %v755_v51 = vadd.f32 1.0, %v3588_v46  ;;  %v714_v53 = vsub.f32 0.0, %v698_v50 }
 0x1c7   : > { %3611 = vpow2.f32 %v742_v40  ;;  %v746_v52 = vmul.f32 1.442695, %v715_v49  ;;  %v3590_v58 = vpop.eup %3589  ;;  %v671_v40 = vmax.f32 %v4048_v62, 0.0  ;;  %v837_v49 = vpop.permute.xlu0 %836 }
 0x1c8   : > { %3613 = vlog2.f32 %v755_v51  ;;  %v754_v61 = vadd.f32 1.0, %v3590_v58  ;;  %v744_v63 = vmul.f32 1.442695, %v714_v53 }
 0x1c9   : > { %v3592_v60 = vpop.eup %3591  ;;  %3615 = vpow2.f32 %v740_v47 }
 0x1ca   : > { %v3594_v3 = vpop.eup %3593  ;;  %3617 = vpow2.f32 %v746_v52  ;;  %v767_v21 = vmul.f32 0.6931472, %v3592_v60  ;;  %v670_v60 = vmax.f32 %v4051_v2, 0.0 }
 0x1cb   : > { %v3596_v23 = vpop.eup %3595  ;;  %3619 = vlog2.f32 %v754_v61  ;;  %v757_v25 = vadd.f32 1.0, %v3594_v3  ;;  %v673_v3 = vmax.f32 %v4054_v22, 0.0 }
 0x1cc   : > { %v3598_v27 = vpop.eup %3597  ;;  %3621 = vpow2.f32 %v744_v63  ;;  %v797_v29 = vadd.f32 %v767_v21, %v669_v20  ;;  %v765_v31 = vmul.f32 0.6931472, %v3596_v23 }
 0x1cd   : > { %v3600_v32 = vpop.eup %3599  ;;  %3623 = vlog2.f32 %v757_v25  ;;  %v756_v36 = vadd.f32 1.0, %v3598_v27 }
 0x1ce   : > { %v3602_v38 = vpop.eup %3601  ;;  %v4101_v41 = vadd.f32 0.001, %v797_v29  ;;  %v796_v45 = vadd.f32 %v765_v31, %v668_v28  ;;  %v771_v46 = vmul.f32 0.6931472, %v3600_v32  ;;  %v843_v28 = vpop.permute.xlu1 %842  ;;  %v672_v31 = vmax.f32 %v4057_v26, 0.0 }
 0x1cf   : > { %3625 = vlog2.f32 %v756_v36  ;;  %v759_v47 = vadd.f32 1.0, %v3602_v38  ;;  %v3604_v50 = vpop.eup %3603 }
 0x1d0   : > { %5744 = vst [vmem:[#allocation2_spill] sm:$0xff] %v4101_v41  ;;  %v877_v51 = vmul.f32 %v831_v35, %v4101_v41  ;;  %v4104_v52 = vadd.f32 0.001, %v796_v45  ;;  %v799_v53 = vadd.f32 %v771_v46, %v671_v40  ;;  %v769_v61 = vmul.f32 0.6931472, %v3604_v50  ;;  %v841_v46 = vpop.permute.xlu0 %840 }
 0x1d1   : > { %v3606_v58 = vpop.eup %3605  ;;  %3627 = vlog2.f32 %v759_v47  ;;  %v675_v50 = vmax.f32 %v4060_v30, 0.0 }
 0x1d2   : > { %5745 = vst [vmem:[#allocation3_spill] sm:$0xff] %v4104_v52  ;;  %v3608_v63 = vpop.eup %3607  ;;  %v876_v20 = vmul.f32 %v829_v44, %v4104_v52  ;;  %910 = vrot.lane.b32.xlu1 %v877_v51, %s3858_s13  ;;  %v4110_v21 = vadd.f32 0.001, %v799_v53  ;;  %v775_v23 = vmul.f32 0.6931472, %v3606_v58  ;;  %v798_v27 = vadd.f32 %v769_v61, %v670_v60 }
 0x1d3   : > { %v3610_v35 = vpop.eup %3609  ;;  %v758_v25 = vadd.f32 1.0, %v3608_v63 }
 0x1d4   : > { %5746 = vst [vmem:[#allocation4_spill] sm:$0xff] %v4110_v21  ;;  %v3612_v29 = vpop.eup %3611  ;;  %v879_v32 = vmul.f32 %v835_v55, %v4110_v21  ;;  %908 = vrot.lane.b32.xlu0 %v876_v20, %s3858_s13  ;;  %v801_v36 = vadd.f32 %v775_v23, %v673_v3  ;;  %v773_v38 = vmul.f32 0.6931472, %v3610_v35  ;;  %v4115_v45 = vadd.f32 0.001, %v798_v27 }
 0x1d5   : > { %v3614_v44 = vpop.eup %3613  ;;  %3629 = vlog2.f32 %v758_v25  ;;  %v761_v40 = vadd.f32 1.0, %v3612_v29  ;;  %v674_v27 = vmax.f32 %v4063_v34, 0.0 }
 0x1d6   : > { %5747 = vst [vmem:[#allocation5_spill] sm:$0xff] %v4115_v45  ;;  %v3616_v47 = vpop.eup %3615  ;;  %914 = vrot.lane.b32.xlu1 %v879_v32, %s3858_s13  ;;  %v4119_v51 = vadd.f32 0.001, %v801_v36  ;;  %v800_v53 = vadd.f32 %v773_v38, %v672_v31  ;;  %v779_v58 = vmul.f32 0.6931472, %v3614_v44  ;;  %v878_v61 = vmul.f32 %v4096_v1, %v4115_v45  ;;  %v847_v31 = vpop.permute.xlu1 %846 }
 0x1d7   : > { %v3618_v55 = vpop.eup %3617  ;;  %3631 = vlog2.f32 %v761_v40  ;;  %v760_v60 = vadd.f32 1.0, %v3616_v47  ;;  %v845_v47 = vpop.permute.xlu0 %844 }
 0x1d8   : > { %5748 = vst [vmem:[#allocation6_spill] sm:$0xff] %v4119_v51  ;;  %v3620_v63 = vpop.eup %3619  ;;  %v763_v3 = vadd.f32 1.0, %v3618_v55  ;;  %v881_v20 = vmul.f32 %v839_v37, %v4119_v51  ;;  %v4124_v23 = vadd.f32 0.001, %v800_v53  ;;  %v803_v35 = vadd.f32 %v779_v58, %v675_v50  ;;  %912 = vrot.lane.b32.xlu0 %v878_v61, %s3858_s13 }
 0x1d9   : > { %v3622_v25 = vpop.eup %3621  ;;  %3633 = vlog2.f32 %v760_v60  ;;  %v777_v29 = vmul.f32 0.6931472, %v3620_v63  ;;  %v677_v37 = vmax.f32 %v4069_v39, 0.0  ;;  %v676_v58 = vmax.f32 %v4072_v43, 0.0 }
 0x1da   : > { %5749 = vst [vmem:[#allocation7_spill] sm:$0xff] %v4124_v23  ;;  %v3624_v32 = vpop.eup %3623  ;;  %3635 = vlog2.f32 %v763_v3  ;;  %v762_v36 = vadd.f32 1.0, %v3622_v25  ;;  %v880_v1 = vmul.f32 %v837_v49, %v4124_v23  ;;  %918 = vrot.lane.b32.xlu1 %v881_v20, %s3858_s13  ;;  %v4130_v38 = vadd.f32 0.001, %v803_v35  ;;  %v851_v25 = vpop.permute.xlu1 %850 }
 0x1db   : > { %v802_v44 = vadd.f32 %v777_v29, %v674_v27  ;;  %v783_v40 = vmul.f32 0.6931472, %v3624_v32  ;;  %v679_v63 = vmax.f32 %v4075_v48, 0.0 }
 0x1dc   : > { %5750 = vst [vmem:[#allocation8_spill] sm:$0xff] %v4130_v38  ;;  %v3626_v50 = vpop.eup %3625  ;;  %3637 = vlog2.f32 %v762_v36  ;;  %v883_v53 = vmul.f32 %v843_v28, %v4130_v38  ;;  %916 = vrot.lane.b32.xlu0 %v880_v1, %s3858_s13  ;;  %v849_v36 = vpop.permute.xlu0 %848 }
 0x1dd   : > { %v4136_v55 = vadd.f32 0.001, %v802_v44  ;;  %v805_v49 = vadd.f32 %v783_v40, %v677_v37  ;;  %v781_v60 = vmul.f32 0.6931472, %v3626_v50  ;;  %v678_v37 = vmax.f32 %v4078_v54, 0.0 }
 0x1de   : > { %v3628_v61 = vpop.eup %3627  ;;  %922 = vrot.lane.b32.xlu1 %v883_v53, %s3858_s13  ;;  %v681_v53 = vmax.f32 %v4081_v0, 0.0 }
 0x1df   : > { %5751 = vst [vmem:[#allocation9_spill] sm:$0xff] %v4136_v55  ;;  %v882_v3 = vmul.f32 %v841_v46, %v4136_v55  ;;  %v4141_v20 = vadd.f32 0.001, %v805_v49  ;;  %v804_v35 = vadd.f32 %v781_v60, %v676_v58  ;;  %v787_v28 = vmul.f32 0.6931472, %v3628_v61  ;;  %v855_v49 = vpop.permute.xlu1 %854 }
 0x1e1   : > { %5752 = vst [vmem:[#allocation10_spill] sm:$0xff] %v4141_v20  ;;  %v885_v27 = vmul.f32 %v847_v31, %v4141_v20  ;;  %920 = vrot.lane.b32.xlu0 %v882_v3, %s3858_s13  ;;  %v4145_v29 = vadd.f32 0.001, %v804_v35  ;;  %v807_v32 = vadd.f32 %v787_v28, %v679_v63  ;;  %v680_v3 = vmax.f32 %v4087_v24, 0.0  ;;  %v853_v28 = vpop.permute.xlu0 %852 }
 0x1e2   : > { %v3630_v1 = vpop.eup %3629 }
 0x1e3   : > { %5753 = vst [vmem:[#allocation11_spill] sm:$0xff] %v4145_v29  ;;  %v884_v44 = vmul.f32 %v845_v47, %v4145_v29  ;;  %926 = vrot.lane.b32.xlu1 %v885_v27, %s3858_s13  ;;  %v4150_v46 = vadd.f32 0.001, %v807_v32  ;;  %v785_v40 = vmul.f32 0.6931472, %v3630_v1  ;;  %v683_v32 = vmax.f32 %v4090_v33, 0.0 }
 0x1e4   : > { %v3632_v50 = vpop.eup %3631 }
 0x1e5   : > { %5754 = vst [vmem:[#allocation12_spill] sm:$0xff] %v4150_v46  ;;  %v887_v31 = vmul.f32 %v851_v25, %v4150_v46  ;;  %924 = vrot.lane.b32.xlu0 %v884_v44, %s3858_s13  ;;  %v806_v58 = vadd.f32 %v785_v40, %v678_v37  ;;  %v791_v60 = vmul.f32 0.6931472, %v3632_v50  ;;  %v682_v50 = vmax.f32 %v4093_v42, 0.0 }
 0x1e6   : > { %v3634_v61 = vpop.eup %3633 }
 0x1e7   : > { %v3636_v63 = vpop.eup %3635  ;;  %v4156_v47 = vadd.f32 0.001, %v806_v58  ;;  %930 = vrot.lane.b32.xlu1 %v887_v31, %s3858_s13  ;;  %v809_v35 = vadd.f32 %v791_v60, %v681_v53  ;;  %v789_v27 = vmul.f32 0.6931472, %v3634_v61  ;;  %v859_v31 = vpop.permute.xlu1 %858 }
 0x1e8   : > { %v795_v1 = vmul.f32 0.6931472, %v3636_v63 }
 0x1e9   : > { %5755 = vst [vmem:[#allocation13_spill] sm:$0xff] %v4156_v47  ;;  %v3638_v25 = vpop.eup %3637  ;;  %v886_v44 = vmul.f32 %v849_v36, %v4156_v47  ;;  %v4161_v37 = vadd.f32 0.001, %v809_v35  ;;  %v808_v40 = vadd.f32 %v789_v27, %v680_v3  ;;  %v857_v36 = vpop.permute.xlu0 %856 }
 0x1ea   : > { %v811_v56 = vadd.f32 %v795_v1, %v683_v32  ;;  %v793_v41 = vmul.f32 0.6931472, %v3638_v25 }
 0x1eb   : > { %5756 = vst [vmem:[#allocation14_spill] sm:$0xff] %v4161_v37  ;;  %v889_v58 = vmul.f32 %v855_v49, %v4161_v37  ;;  %928 = vrot.lane.b32.xlu0 %v886_v44, %s3858_s13  ;;  %v4166_v53 = vadd.f32 0.001, %v808_v40 }
 0x1ec   : > { %v4168_v60 = vadd.f32 0.001, %v811_v56  ;;  %v810_v61 = vadd.f32 %v793_v41, %v682_v50  ;;  %v3859_v56 = vmov 33   ;;  %v5760_v41 = vmov 34  }
 0x1ed   : > { %5757 = vst [vmem:[#allocation15_spill] sm:$0xff] %v4166_v53  ;;  %v888_v63 = vmul.f32 %v853_v28, %v4166_v53  ;;  %934 = vrot.lane.b32.xlu1 %v889_v58, %s3858_s13 }
 0x1ee   : > { %5758 = vst [vmem:[#allocation16_spill] sm:$0xff] %v4168_v60  ;;  %v891_v3 = vmul.f32 %v859_v31, %v4168_v60  ;;  %v4173_v35 = vadd.f32 0.001, %v810_v61 }
 0x1ef   : > { %932 = vrot.lane.b32.xlu0 %v888_v63, %s3858_s13 }
 0x1f0   : > { %5759 = vst [vmem:[#allocation17_spill] sm:$0xff] %v4173_v35  ;;  %v890_v49 = vmul.f32 %v857_v36, %v4173_v35 }
 0x1f1   : > { %938 = vrot.lane.b32.xlu1 %v891_v3, %s3858_s13 }
 0x1f3   : > { %936 = vrot.lane.b32.xlu0 %v890_v49, %s3858_s13 }
 0x1f5   : > { %1309 = vperm.xlu1 %3523, %v3971_v13  }
 0x1f7   : > { %1305 = vperm.xlu0 %3525, %v3954_v11  }
 0x1f9   : > { %3524 = vset.pattern.permute.xlu1 %v3859_v56 }
 0x1fa   : > { %1225 = vperm.xlu1 %3524, %v3954_v11  }
 0x1fb   : > { %1293 = vperm.xlu0 %3525, %v4004_v19  }
 0x1fe   : > { %1221 = vperm.xlu1 %3524, %v3951_v10  }
 0x1ff   : > { %3528 = vset.pattern.permute.xlu0 %v3859_v56 }
 0x200   : > { %1229 = vperm.xlu0 %3528, %v3971_v13  }
 0x202   : > { %3526 = vset.pattern.permute.xlu1 %v5760_v41 }
 0x203   : > { %1301 = vperm.xlu1 %3526, %v3951_v10   ;;  %v5689_v10 = vmov 36  }
 0x204   : > { %1217 = vperm.xlu0 %3528, %v3948_v9  }
 0x207   : > { %1297 = vperm.xlu1 %3526, %v3948_v9  }
 0x208   : > { %1205 = vperm.xlu0 %3528, %v3994_v17  }
 0x20b   : > { %3527 = vset.pattern.permute.xlu1 %v3859_v56 }
 0x20c   : > { %1213 = vperm.xlu1 %3527, %v4004_v19   ;;  %1193 = vperm.xlu0 %3528, %v3974_v14  }
 0x210   : > { %1209 = vperm.xlu1 %3527, %v3997_v18   ;;  %1181 = vperm.xlu0 %3528, %v3942_v7  }
 0x214   : > { %3529 = vset.pattern.permute.xlu1 %v5760_v41  ;;  %3534 = vset.pattern.permute.xlu0 %v5760_v41 }
 0x215   : > { %1289 = vperm.xlu1 %3529, %v3997_v18   ;;  %1281 = vperm.xlu0 %3534, %v3987_v16  }
 0x219   : > { %1285 = vperm.xlu1 %3529, %v3994_v17   ;;  %1269 = vperm.xlu0 %3534, %v3966_v12  }
 0x21d   : > { %3530 = vset.pattern.permute.xlu1 %v3859_v56  ;;  %1257 = vperm.xlu0 %3534, %v3931_v6  }
 0x21e   : > { %1201 = vperm.xlu1 %3530, %v3987_v16  }
 0x221   : > { %3537 = vset.pattern.permute.xlu0 %v3859_v56 }
 0x222   : > { %1197 = vperm.xlu1 %3530, %v3984_v15   ;;  %1169 = vperm.xlu0 %3537, %v3925_v4  }
 0x226   : > { %3531 = vset.pattern.permute.xlu1 %v5760_v41  ;;  %2334 = vrot.lane.b32.xlu0 %v4173_v35, %s3858_s13 }
 0x227   : > { %1277 = vperm.xlu1 %3531, %v3984_v15   ;;  %3539 = vset.pattern.permute.xlu0 %v5689_v10 }
 0x22a   : > { %2330 = vrot.lane.b32.xlu0 %v4166_v53, %s3858_s13  ;;  %v3838_v53 = vld [vmem:[%s3922_s6 + $0x70] sm:$0xff] }
 0x22b   : > { %1273 = vperm.xlu1 %3531, %v3974_v14  }
 0x22e   : > { %2326 = vrot.lane.b32.xlu0 %v4156_v47, %s3858_s13 }
 0x22f   : > { %3532 = vset.pattern.permute.xlu1 %v3859_v56 }
 0x230   : > { %1189 = vperm.xlu1 %3532, %v3966_v12  }
 0x232   : > { %2322 = vrot.lane.b32.xlu0 %v4145_v29, %s3858_s13  ;;  %v3837_v29 = vld [vmem:[%s3922_s6] sm:$0xff] }
 0x234   : > { %1185 = vperm.xlu1 %3532, %v3945_v8  }
 0x236   : > { %2318 = vrot.lane.b32.xlu0 %v4136_v55, %s3858_s13 }
 0x238   : > { %3533 = vset.pattern.permute.xlu1 %v5760_v41 }
 0x239   : > { %1265 = vperm.xlu1 %3533, %v3945_v8  }
 0x23a   : > { %2314 = vrot.lane.b32.xlu0 %v4124_v23, %s3858_s13 }
 0x23d   : > { %1261 = vperm.xlu1 %3533, %v3942_v7  }
 0x23e   : > { %2310 = vrot.lane.b32.xlu0 %v4115_v45, %s3858_s13 }
 0x241   : > { %3535 = vset.pattern.permute.xlu1 %v3859_v56  ;;  %v3861_v56 = vmov 35  }
 0x242   : > { %1177 = vperm.xlu1 %3535, %v3931_v6   ;;  %2306 = vrot.lane.b32.xlu0 %v4104_v52, %s3858_s13  ;;  %v3835_v52 = vld [vmem:[%s3922_s6 + $0x10] sm:$0xff] }
 0x244   : > { %v911_v14 = vpop.permute.xlu1 %910 }
 0x245   : > { %v4236_v27 = vadd.f32 %v4042_v57, %v911_v14 }
 0x246   : > { %1173 = vperm.xlu1 %3535, %v3928_v5   ;;  %v909_v28 = vpop.permute.xlu0 %908  ;;  %1465 = vperm.xlu0 %3539, %v3954_v11  }
 0x247   : > { %v4233_v8 = vadd.f32 %v909_v28, %v4045_v59  ;;  %5762 = vst [vmem:[#allocation19_spill] sm:$0xff] %v4236_v27 }
 0x248   : > { %v915_v32 = vpop.permute.xlu1 %914 }
 0x249   : > { %5761 = vst [vmem:[#allocation18_spill] sm:$0xff] %v4233_v8  ;;  %3374 = vmatprep.mubr.msk.f32.mxu0 %vm974_vm3, %v4233_v8  ;;  %v4249_v25 = vadd.f32 %v4048_v62, %v915_v32 }
 0x24a   : > { %3536 = vset.pattern.permute.xlu1 %v5760_v41  ;;  %3375 = vmatmul.mubr.msk.f32.vlgmr.msra.gmra.mxu0 %vm974_vm3, %v4236_v27  ;;  %v913_v6 = vpop.permute.xlu0 %912 }
 0x24b   : > { %1253 = vperm.xlu1 %3536, %v3928_v5   ;;  %1453 = vperm.xlu0 %3539, %v4004_v19   ;;  %v4246_v11 = vadd.f32 %v913_v6, %v4051_v2  ;;  %5764 = vst [vmem:[#allocation21_spill] sm:$0xff] %v4249_v25 }
 0x24c   : > { %v919_v1 = vpop.permute.xlu1 %918 }
 0x24d   : > { %5763 = vst [vmem:[#allocation20_spill] sm:$0xff] %v4246_v11  ;;  %3377 = vmatprep.mubr.msk.f32.mxu0 %vm974_vm3, %v4246_v11  ;;  %v4261_v40 = vadd.f32 %v4054_v22, %v919_v1 }
 0x24e   : > { %3378 = vmatmul.mubr.msk.f32.gmra.mxu0 %vm974_vm3, %v4249_v25  ;;  %v917_v44 = vpop.permute.xlu0 %916 }
 0x24f   : > { %1249 = vperm.xlu1 %3536, %v3925_v4   ;;  %v4257_v5 = vadd.f32 %v917_v44, %v4057_v26  ;;  %1445 = vperm.xlu0 %3539, %v3994_v17   ;;  %5766 = vst [vmem:[#allocation23_spill] sm:$0xff] %v4261_v40 }
 0x250   : > { %v923_v19 = vpop.permute.xlu1 %922 }
 0x251   : > { %5765 = vst [vmem:[#allocation22_spill] sm:$0xff] %v4257_v5  ;;  %3380 = vmatprep.mubr.msk.f32.mxu0 %vm974_vm3, %v4257_v5  ;;  %v4275_v17 = vadd.f32 %v4060_v30, %v923_v19 }
 0x252   : > { %3381 = vmatmul.mubr.msk.f32.gmra.mxu0 %vm974_vm3, %v4261_v40 }
 0x253   : > { %2336 = vrot.lane.b32.xlu1 %v4168_v60, %s3858_s13  ;;  %v921_v4 = vpop.permute.xlu0 %920  ;;  %1437 = vperm.xlu0 %3539, %v3984_v15   ;;  %5768 = vst [vmem:[#allocation25_spill] sm:$0xff] %v4275_v17 }
 0x254   : > { %v4270_v50 = vadd.f32 %v921_v4, %v4063_v34  ;;  %3538 = vset.pattern.permute.xlu1 %v5689_v10  ;;  %v3831_v4 = vld [vmem:[%s3922_s6 + $0x68] sm:$0xff]  ;;  %v3834_v10 = vld [vmem:[%s3922_s6 + $0x20] sm:$0xff] }
 0x255   : > { %v927_v58 = vpop.permute.xlu1 %926 }
 0x256   : > { %5767 = vst [vmem:[#allocation24_spill] sm:$0xff] %v4270_v50  ;;  %3383 = vmatprep.mubr.msk.f32.mxu0 %vm974_vm3, %v4270_v50  ;;  %v4288_v15 = vadd.f32 %v4069_v39, %v927_v58 }
 0x257   : > { %2332 = vrot.lane.b32.xlu1 %v4161_v37, %s3858_s13  ;;  %3384 = vmatmul.mubr.msk.f32.gmra.mxu0 %vm974_vm3, %v4275_v17  ;;  %v925_v31 = vpop.permute.xlu0 %924 }
 0x258   : > { %v4284_v61 = vadd.f32 %v925_v31, %v4072_v43  ;;  %1429 = vperm.xlu0 %3539, %v3966_v12   ;;  %5770 = vst [vmem:[#allocation27_spill] sm:$0xff] %v4288_v15 }
 0x259   : > { %v931_v63 = vpop.permute.xlu1 %930 }
 0x25a   : > { %5769 = vst [vmem:[#allocation26_spill] sm:$0xff] %v4284_v61  ;;  %3386 = vmatprep.mubr.msk.f32.mxu0 %vm974_vm3, %v4284_v61  ;;  %v4301_v12 = vadd.f32 %v4075_v48, %v931_v63  ;;  %v3832_v63 = vld [vmem:[%s3922_s6 + $0x60] sm:$0xff] }
 0x25b   : > { %2328 = vrot.lane.b32.xlu1 %v4150_v46, %s3858_s13  ;;  %3387 = vmatmul.mubr.msk.f32.gmra.mxu0 %vm974_vm3, %v4288_v15 }
 0x25c   : > { %1421 = vperm.xlu0 %3539, %v3942_v7   ;;  %5772 = vst [vmem:[#allocation29_spill] sm:$0xff] %v4301_v12 }
 0x25d   : > { %v929_v36 = vpop.permute.xlu0 %928 }
 0x25e   : > { %v4298_v3 = vadd.f32 %v929_v36, %v4078_v54 }
 0x25f   : > { %v935_v49 = vpop.permute.xlu1 %934  ;;  %2324 = vrot.lane.b32.xlu1 %v4141_v20, %s3858_s13  ;;  %v3841_v20 = vld [vmem:[%s3922_s6 + $0x48] sm:$0xff] }
 0x260   : > { %5771 = vst [vmem:[#allocation28_spill] sm:$0xff] %v4298_v3  ;;  %3389 = vmatprep.mubr.msk.f32.mxu0 %vm974_vm3, %v4298_v3  ;;  %3540 = vset.pattern.permute.xlu0 %v3861_v56  ;;  %v4314_v14 = vadd.f32 %v4081_v0, %v935_v49 }
 0x261   : > { %3390 = vmatmul.mubr.msk.f32.gmra.mxu0 %vm974_vm3, %v4301_v12  ;;  %v933_v7 = vpop.permute.xlu0 %932  ;;  %1389 = vperm.xlu0 %3540, %v3971_v13  }
 0x262   : > { %v4311_v41 = vadd.f32 %v933_v7, %v4087_v24  ;;  %5774 = vst [vmem:[#allocation31_spill] sm:$0xff] %v4314_v14 }
 0x263   : > { %2320 = vrot.lane.b32.xlu1 %v4130_v38, %s3858_s13  ;;  %v939_v28 = vpop.permute.xlu1 %938  ;;  %v3840_v38 = vld [vmem:[%s3922_s6 + $0x50] sm:$0xff] }
 0x264   : > { %5773 = vst [vmem:[#allocation30_spill] sm:$0xff] %v4311_v41  ;;  %3392 = vmatprep.mubr.msk.f32.mxu0 %vm974_vm3, %v4311_v41  ;;  %v4327_v1 = vadd.f32 %v4090_v33, %v939_v28  ;;  %v3833_v28 = vld [vmem:[%s3922_s6 + $0x30] sm:$0xff] }
 0x265   : > { %3393 = vmatmul.mubr.msk.f32.gmra.mxu0 %vm974_vm3, %v4314_v14  ;;  %v937_v32 = vpop.permute.xlu0 %936  ;;  %1377 = vperm.xlu0 %3540, %v3948_v9   ;;  %v5777_v9 = vld [vmem:[#allocation2_spill] sm:$0xff] }
 0x266   : > { %v4324_v6 = vadd.f32 %v937_v32, %v4093_v42  ;;  %5776 = vst [vmem:[#allocation33_spill] sm:$0xff] %v4327_v1 }
 0x267   : > { %2316 = vrot.lane.b32.xlu1 %v4119_v51, %s3858_s13 }
 0x268   : > { %5775 = vst [vmem:[#allocation32_spill] sm:$0xff] %v4324_v6  ;;  %3395 = vmatprep.mubr.msk.f32.mxu0 %vm974_vm3, %v4324_v6 }
 0x269   : > { %3396 = vmatmul.mubr.msk.f32.gmra.mxu0 %vm974_vm3, %v4327_v1 }
 0x26b   : > { %2312 = vrot.lane.b32.xlu1 %v4110_v21, %s3858_s13 }
 0x26f   : > { %2308 = vrot.lane.b32.xlu1 %v5777_v9, %s3858_s13 }
 0x270   : > { %v4339_v44 = vpop.permute.xlu1 %1309 }
 0x272   : > { %v4347_v31 = vpop.permute.xlu0 %1305 }
 0x273   : > { %1469 = vperm.xlu1 %3538, %v3971_v13   ;;  %5780 = vst [vmem:[#allocation36_spill] sm:$0xff] %v4347_v31 }
 0x275   : > { %v4342_v19 = vpop.permute.xlu1 %1225 }
 0x276   : > { %5778 = vst [vmem:[#allocation34_spill] sm:$0xff] %v4342_v19  ;;  %v4353_v49 = vpop.permute.xlu0 %1293 }
 0x277   : > { %1461 = vperm.xlu1 %3538, %v3831_v4  }
 0x279   : > { %v4345_v58 = vpop.permute.xlu1 %1221 }
 0x27a   : > { %5779 = vst [vmem:[#allocation35_spill] sm:$0xff] %v4345_v58 }
 0x27b   : > { %1457 = vperm.xlu1 %3538, %v3832_v63   ;;  %v4358_v7 = vpop.permute.xlu0 %1229 }
 0x27e   : > { %v4350_v36 = vpop.permute.xlu1 %1301 }
 0x27f   : > { %1449 = vperm.xlu1 %3538, %v3997_v18   ;;  %v4366_v18 = vpop.permute.xlu0 %1217 }
 0x280   : > { %5784 = vst [vmem:[#allocation40_spill] sm:$0xff] %v4366_v18 }
 0x282   : > { %v4355_v13 = vpop.permute.xlu1 %1297 }
 0x283   : > { %5781 = vst [vmem:[#allocation37_spill] sm:$0xff] %v4355_v13  ;;  %1441 = vperm.xlu1 %3538, %v3987_v16   ;;  %v4371_v23 = vpop.permute.xlu0 %1205  ;;  %v3836_v16 = vld [vmem:[%s3922_s6 + $0x8] sm:$0xff] }
 0x284   : > { %5785 = vst [vmem:[#allocation41_spill] sm:$0xff] %v4371_v23 }
 0x287   : > { %1433 = vperm.xlu1 %3538, %v3833_v28   ;;  %v4361_v32 = vpop.permute.xlu1 %1213  ;;  %v4377_v47 = vpop.permute.xlu0 %1193 }
 0x288   : > { %5782 = vst [vmem:[#allocation38_spill] sm:$0xff] %v4361_v32  ;;  %5786 = vst [vmem:[#allocation42_spill] sm:$0xff] %v4377_v47  ;;  %v3843_v47 = vld [vmem:[%s3922_s6 + $0x38] sm:$0xff] }
 0x28b   : > { %1425 = vperm.xlu1 %3538, %v3834_v10   ;;  %v4364_v63 = vpop.permute.xlu1 %1209  ;;  %v4384_v35 = vpop.permute.xlu0 %1181 }
 0x28c   : > { %5783 = vst [vmem:[#allocation39_spill] sm:$0xff] %v4364_v63  ;;  %5789 = vst [vmem:[#allocation45_spill] sm:$0xff] %v4384_v35  ;;  %v3842_v35 = vld [vmem:[%s3922_s6 + $0x40] sm:$0xff] }
 0x28f   : > { %1417 = vperm.xlu1 %3538, %v3835_v52  }
 0x290   : > { %v4369_v45 = vpop.permute.xlu1 %1289  ;;  %v4388_v21 = vpop.permute.xlu0 %1281 }
 0x293   : > { %1413 = vperm.xlu1 %3538, %v3836_v16  }
 0x294   : > { %v4374_v55 = vpop.permute.xlu1 %1285 }
 0x297   : > { %1409 = vperm.xlu1 %3538, %v3837_v29   ;;  %v3839_v29 = vld [vmem:[%s3922_s6 + $0x58] sm:$0xff] }
 0x299   : > { %v4379_v46 = vpop.permute.xlu1 %1201 }
 0x29a   : > { %5787 = vst [vmem:[#allocation43_spill] sm:$0xff] %v4379_v46 }
 0x29b   : > { %3541 = vset.pattern.permute.xlu1 %v3861_v56  ;;  %v4394_v56 = vpop.permute.xlu0 %1269 }
 0x29c   : > { %1385 = vperm.xlu1 %3541, %v3838_v53   ;;  %5790 = vst [vmem:[#allocation46_spill] sm:$0xff] %v4394_v56 }
 0x29d   : > { %v4382_v37 = vpop.permute.xlu1 %1197 }
 0x29e   : > { %5788 = vst [vmem:[#allocation44_spill] sm:$0xff] %v4382_v37 }
 0x2a0   : > { %1381 = vperm.xlu1 %3541, %v3831_v4   ;;  %v4401_v4 = vpop.permute.xlu0 %1257 }
 0x2a1   : > { %5793 = vst [vmem:[#allocation49_spill] sm:$0xff] %v4401_v4 }
 0x2a2   : > { %v4386_v9 = vpop.permute.xlu1 %1277 }
 0x2a4   : > { %1373 = vperm.xlu1 %3541, %v3839_v29   ;;  %v4407_v37 = vpop.permute.xlu0 %1169 }
 0x2a5   : > { %5795 = vst [vmem:[#allocation51_spill] sm:$0xff] %v4407_v37 }
 0x2a6   : > { %v4391_v51 = vpop.permute.xlu1 %1273 }
 0x2a8   : > { %1369 = vperm.xlu1 %3541, %v3840_v38   ;;  %v2335_v56 = vpop.permute.xlu0 %2334 }
 0x2a9   : > { %3639 = vrcp.f32 %v2335_v56 }
 0x2ab   : > { %v4396_v53 = vpop.permute.xlu1 %1189 }
 0x2ac   : > { %5791 = vst [vmem:[#allocation47_spill] sm:$0xff] %v4396_v53  ;;  %1365 = vperm.xlu1 %3541, %v3841_v20   ;;  %v3844_v53 = vld [vmem:[%s3922_s6 + $0x28] sm:$0xff]  ;;  %v4416_v4 = vpop.permute.xlu0 %2330 }
 0x2af   : > { %v4399_v60 = vpop.permute.xlu1 %1185 }
 0x2b0   : > { %5792 = vst [vmem:[#allocation48_spill] sm:$0xff] %v4399_v60  ;;  %1361 = vperm.xlu1 %3541, %v3842_v35   ;;  %v3845_v35 = vld [vmem:[%s3922_s6 + $0x18] sm:$0xff] }
 0x2b4   : > { %1357 = vperm.xlu1 %3541, %v3843_v47   ;;  %v4405_v29 = vpop.permute.xlu1 %1265 }
 0x2b5   : > { %5794 = vst [vmem:[#allocation50_spill] sm:$0xff] %v4405_v29  ;;  %v4421_v29 = vpop.permute.xlu0 %2326 }
 0x2b8   : > { %1353 = vperm.xlu1 %3541, %v3833_v28   ;;  %v4409_v38 = vpop.permute.xlu1 %1261 }
 0x2b9   : > { %5796 = vst [vmem:[#allocation52_spill] sm:$0xff] %v4409_v38 }
 0x2bc   : > { %1349 = vperm.xlu1 %3541, %v3844_v53   ;;  %v1729_v53 = vld [vmem:[%s5682_s3] sm:$0xff] }
 0x2bd   : > { %v4412_v20 = vpop.permute.xlu1 %1177  ;;  %3430 = vmatprep.mubr.f32.mxu1 %v1729_v53 }
 0x2be   : > { %5797 = vst [vmem:[#allocation53_spill] sm:$0xff] %v4412_v20  ;;  %v3640_v20 = vpop.eup %3639 }
 0x2c0   : > { %1345 = vperm.xlu1 %3541, %v3834_v10   ;;  %v4428_v10 = vpop.permute.xlu0 %2322 }
 0x2c1   : > { %v4414_v60 = vpop.permute.xlu1 %1173 }
 0x2c2   : > { %5798 = vst [vmem:[#allocation54_spill] sm:$0xff] %v4414_v60 }
 0x2c4   : > { %1341 = vperm.xlu1 %3541, %v3845_v35   ;;  %v2319_v35 = vpop.permute.xlu0 %2318 }
 0x2c6   : > { %v4419_v47 = vpop.permute.xlu1 %1253 }
 0x2c7   : > { %5799 = vst [vmem:[#allocation55_spill] sm:$0xff] %v4419_v47 }
 0x2c8   : > { %1337 = vperm.xlu1 %3541, %v3835_v52   ;;  %v2315_v52 = vpop.permute.xlu0 %2314 }
 0x2ca   : > { %v4423_v28 = vpop.permute.xlu1 %1249 }
 0x2cb   : > { %5800 = vst [vmem:[#allocation56_spill] sm:$0xff] %v4423_v28  ;;  %v2288_v28 = vsub.f32 %v4324_v6, %v4093_v42 }
 0x2cc   : > { %1333 = vperm.xlu1 %3541, %v3836_v16   ;;  %v2289_v16 = vsub.f32 %v4327_v1, %v4090_v33 }
 0x2cd   : > { %v2383_v46 = vmul.f32 %v3640_v20, %v2288_v28  ;;  %v2274_v20 = vsub.f32 %v4233_v8, %v4045_v59 }
 0x2ce   : > { %v2337_v37 = vpop.permute.xlu1 %2336 }
 0x2cf   : > { %3641 = vrcp.f32 %v2337_v37  ;;  %v2311_v37 = vpop.permute.xlu0 %2310  ;;  %v2448_v13 = vmul.f32 0.5, %v2383_v46 }
 0x2d1   : > { %v2464_v31 = vmul.f32 %v2448_v13, %v2383_v46 }
 0x2d2   : > { %v4430_v60 = vpop.permute.xlu1 %2332 }
 0x2d3   : > { %v2307_v19 = vpop.permute.xlu0 %2306 }
 0x2d4   : > { %3643 = vrcp.f32 %v2307_v19  ;;  %v2277_v19 = vsub.f32 %v4249_v25, %v4048_v62  ;;  %v2279_v62 = vsub.f32 %v4261_v40, %v4054_v22 }
 0x2d6   : > { %v4432_v47 = vpop.permute.xlu1 %2328 }
 0x2da   : > { %v2325_v38 = vpop.permute.xlu1 %2324 }
 0x2dc   : > { %v3642_v56 = vpop.eup %3641 }
 0x2dd   : > { %v2385_v53 = vmul.f32 %v3642_v56, %v2289_v16 }
 0x2de   : > { %v2321_v23 = vpop.permute.xlu1 %2320 }
 0x2df   : > { %v2449_v63 = vmul.f32 0.5, %v2385_v53 }
 0x2e1   : > { %v2465_v32 = vmul.f32 %v2449_v63, %v2385_v53  ;;  %v3644_v42 = vpop.eup %3643  ;;  %v2275_v63 = vsub.f32 %v4236_v27, %v4042_v57  ;;  %v2276_v57 = vsub.f32 %v4246_v11, %v4051_v2  ;;  %v2278_v2 = vsub.f32 %v4257_v5, %v4057_v26 }
 0x2e2   : > { %v2317_v18 = vpop.permute.xlu1 %2316  ;;  %v2355_v13 = vmul.f32 %v3644_v42, %v2274_v20 }
 0x2e3   : > { %2512 = vrot.lane.b32.xlu0 %v2465_v32, %s3862_s16 }
 0x2e4   : > { %v2434_v16 = vmul.f32 0.5, %v2355_v13 }
 0x2e6   : > { %v2313_v58 = vpop.permute.xlu1 %2312  ;;  %v2450_v59 = vmul.f32 %v2434_v16, %v2355_v13 }
 0x2e7   : > { %2510 = vrot.lane.b32.xlu0 %v2464_v31, %s3862_s16 }
 0x2ea   : > { %v2309_v33 = vpop.permute.xlu1 %2308 }
 0x2eb   : > { %3645 = vrcp.f32 %v2309_v33 }
 0x2ec   : > { %3647 = vrcp.f32 %v2313_v58 }
 0x2ed   : > { %3649 = vrcp.f32 %v2311_v37 }
 0x2ee   : > { %3651 = vrcp.f32 %v2317_v18  ;;  %v4446_v58 = vpop.permute.xlu1 %1469 }
 0x2ef   : > { %3653 = vrcp.f32 %v2315_v52 }
 0x2f0   : > { %3655 = vrcp.f32 %v2321_v23 }
 0x2f1   : > { %3657 = vrcp.f32 %v2319_v35  ;;  %v4458_v35 = vpop.permute.xlu0 %1465 }
 0x2f2   : > { %v4453_v23 = vpop.permute.xlu1 %1461  ;;  %3659 = vrcp.f32 %v2325_v38 }
 0x2f3   : > { %3661 = vrcp.f32 %v4428_v10 }
 0x2f4   : > { %3663 = vrcp.f32 %v4432_v47 }
 0x2f5   : > { %3665 = vrcp.f32 %v4421_v29 }
 0x2f6   : > { %3667 = vrcp.f32 %v4430_v60 }
 0x2f7   : > { %3669 = vrcp.f32 %v4416_v4 }
 0x2f8   : > { %v3646_v28 = vpop.eup %3645 }
 0x2f9   : > { %v2357_v46 = vmul.f32 %v3646_v28, %v2275_v63  ;;  %v3648_v32 = vpop.eup %3647 }
 0x2fa   : > { %v2361_v56 = vmul.f32 %v3648_v32, %v2277_v19  ;;  %v3650_v53 = vpop.eup %3649 }
 0x2fb   : > { %v2435_v31 = vmul.f32 0.5, %v2357_v46  ;;  %v2359_v37 = vmul.f32 %v3650_v53, %v2276_v57  ;;  %v3652_v33 = vpop.eup %3651  ;;  %v2280_v57 = vsub.f32 %v4270_v50, %v4063_v34 }
 0x2fc   : > { %v2437_v52 = vmul.f32 0.5, %v2361_v56  ;;  %v2365_v20 = vmul.f32 %v3652_v33, %v2279_v62  ;;  %v3654_v28 = vpop.eup %3653 }
 0x2fd   : > { %v2451_v18 = vmul.f32 %v2435_v31, %v2357_v46  ;;  %v2436_v63 = vmul.f32 0.5, %v2359_v37  ;;  %v4462_v46 = vpop.permute.xlu1 %1457  ;;  %v2363_v32 = vmul.f32 %v3654_v28, %v2278_v2  ;;  %v3656_v19 = vpop.eup %3655  ;;  %v2281_v31 = vsub.f32 %v4275_v17, %v4060_v30 }
 0x2fe   : > { %v2453_v42 = vmul.f32 %v2437_v52, %v2361_v56  ;;  %v2439_v13 = vmul.f32 0.5, %v2365_v20  ;;  %v3658_v53 = vpop.eup %3657 }
 0x2ff   : > { %2484 = vrot.lane.b32.xlu1 %v2451_v18, %s3862_s16  ;;  %v2452_v22 = vmul.f32 %v2436_v63, %v2359_v37  ;;  %v4472_v18 = vpop.permute.xlu0 %1453  ;;  %v2438_v16 = vmul.f32 0.5, %v2363_v32  ;;  %v2369_v56 = vmul.f32 %v3656_v19, %v2281_v31  ;;  %v2367_v33 = vmul.f32 %v3658_v53, %v2280_v57  ;;  %v3660_v62 = vpop.eup %3659 }
 0x300   : > { %v2455_v10 = vmul.f32 %v2439_v13, %v2365_v20  ;;  %v3662_v13 = vpop.eup %3661  ;;  %v2285_v57 = vsub.f32 %v4301_v12, %v4075_v48  ;;  %v2284_v48 = vsub.f32 %v4298_v3, %v4078_v54  ;;  %v5841_v12 = vld [vmem:[#allocation16_spill] sm:$0xff] }
 0x301   : > { %v2454_v47 = vmul.f32 %v2438_v16, %v2363_v32  ;;  %v2441_v37 = vmul.f32 0.5, %v2369_v56  ;;  %v2440_v2 = vmul.f32 0.5, %v2367_v33  ;;  %v2282_v32 = vsub.f32 %v4284_v61, %v4072_v43  ;;  %v3664_v53 = vpop.eup %3663 }
 0x302   : > { %3671 = vlog2.f32 %v5841_v12 }
 0x303   : > { %2482 = vrot.lane.b32.xlu1 %v2450_v59, %s3862_s16  ;;  %v4476_v59 = vpop.permute.xlu1 %1449  ;;  %v1446_v63 = vpop.permute.xlu0 %1445  ;;  %v2457_v29 = vmul.f32 %v2441_v37, %v2369_v56  ;;  %v2371_v56 = vmul.f32 %v3662_v13, %v2282_v32 }
 0x304   : > { %v3666_v13 = vpop.eup %3665 }
 0x307   : > { %2488 = vrot.lane.b32.xlu1 %v2453_v42, %s3862_s16  ;;  %v2283_v42 = vsub.f32 %v4288_v15, %v4069_v39  ;;  %v1442_v20 = vpop.permute.xlu1 %1441  ;;  %v1438_v60 = vpop.permute.xlu0 %1437 }
 0x30a   : > { %v4464_v38 = vpop.f32.mrf.mxu0 }
 0x30b   : > { %2486 = vrot.lane.b32.xlu1 %v2452_v22, %s3862_s16  ;;  %v2373_v22 = vmul.f32 %v3660_v62, %v2283_v42 }
 0x30c   : > { %v4469_v26 = vpop.f32.mrf.mxu0 }
 0x30d   : > { %v2443_v16 = vmul.f32 0.5, %v2373_v22 }
 0x30e   : > { %v4479_v30 = vpop.f32.mrf.mxu0 }
 0x30f   : > { %2492 = vrot.lane.b32.xlu1 %v2455_v10, %s3862_s16  ;;  %v2456_v10 = vmul.f32 %v2440_v2, %v2367_v33  ;;  %v2377_v2 = vmul.f32 %v3664_v53, %v2285_v57  ;;  %v2287_v57 = vsub.f32 %v4314_v14, %v4081_v0 }
 0x310   : > { %v4482_v52 = vpop.f32.mrf.mxu0 }
 0x311   : > { %v2445_v53 = vmul.f32 0.5, %v2377_v2 }
 0x312   : > { %v4487_v34 = vpop.f32.mrf.mxu0 }
 0x313   : > { %2490 = vrot.lane.b32.xlu1 %v2454_v47, %s3862_s16  ;;  %v1434_v47 = vpop.permute.xlu1 %1433 }
 0x314   : > { %v4490_v28 = vpop.f32.mrf.mxu0 }
 0x317   : > { %2496 = vrot.lane.b32.xlu1 %v2457_v29, %s3862_s16  ;;  %v4496_v39 = vpop.f32.mrf.mxu0  ;;  %v2442_v29 = vmul.f32 0.5, %v2371_v56 }
 0x318   : > { %v4500_v19 = vadd.f32 %v4496_v39, %v4386_v9 }
 0x319   : > { %v4502_v31 = vpop.f32.mrf.mxu0 }
 0x31a   : > { %v4506_v43 = vadd.f32 %v4391_v51, %v4502_v31  ;;  %v1479_v4 = vsub.f32 %v1438_v60, %v4500_v19  ;;  %v2459_v51 = vmul.f32 %v2443_v16, %v2373_v22  ;;  %v2458_v16 = vmul.f32 %v2442_v29, %v2371_v56 }
 0x31b   : > { %2494 = vrot.lane.b32.xlu1 %v2456_v10, %s3862_s16  ;;  %v4512_v9 = vpop.f32.mrf.mxu0  ;;  %v3668_v10 = vpop.eup %3667  ;;  %v2286_v56 = vsub.f32 %v4311_v41, %v4087_v24  ;;  %v2461_v29 = vmul.f32 %v2445_v53, %v2377_v2 }
 0x31c   : > { %v4516_v37 = vadd.f32 %v4512_v9, %v4374_v55  ;;  %v1511_v33 = vmul.f32 %v1479_v4, %v1479_v4  ;;  %v1478_v62 = vsub.f32 %v1434_v47, %v4506_v43  ;;  %v2375_v4 = vmul.f32 %v3666_v13, %v2284_v48  ;;  %v3670_v47 = vpop.eup %3669 }
 0x31d   : > { %v4519_v42 = vpop.f32.mrf.mxu0  ;;  %v2379_v48 = vmul.f32 %v3670_v47, %v2286_v56  ;;  %v5805_v56 = vld [vmem:[#allocation36_spill] sm:$0xff] }
 0x31e   : > { %1550 = vrot.lane.b32.xlu0 %v1511_v33, %s3863_s17  ;;  %v1481_v55 = vsub.f32 %v1446_v63, %v4516_v37  ;;  %v4528_v32 = vadd.f32 %v4388_v21, %v4519_v42  ;;  %v1510_v60 = vmul.f32 %v1478_v62, %v1478_v62  ;;  %v2381_v62 = vmul.f32 %v3668_v10, %v2287_v57 }
 0x31f   : > { %2500 = vrot.lane.b32.xlu1 %v2459_v51, %s3862_s16  ;;  %v2444_v13 = vmul.f32 0.5, %v2375_v4  ;;  %v2446_v57 = vmul.f32 0.5, %v2379_v48 }
 0x320   : > { %v1513_v63 = vmul.f32 %v1481_v55, %v1481_v55  ;;  %v1480_v33 = vsub.f32 %v1442_v20, %v4528_v32  ;;  %v2447_v55 = vmul.f32 0.5, %v2381_v62 }
 0x321   : > { %v3391_v22 = vpop.f32.mrf.mxu0 }
 0x322   : > { %1548 = vrot.lane.b32.xlu0 %v1510_v60, %s3863_s17  ;;  %v4536_v21 = vadd.f32 %v3391_v22, %v4353_v49  ;;  %v1512_v60 = vmul.f32 %v1480_v33, %v1480_v33 }
 0x323   : > { %v1139_v54 = vpop.f32.mrf.mxu0  ;;  %2498 = vrot.lane.b32.xlu1 %v2458_v16, %s3862_s16  ;;  %v2460_v16 = vmul.f32 %v2444_v13, %v2375_v4  ;;  %v2463_v4 = vmul.f32 %v2447_v55, %v2381_v62  ;;  %v5807_v62 = vld [vmem:[#allocation37_spill] sm:$0xff] }
 0x324   : > { %v1483_v20 = vsub.f32 %v4472_v18, %v4536_v21  ;;  %v4545_v49 = vadd.f32 %v4369_v45, %v1139_v54 }
 0x325   : > { %v3394_v51 = vpop.f32.mrf.mxu0 }
 0x326   : > { %1554 = vrot.lane.b32.xlu0 %v1513_v63, %s3863_s17  ;;  %v1515_v18 = vmul.f32 %v1483_v20, %v1483_v20  ;;  %v1482_v45 = vsub.f32 %v4476_v59, %v4545_v49  ;;  %v4558_v47 = vadd.f32 %v3394_v51, %v4350_v36  ;;  %v5806_v59 = vld [vmem:[#allocation40_spill] sm:$0xff] }
 0x327   : > { %v1149_v0 = vpop.f32.mrf.mxu0  ;;  %2504 = vrot.lane.b32.xlu1 %v2461_v29, %s3862_s16 }
 0x328   : > { %v4574_v36 = vadd.f32 %v5806_v59, %v1149_v0  ;;  %v1514_v20 = vmul.f32 %v1482_v45, %v1482_v45  ;;  %v1485_v55 = vsub.f32 %v4453_v23, %v4558_v47 }
 0x329   : > { %v3397_v10 = vpop.f32.mrf.mxu0 }
 0x32a   : > { %v4548_v24 = vadd.f32 %v3397_v10, %v4358_v7  ;;  %v4551_v2 = vadd.f32 %v3397_v10, %v4339_v44  ;;  %1552 = vrot.lane.b32.xlu0 %v1512_v60, %s3863_s17  ;;  %v5802_v7 = vld [vmem:[#allocation35_spill] sm:$0xff]  ;;  %v5803_v44 = vld [vmem:[#allocation34_spill] sm:$0xff]  ;;  %v4577_v60 = vadd.f32 %v5807_v62, %v1149_v0 }
 0x32b   : > { %v1159_v53 = vpop.f32.mrf.mxu0  ;;  %2502 = vrot.lane.b32.xlu1 %v2460_v16, %s3862_s16  ;;  %v4561_v63 = vadd.f32 %v3394_v51, %v5802_v7  ;;  %v5808_v10 = vld [vmem:[#allocation38_spill] sm:$0xff] }
 0x32c   : > { %5801 = vst [vmem:[#allocation57_spill] sm:$0xff] %v4548_v24  ;;  %v4564_v33 = vadd.f32 %v5803_v44, %v1159_v53  ;;  %v4567_v29 = vadd.f32 %v5805_v56, %v1159_v53  ;;  %v1728_v13 = vsel %vm1712_vm4, %v4548_v24, %v4551_v2  ;;  %v4586_v16 = vadd.f32 %v3391_v22, %v5808_v10  ;;  %v5815_v62 = vld [vmem:[#allocation42_spill] sm:$0xff] }
 0x32d   : > { %3398 = vmatprep.subr.mxu1 %v1728_v13  ;;  %v1726_v0 = vsel %vm1712_vm4, %v4561_v63, %v4558_v47  ;;  %v2462_v53 = vmul.f32 %v2446_v57, %v2379_v48  ;;  %v1725_v23 = vsel %vm1712_vm4, %v4574_v36, %v4577_v60  ;;  %v1517_v22 = vmul.f32 %v1485_v55, %v1485_v55  ;;  %v5812_v57 = vld [vmem:[#allocation43_spill] sm:$0xff] }
 0x32e   : > { %5804 = vst [vmem:[#allocation35_spill] sm:$0xff] %v4564_v33  ;;  %1558 = vrot.lane.b32.xlu0 %v1515_v18, %s3863_s17  ;;  %3399 = vmatpush3.msra.mxu1 %v1728_v13  ;;  %v1727_v51 = vsel %vm1712_vm4, %v4564_v33, %v4567_v29  ;;  %v5809_v18 = vld [vmem:[#allocation39_spill] sm:$0xff]  ;;  %v1484_v45 = vsub.f32 %v4462_v46, %v4577_v60  ;;  %v5814_v13 = vld [vmem:[#allocation44_spill] sm:$0xff] }
 0x32f   : > { %2508 = vrot.lane.b32.xlu1 %v2463_v4, %s3862_s16  ;;  %3400 = vmatprep.subr.mxu1 %v1727_v51  ;;  %v4593_v7 = vadd.f32 %v5809_v18, %v1139_v54  ;;  %v5811_v4 = vld [vmem:[#allocation41_spill] sm:$0xff]  ;;  %v1724_v54 = vsel %vm1712_vm4, %v4586_v16, %v4536_v21  ;;  %v4611_v44 = vadd.f32 %v5812_v57, %v4519_v42  ;;  %v5816_v55 = vld [vmem:[#allocation47_spill] sm:$0xff]  ;;  %v5818_v18 = vld [vmem:[#allocation48_spill] sm:$0xff] }
 0x330   : > { %3401 = vmatpush3.msra.mxu1 %v1727_v51  ;;  %v4603_v48 = vadd.f32 %v4512_v9, %v5811_v4  ;;  %v1516_v56 = vmul.f32 %v1484_v45, %v1484_v45  ;;  %v1487_v9 = vsub.f32 %v4446_v58, %v4551_v2  ;;  %v4620_v59 = vadd.f32 %v4496_v39, %v5814_v13  ;;  %v5821_v4 = vld [vmem:[#allocation45_spill] sm:$0xff]  ;;  %v5823_v57 = vld [vmem:[#allocation52_spill] sm:$0xff] }
 0x331   : > { %3402 = vmatprep.subr.mxu1 %v1726_v0  ;;  %5810 = vst [vmem:[#allocation34_spill] sm:$0xff] %v4593_v7  ;;  %5813 = vst [vmem:[#allocation36_spill] sm:$0xff] %v4611_v44  ;;  %v1723_v46 = vsel %vm1712_vm4, %v4593_v7, %v4545_v49  ;;  %v4628_v51 = vadd.f32 %v5815_v62, %v4502_v31  ;;  %v1721_v58 = vsel %vm1712_vm4, %v4611_v44, %v4528_v32  ;;  %v5826_v13 = vld [vmem:[#allocation49_spill] sm:$0xff]  ;;  %v5827_v62 = vld [vmem:[#allocation54_spill] sm:$0xff] }
 0x332   : > { %1556 = vrot.lane.b32.xlu0 %v1514_v20, %s3863_s17  ;;  %3403 = vmatpush3.msra.mxu1 %v1726_v0  ;;  %v1722_v42 = vsel %vm1712_vm4, %v4603_v48, %v4516_v37  ;;  %v1519_v20 = vmul.f32 %v1487_v9, %v1487_v9  ;;  %v1486_v39 = vsub.f32 %v4458_v35, %v4567_v29  ;;  %v5817_v0 = vld [vmem:[#allocation46_spill] sm:$0xff] }
 0x333   : > { %2506 = vrot.lane.b32.xlu1 %v2462_v53, %s3862_s16  ;;  %3404 = vmatprep.subr.mxu1 %v1725_v23  ;;  %v4637_v10 = vadd.f32 %v4487_v34, %v5816_v55  ;;  %v4641_v53 = vadd.f32 %v4487_v34, %v5817_v0  ;;  %v1720_v31 = vsel %vm1712_vm4, %v4620_v59, %v4500_v19  ;;  %v5829_v55 = vld [vmem:[#allocation51_spill] sm:$0xff] }
 0x334   : > { %3405 = vmatpush3.msra.mxu1 %v1725_v23  ;;  %v4649_v35 = vadd.f32 %v5818_v18, %v4490_v28  ;;  %v5820_v23 = vld [vmem:[#allocation50_spill] sm:$0xff]  ;;  %v1719_v34 = vsel %vm1712_vm4, %v4628_v51, %v4506_v43  ;;  %v1518_v45 = vmul.f32 %v1486_v39, %v1486_v39  ;;  %v4694_v0 = vadd.f32 %v5829_v55, %v4469_v26 }
 0x335   : > { %3406 = vmatprep.subr.mxu1 %v1724_v54  ;;  %v1741_v55 = vld [vmem:[%s5682_s3 + $0x60] sm:$0xff] }
 0x336   : > { %1562 = vrot.lane.b32.xlu0 %v1517_v22, %s3863_s17  ;;  %3407 = vmatpush3.msra.mxu1 %v1724_v54  ;;  %5819 = vst [vmem:[#allocation40_spill] sm:$0xff] %v4649_v35  ;;  %v4653_v22 = vadd.f32 %v5820_v23, %v4490_v28  ;;  %v4660_v54 = vadd.f32 %v4479_v30, %v5821_v4  ;;  %5830 = vst [vmem:[#allocation39_spill] sm:$0xff] %v4694_v0  ;;  %v1732_v4 = vld [vmem:[%s5682_s3 + $0x18] sm:$0xff] }
 0x337   : > { %3408 = vmatprep.subr.mxu1 %v1723_v46  ;;  %v1718_v28 = vsel %vm1712_vm4, %v4637_v10, %v4641_v53 }
 0x338   : > { %3409 = vmatpush3.msra.mxu1 %v1723_v46  ;;  %5822 = vst [vmem:[#allocation37_spill] sm:$0xff] %v4660_v54  ;;  %v4664_v46 = vadd.f32 %v4479_v30, %v5823_v57  ;;  %v1717_v30 = vsel %vm1712_vm4, %v4649_v35, %v4653_v22  ;;  %v1733_v57 = vld [vmem:[%s5682_s3 + $0x20] sm:$0xff] }
 0x339   : > { %3410 = vmatprep.subr.mxu1 %v1722_v42 }
 0x33a   : > { %1560 = vrot.lane.b32.xlu0 %v1516_v56, %s3863_s17  ;;  %3411 = vmatpush3.msra.mxu1 %v1722_v42  ;;  %v5824_v56 = vld [vmem:[#allocation53_spill] sm:$0xff]  ;;  %v4676_v42 = vadd.f32 %v5826_v13, %v4482_v52 }
 0x33b   : > { %3412 = vmatprep.subr.mxu1 %v1721_v58  ;;  %v4672_v9 = vadd.f32 %v5824_v56, %v4482_v52  ;;  %v1716_v52 = vsel %vm1712_vm4, %v4660_v54, %v4664_v46  ;;  %v1735_v56 = vld [vmem:[%s5682_s3 + $0x30] sm:$0xff]  ;;  %v1736_v13 = vld [vmem:[%s5682_s3 + $0x38] sm:$0xff] }
 0x33c   : > { %3413 = vmatpush3.msra.mxu1 %v1721_v58  ;;  %v4683_v58 = vadd.f32 %v4464_v38, %v5827_v62  ;;  %v1738_v62 = vld [vmem:[%s5682_s3 + $0x48] sm:$0xff] }
 0x33d   : > { %3414 = vmatprep.subr.mxu1 %v1720_v31  ;;  %5825 = vst [vmem:[#allocation38_spill] sm:$0xff] %v4672_v9 }
 0x33e   : > { %1566 = vrot.lane.b32.xlu0 %v1519_v20, %s3863_s17  ;;  %3415 = vmatpush3.msra.mxu1 %v1720_v31  ;;  %v5828_v20 = vld [vmem:[#allocation55_spill] sm:$0xff]  ;;  %v5831_v31 = vld [vmem:[#allocation56_spill] sm:$0xff] }
 0x33f   : > { %3416 = vmatprep.subr.mxu1 %v1719_v34  ;;  %v4687_v39 = vadd.f32 %v4464_v38, %v5828_v20  ;;  %v4698_v18 = vadd.f32 %v5831_v31, %v4469_v26  ;;  %v1715_v38 = vsel %vm1712_vm4, %v4672_v9, %v4676_v42  ;;  %v1730_v26 = vld [vmem:[%s5682_s3 + $0x8] sm:$0xff]  ;;  %v1739_v20 = vld [vmem:[%s5682_s3 + $0x50] sm:$0xff] }
 0x340   : > { %3417 = vmatpush3.msra.mxu1 %v1719_v34  ;;  %v1742_v31 = vld [vmem:[%s5682_s3 + $0x68] sm:$0xff] }
 0x341   : > { %3418 = vmatprep.subr.mxu1 %v1718_v28  ;;  %v1714_v23 = vsel %vm1712_vm4, %v4683_v58, %v4687_v39  ;;  %v1713_v34 = vsel %vm1712_vm4, %v4694_v0, %v4698_v18 }
 0x342   : > { %1564 = vrot.lane.b32.xlu0 %v1518_v45, %s3863_s17  ;;  %3419 = vmatpush3.msra.mxu1 %v1718_v28  ;;  %v1731_v45 = vld [vmem:[%s5682_s3 + $0x10] sm:$0xff]  ;;  %v1734_v28 = vld [vmem:[%s5682_s3 + $0x28] sm:$0xff] }
 0x343   : > { %3420 = vmatprep.subr.mxu1 %v1717_v30 }
 0x344   : > { %3421 = vmatpush3.msra.mxu1 %v1717_v30  ;;  %v1737_v30 = vld [vmem:[%s5682_s3 + $0x40] sm:$0xff] }
 0x345   : > { %3422 = vmatprep.subr.mxu1 %v1716_v52 }
 0x346   : > { %3423 = vmatpush3.msra.mxu1 %v1716_v52  ;;  %v1740_v52 = vld [vmem:[%s5682_s3 + $0x58] sm:$0xff] }
 0x347   : > { %3424 = vmatprep.subr.mxu1 %v1715_v38 }
 0x348   : > { %3425 = vmatpush3.msra.mxu1 %v1715_v38  ;;  %v1743_v38 = vld [vmem:[%s5682_s3 + $0x70] sm:$0xff] }
 0x349   : > { %3426 = vmatprep.subr.mxu1 %v1714_v23 }
 0x34a   : > { %3427 = vmatpush3.msra.mxu1 %v1714_v23  ;;  %v1744_v23 = vld [vmem:[%s5682_s3 + $0x78] sm:$0xff] }
 0x34b   : > { %3428 = vmatprep.subr.mxu1 %v1713_v34 }
 0x34c   : > { %3429 = vmatpush3.msra.mxu1 %v1713_v34  ;;  %v1426_v34 = vpop.permute.xlu1 %1425 }
 0x34d   : > { %3431 = vmatmul.mubr.f32.vlgmr.msra.gmra.mxu1 %v1730_v26 }
 0x34e   : > { %3433 = vmatprep.mubr.f32.mxu1 %v1731_v45 }
 0x350   : > { %v4754_v26 = vpop.permute.xlu1 %1417 }
 0x351   : > { %3434 = vmatmul.mubr.f32.gmra.mxu1 %v1732_v4 }
 0x352   : > { %3436 = vmatprep.mubr.f32.mxu1 %v1733_v57 }
 0x354   : > { %v4756_v45 = vpop.permute.xlu1 %1413 }
 0x355   : > { %3437 = vmatmul.mubr.f32.gmra.mxu1 %v1734_v28 }
 0x356   : > { %3439 = vmatprep.mubr.f32.mxu1 %v1735_v56 }
 0x358   : > { %v4758_v4 = vpop.permute.xlu1 %1409 }
 0x359   : > { %3440 = vmatmul.mubr.f32.gmra.mxu1 %v1736_v13 }
 0x35a   : > { %3442 = vmatprep.mubr.f32.mxu1 %v1737_v30 }
 0x35c   : > { %v4760_v57 = vpop.permute.xlu1 %1385 }
 0x35d   : > { %3443 = vmatmul.mubr.f32.gmra.mxu1 %v1738_v62 }
 0x35e   : > { %3445 = vmatprep.mubr.f32.mxu1 %v1739_v20 }
 0x360   : > { %v4762_v28 = vpop.permute.xlu1 %1381 }
 0x361   : > { %3446 = vmatmul.mubr.f32.gmra.mxu1 %v1740_v52  ;;  %v4774_v52 = vpop.permute.xlu0 %1429 }
 0x362   : > { %3448 = vmatprep.mubr.f32.mxu1 %v1741_v55 }
 0x364   : > { %v4764_v56 = vpop.permute.xlu1 %1373 }
 0x365   : > { %3449 = vmatmul.mubr.f32.gmra.mxu1 %v1742_v31  ;;  %v1422_v31 = vpop.permute.xlu0 %1421 }
 0x366   : > { %3451 = vmatprep.mubr.f32.mxu1 %v1743_v38 }
 0x368   : > { %v4766_v13 = vpop.permute.xlu1 %1369 }
 0x369   : > { %3452 = vmatmul.mubr.f32.gmra.mxu1 %v1744_v23  ;;  %5832 = vst [vmem:[#allocation41_spill] sm:$0xff] %v4766_v13  ;;  %v4778_v38 = vpop.permute.xlu0 %1389 }
 0x36c   : > { %v4768_v30 = vpop.permute.xlu1 %1365 }
 0x36d   : > { %v4782_v8 = vpop.permute.xlu0 %1377 }
 0x370   : > { %v4770_v62 = vpop.permute.xlu1 %1361 }
 0x371   : > { %5833 = vst [vmem:[#allocation43_spill] sm:$0xff] %v4770_v62  ;;  %v2513_v11 = vpop.permute.xlu0 %2512 }
 0x374   : > { %v4772_v20 = vpop.permute.xlu1 %1357 }
 0x375   : > { %v4788_v5 = vpop.permute.xlu0 %2510 }
 0x378   : > { %v4776_v55 = vpop.permute.xlu1 %1353 }
 0x379   : > { %5834 = vst [vmem:[#allocation44_spill] sm:$0xff] %v4776_v55 }
 0x37c   : > { %v4780_v23 = vpop.permute.xlu1 %1349 }
 0x37d   : > { %5835 = vst [vmem:[#allocation42_spill] sm:$0xff] %v4780_v23 }
 0x380   : > { %v4784_v27 = vpop.permute.xlu1 %1345 }
 0x381   : > { %5836 = vst [vmem:[#allocation47_spill] sm:$0xff] %v4784_v27 }
 0x384   : > { %v4786_v25 = vpop.permute.xlu1 %1341 }
 0x385   : > { %5837 = vst [vmem:[#allocation46_spill] sm:$0xff] %v4786_v25 }
 0x388   : > { %v4790_v40 = vpop.permute.xlu1 %1337 }
 0x389   : > { %5838 = vst [vmem:[#allocation48_spill] sm:$0xff] %v4790_v40  ;;  %v3672_v40 = vpop.eup %3671 }
 0x38a   : > { %v2417_v0 = vmul.f32 0.6931472, %v3672_v40 }
 0x38c   : > { %v4794_v17 = vpop.permute.xlu1 %1333  ;;  %v2433_v23 = vadd.f32 0.9189385, %v2417_v0 }
 0x38d   : > { %5839 = vst [vmem:[#allocation50_spill] sm:$0xff] %v4794_v17 }
 0x38e   : > { %v4833_v55 = vadd.f32 %v2513_v11, %v2433_v23  ;;  %v1475_v11 = vsub.f32 %v1422_v31, %v4664_v46 }
 0x390   : > { %v4792_v50 = vpop.permute.xlu0 %1550  ;;  %v4798_v15 = vpop.permute.xlu1 %2484  ;;  %v1507_v7 = vmul.f32 %v1475_v11, %v1475_v11 }
 0x394   : > { %v4796_v61 = vpop.permute.xlu0 %1548  ;;  %v4803_v41 = vpop.permute.xlu1 %2482 }
 0x395   : > { %5840 = vst [vmem:[#allocation45_spill] sm:$0xff] %v4796_v61 }
 0x398   : > { %v4800_v3 = vpop.permute.xlu0 %1554  ;;  %v4807_v6 = vpop.permute.xlu1 %2488 }
 0x39c   : > { %v4805_v14 = vpop.permute.xlu0 %1552  ;;  %v4811_v9 = vpop.permute.xlu1 %2486 }
 0x39d   : > { %5842 = vst [vmem:[#allocation52_spill] sm:$0xff] %v4805_v14 }
 0x3a0   : > { %v4809_v1 = vpop.permute.xlu0 %1558  ;;  %v4823_v27 = vpop.permute.xlu1 %2492 }
 0x3a4   : > { %v4817_v54 = vpop.permute.xlu0 %1556 }
 0x3a5   : > { %5843 = vst [vmem:[#allocation53_spill] sm:$0xff] %v4817_v54  ;;  %v1476_v54 = vsub.f32 %v1426_v34, %v4653_v22 }
 0x3a7   : > { %v1508_v34 = vmul.f32 %v1476_v54, %v1476_v54  ;;  %v5849_v54 = vld [vmem:[#allocation6_spill] sm:$0xff] }
 0x40d   : > { %v4813_v17 = vpop.f32.mrf.mxu1 }
 0x40e   : > { %v1907_v25 = vsub.f32 %v4687_v39, %v4813_v17 }
 0x40f   : > { %v4819_v12 = vpop.f32.mrf.mxu1 }
 0x410   : > { %5844 = vst [vmem:[#allocation49_spill] sm:$0xff] %v4819_v12  ;;  %v1939_v61 = vmul.f32 %v1907_v25, %v1907_v25  ;;  %v1906_v14 = vsub.f32 %v4698_v18, %v4819_v12  ;;  %v5847_v25 = vld [vmem:[#allocation10_spill] sm:$0xff]  ;;  %v4837_v12 = vpop.permute.xlu0 %1562 }
 0x411   : > { %v4825_v35 = vpop.f32.mrf.mxu1  ;;  %3673 = vlog2.f32 %v5847_v25 }
 0x412   : > { %5845 = vst [vmem:[#allocation54_spill] sm:$0xff] %v4825_v35  ;;  %v1938_v62 = vmul.f32 %v1906_v14, %v1906_v14  ;;  %v1909_v40 = vsub.f32 %v4664_v46, %v4825_v35  ;;  %1972 = vrot.lane.b32.xlu1 %v1939_v61, %s3863_s17  ;;  %v4843_v61 = vpop.permute.xlu1 %2490  ;;  %v1474_v35 = vsub.f32 %v4754_v26, %v4676_v42 }
 0x413   : > { %v4830_v44 = vpop.f32.mrf.mxu1 }
 0x414   : > { %5846 = vst [vmem:[#allocation55_spill] sm:$0xff] %v4830_v44  ;;  %1970 = vrot.lane.b32.xlu0 %v1938_v62, %s3863_s17  ;;  %v1941_v13 = vmul.f32 %v1909_v40, %v1909_v40  ;;  %v1908_v14 = vsub.f32 %v4676_v42, %v4830_v44  ;;  %v5848_v62 = vld [vmem:[#allocation8_spill] sm:$0xff]  ;;  %v4853_v25 = vpop.permute.xlu0 %1560  ;;  %v1407_v42 = vsub.f32 %v4778_v38, %v4548_v24 }
 0x415   : > { %v4845_v0 = vpop.f32.mrf.mxu1  ;;  %3675 = vlog2.f32 %v5848_v62  ;;  %v1506_v62 = vmul.f32 %v1474_v35, %v1474_v35  ;;  %v1406_v38 = vsub.f32 %v4760_v57, %v4564_v33 }
 0x416   : > { %2592 = vrot.lane.b32.xlu1 %v4833_v55, %s3863_s17  ;;  %v1940_v23 = vmul.f32 %v1908_v14, %v1908_v14  ;;  %v1911_v40 = vsub.f32 %v4641_v53, %v4845_v0  ;;  %3677 = vlog2.f32 %v5849_v54  ;;  %v2497_v46 = vpop.permute.xlu1 %2496 }
 0x417   : > { %v4855_v44 = vpop.f32.mrf.mxu1 }
 0x418   : > { %1976 = vrot.lane.b32.xlu0 %v1941_v13, %s3863_s17  ;;  %v1943_v13 = vmul.f32 %v1911_v40, %v1911_v40  ;;  %v1910_v31 = vsub.f32 %v4653_v22, %v4855_v44  ;;  %v1567_v26 = vpop.permute.xlu0 %1566 }
 0x419   : > { %v4864_v14 = vpop.f32.mrf.mxu1 }
 0x41a   : > { %1544 = vrot.lane.b32.xlu1 %v1508_v34, %s3863_s17  ;;  %v1473_v34 = vsub.f32 %v4756_v45, %v4687_v39  ;;  %v1942_v40 = vmul.f32 %v1910_v31, %v1910_v31  ;;  %v1913_v22 = vsub.f32 %v4500_v19, %v4864_v14  ;;  %v1472_v39 = vsub.f32 %v4758_v4, %v4698_v18 }
 0x41b   : > { %v4877_v54 = vpop.f32.mrf.mxu1  ;;  %v1503_v45 = vmul.f32 %v1407_v42, %v1407_v42  ;;  %v1502_v42 = vmul.f32 %v1406_v38, %v1406_v38 }
 0x41c   : > { %1974 = vrot.lane.b32.xlu0 %v1940_v23, %s3863_s17  ;;  %v5850_v23 = vld [vmem:[#allocation4_spill] sm:$0xff]  ;;  %v1505_v35 = vmul.f32 %v1473_v34, %v1473_v34  ;;  %v1912_v24 = vsub.f32 %v4506_v43, %v4877_v54  ;;  %v1565_v34 = vpop.permute.xlu0 %1564  ;;  %v1504_v4 = vmul.f32 %v1472_v39, %v1472_v39 }
 0x41d   : > { %3679 = vlog2.f32 %v5850_v23  ;;  %v5851_v23 = vld [vmem:[#allocation2_spill] sm:$0xff]  ;;  %v4885_v19 = vadd.f32 %v1567_v26, %v1503_v45  ;;  %v4890_v18 = vpop.f32.mrf.mxu1  ;;  %v4894_v26 = vadd.f32 %v1565_v34, %v1502_v42 }
 0x41e   : > { %1542 = vrot.lane.b32.xlu1 %v1507_v7, %s3863_s17  ;;  %v3674_v11 = vpop.eup %3673  ;;  %v4875_v7 = vpop.permute.xlu1 %2494  ;;  %3681 = vlog2.f32 %v5851_v23  ;;  %v1915_v43 = vsub.f32 %v4516_v37, %v4890_v18 }
 0x41f   : > { %3683 = vrsqrt.f32 %v4885_v19  ;;  %vm1707_vm5 = vcmp.eq.f32.partialorder %v4885_v19, inf  ;;  %vm1709_vm6 = vcmp.eq.f32.partialorder %v4885_v19, 0.0  ;;  %vm1700_vm7 = vcmp.eq.f32.partialorder %v4894_v26, inf }
 0x420   : > { %1980 = vrot.lane.b32.xlu0 %v1943_v13, %s3863_s17  ;;  %v2405_v13 = vmul.f32 0.6931472, %v3674_v11  ;;  %3685 = vrsqrt.f32 %v4894_v26  ;;  %vm1702_vm8 = vcmp.eq.f32.partialorder %v4894_v26, 0.0 }
 0x422   : > { %1540 = vrot.lane.b32.xlu1 %v1506_v62, %s3863_s17  ;;  %v3676_v31 = vpop.eup %3675  ;;  %v1945_v62 = vmul.f32 %v1913_v22, %v1913_v22  ;;  %v2427_v11 = vadd.f32 0.9189385, %v2405_v13  ;;  %v1944_v22 = vmul.f32 %v1912_v24, %v1912_v24  ;;  %v1947_v13 = vmul.f32 %v1915_v43, %v1915_v43 }
 0x423   : > { %v2401_v57 = vmul.f32 0.6931472, %v3676_v31  ;;  %v3678_v33 = vpop.eup %3677 }
 0x424   : > { %1978 = vrot.lane.b32.xlu0 %v1942_v40, %s3863_s17  ;;  %v2501_v40 = vpop.permute.xlu1 %2500  ;;  %v2397_v45 = vmul.f32 0.6931472, %v3678_v33 }
 0x425   : > { %v4901_v39 = vadd.f32 %v2501_v40, %v2427_v11  ;;  %v2425_v38 = vadd.f32 0.9189385, %v2401_v57 }
 0x426   : > { %1538 = vrot.lane.b32.xlu1 %v1505_v35, %s3863_s17  ;;  %v4899_v35 = vpop.f32.mrf.mxu1  ;;  %v2423_v34 = vadd.f32 0.9189385, %v2397_v45 }
 0x427   : > { %v1914_v31 = vsub.f32 %v4528_v32, %v4899_v35  ;;  %v4911_v23 = vadd.f32 %v2497_v46, %v2425_v38 }
 0x428   : > { %1984 = vrot.lane.b32.xlu0 %v1945_v62, %s3863_s17  ;;  %v4909_v24 = vpop.f32.mrf.mxu1  ;;  %v4921_v57 = vadd.f32 %v4823_v27, %v2423_v34 }
 0x429   : > { %v1946_v33 = vmul.f32 %v1914_v31, %v1914_v31 }
 0x42a   : > { %1536 = vrot.lane.b32.xlu1 %v1504_v4, %s3863_s17  ;;  %v3680_v37 = vpop.eup %3679  ;;  %v1917_v4 = vsub.f32 %v4536_v21, %v4909_v24  ;;  %v4918_v42 = vpop.f32.mrf.mxu1  ;;  %5852 = vst [vmem:[#allocation51_spill] sm:$0xff] %v4921_v57 }
 0x42b   : > { %v2393_v62 = vmul.f32 0.6931472, %v3680_v37  ;;  %v3682_v32 = vpop.eup %3681 }
 0x42c   : > { %1982 = vrot.lane.b32.xlu0 %v1944_v22, %s3863_s17  ;;  %v2389_v46 = vmul.f32 0.6931472, %v3682_v32  ;;  %v1949_v40 = vmul.f32 %v1917_v4, %v1917_v4  ;;  %v1916_v22 = vsub.f32 %v4545_v49, %v4918_v42  ;;  %v3684_v21 = vpop.eup %3683  ;;  %v4928_v43 = vpop.f32.mrf.mxu1  ;;  %v5855_v32 = vld [vmem:[#allocation17_spill] sm:$0xff] }
 0x42d   : > { %v2421_v11 = vadd.f32 0.9189385, %v2393_v62  ;;  %v1706_v49 = vmul.f32 %v3684_v21, %v4885_v19  ;;  %v3686_v31 = vpop.eup %3685  ;;  %3687 = vlog2.f32 %v5855_v32  ;;  %v5859_v32 = vld [vmem:[#allocation13_spill] sm:$0xff] }
 0x42e   : > { %2580 = vrot.lane.b32.xlu1 %v4901_v39, %s3863_s17  ;;  %v2419_v27 = vadd.f32 0.9189385, %v2389_v46  ;;  %v1948_v38 = vmul.f32 %v1916_v22, %v1916_v22  ;;  %v4939_v37 = vpop.f32.mrf.mxu1  ;;  %v2499_v22 = vpop.permute.xlu1 %2498 }
 0x42f   : > { %v4931_v45 = vadd.f32 %v4807_v6, %v2421_v11  ;;  %v1918_v34 = vsub.f32 %v4577_v60, %v4939_v37 }
 0x430   : > { %1988 = vrot.lane.b32.xlu0 %v1947_v13, %s3863_s17  ;;  %v1919_v13 = vsub.f32 %v4558_v47, %v4928_v43  ;;  %v4942_v62 = vadd.f32 %v4798_v15, %v2419_v27  ;;  %v1708_v47 = vsel %vm1707_vm5, %v4885_v19, %v1706_v49  ;;  %v4952_v4 = vpop.f32.mrf.mxu1  ;;  %v1710_v15 = vand.u32 2147483648, %v4885_v19  ;;  %v5857_v49 = vld [vmem:[#allocation15_spill] sm:$0xff] }
 0x431   : > { %5853 = vst [vmem:[#allocation56_spill] sm:$0xff] %v4931_v45  ;;  %v1950_v60 = vmul.f32 %v1918_v34, %v1918_v34  ;;  %v1921_v11 = vsub.f32 %v4551_v2, %v4952_v4  ;;  %v1703_v27 = vand.u32 2147483648, %v4894_v26 }
 0x432   : > { %2576 = vrot.lane.b32.xlu1 %v4911_v23, %s3863_s17  ;;  %5854 = vst [vmem:[#allocation16_spill] sm:$0xff] %v4942_v62  ;;  %v1951_v6 = vmul.f32 %v1919_v13, %v1919_v13  ;;  %v1711_v46 = vsel %vm1709_vm6, %v1710_v15, %v1708_v47  ;;  %v4963_v21 = vpop.f32.mrf.mxu1  ;;  %v5858_v47 = vld [vmem:[#allocation12_spill] sm:$0xff] }
 0x433   : > { %v1953_v13 = vmul.f32 %v1921_v11, %v1921_v11  ;;  %v1920_v2 = vsub.f32 %v4567_v29, %v4963_v21  ;;  %v5860_v11 = vld [vmem:[#allocation11_spill] sm:$0xff] }
 0x434   : > { %1986 = vrot.lane.b32.xlu0 %v1946_v33, %s3863_s17  ;;  %v1699_v33 = vmul.f32 %v3686_v31, %v4894_v26  ;;  %v2505_v31 = vpop.permute.xlu1 %2504 }
 0x435   : > { %v1952_v34 = vmul.f32 %v1920_v2, %v1920_v2 }
 0x436   : > { %2572 = vrot.lane.b32.xlu1 %v4921_v57, %s3863_s17 }
 0x438   : > { %1992 = vrot.lane.b32.xlu0 %v1949_v40, %s3863_s17  ;;  %v1701_v40 = vsel %vm1700_vm7, %v4894_v26, %v1699_v33  ;;  %v2503_v15 = vpop.permute.xlu1 %2502 }
 0x439   : > { %v1704_v19 = vsel %vm1702_vm8, %v1703_v27, %v1701_v40  ;;  %v3846_v27 = vld [vmem:[%s3922_s6] sm:$0xff]  ;;  %s3864_s6 = smov 24  }
 0x43a   : > { %2568 = vrot.lane.b32.xlu1 %v4931_v45, %s3863_s17  ;;  %v3688_v26 = vpop.eup %3687 }
 0x43b   : > { %v2415_v29 = vmul.f32 0.6931472, %v3688_v26  ;;  %v5863_v26 = vld [vmem:[#allocation7_spill] sm:$0xff] }
 0x43c   : > { %1990 = vrot.lane.b32.xlu0 %v1948_v38, %s3863_s17  ;;  %v5856_v38 = vld [vmem:[#allocation14_spill] sm:$0xff] }
 0x43d   : > { %3689 = vlog2.f32 %v5856_v38 }
 0x43e   : > { %2564 = vrot.lane.b32.xlu1 %v4942_v62, %s3863_s17  ;;  %3691 = vlog2.f32 %v5857_v49 }
 0x43f   : > { %3693 = vlog2.f32 %v5858_v47 }
 0x440   : > { %1996 = vrot.lane.b32.xlu0 %v1951_v6, %s3863_s17  ;;  %v1477_v6 = vsub.f32 %v4774_v52, %v4641_v53  ;;  %3695 = vlog2.f32 %v5859_v32  ;;  %v2509_v52 = vpop.permute.xlu1 %2508 }
 0x441   : > { %3697 = vlog2.f32 %v5860_v11 }
 0x442   : > { %2672 = vrot.lane.b32.xlu1 %v1711_v46, %s3862_s16  ;;  %v1509_v33 = vmul.f32 %v1477_v6, %v1477_v6  ;;  %v5862_v6 = vmov 36  }
 0x444   : > { %1994 = vrot.lane.b32.xlu0 %v1950_v60, %s3863_s17  ;;  %v2432_v60 = vadd.f32 0.9189385, %v2415_v29  ;;  %v2507_v47 = vpop.permute.xlu1 %2506 }
 0x446   : > { %2670 = vrot.lane.b32.xlu1 %v1704_v19, %s3862_s16  ;;  %v4983_v38 = vadd.f32 %v4788_v5, %v2432_v60  ;;  %v5861_v19 = vld [vmem:[#allocation9_spill] sm:$0xff] }
 0x447   : > { %3699 = vlog2.f32 %v5861_v19 }
 0x448   : > { %2000 = vrot.lane.b32.xlu0 %v1953_v13, %s3863_s17  ;;  %3701 = vlog2.f32 %v5863_v26 }
 0x44a   : > { %v3690_v46 = vpop.eup %3689 }
 0x44b   : > { %v2413_v40 = vmul.f32 0.6931472, %v3690_v46  ;;  %v3692_v53 = vpop.eup %3691  ;;  %v5864_v46 = vld [vmem:[#allocation5_spill] sm:$0xff] }
 0x44c   : > { %1998 = vrot.lane.b32.xlu0 %v1952_v34, %s3863_s17  ;;  %v2411_v2 = vmul.f32 0.6931472, %v3692_v53  ;;  %v3694_v49 = vpop.eup %3693  ;;  %3703 = vlog2.f32 %v5864_v46  ;;  %v5865_v53 = vld [vmem:[#allocation3_spill] sm:$0xff] }
 0x44d   : > { %v2431_v13 = vadd.f32 0.9189385, %v2413_v40  ;;  %v3696_v5 = vpop.eup %3695  ;;  %3705 = vlog2.f32 %v5865_v53 }
 0x44e   : > { %v2430_v29 = vadd.f32 0.9189385, %v2411_v2  ;;  %v2407_v11 = vmul.f32 0.6931472, %v3696_v5  ;;  %v3698_v40 = vpop.eup %3697  ;;  %v1405_v5 = vsub.f32 %v4762_v28, %v4561_v63 }
 0x44f   : > { %v4989_v34 = vadd.f32 %v2509_v52, %v2431_v13  ;;  %v2403_v52 = vmul.f32 0.6931472, %v3698_v40 }
 0x450   : > { %1546 = vrot.lane.b32.xlu0 %v1509_v33, %s3863_s17  ;;  %v2409_v33 = vmul.f32 0.6931472, %v3694_v49  ;;  %v4994_v32 = vadd.f32 %v2507_v47, %v2430_v29  ;;  %v2428_v19 = vadd.f32 0.9189385, %v2407_v11 }
 0x452   : > { %v2429_v60 = vadd.f32 0.9189385, %v2409_v33  ;;  %v5004_v2 = vadd.f32 %v2503_v15, %v2428_v19 }
 0x454   : > { %1329 = vperm.xlu0 %3540, %v3846_v27   ;;  %v4999_v27 = vadd.f32 %v2505_v31, %v2429_v60  ;;  %v3700_v13 = vpop.eup %3699 }
 0x455   : > { %v2399_v49 = vmul.f32 0.6931472, %v3700_v13  ;;  %v3702_v47 = vpop.eup %3701 }
 0x456   : > { %v2395_v31 = vmul.f32 0.6931472, %v3702_v47 }
 0x457   : > { %v2424_v33 = vadd.f32 0.9189385, %v2399_v49 }
 0x458   : > { %2590 = vrot.lane.b32.xlu0 %v4983_v38, %s3863_s17  ;;  %v2422_v60 = vadd.f32 0.9189385, %v2395_v31 }
 0x459   : > { %3542 = vset.pattern.permute.xlu0 %v5862_v6  ;;  %v2426_v6 = vadd.f32 0.9189385, %v2403_v52  ;;  %v3704_v29 = vpop.eup %3703  ;;  %v5015_v15 = vadd.f32 %v4875_v7, %v2424_v33 }
 0x45a   : > { %v2391_v46 = vmul.f32 0.6931472, %v3704_v29  ;;  %v3706_v11 = vpop.eup %3705  ;;  %v5020_v40 = vadd.f32 %v4843_v61, %v2422_v60 }
 0x45b   : > { %v5008_v26 = vadd.f32 %v2499_v22, %v2426_v6  ;;  %v1501_v22 = vmul.f32 %v1405_v5, %v1405_v5  ;;  %v2387_v52 = vmul.f32 0.6931472, %v3706_v11 }
 0x45c   : > { %2588 = vrot.lane.b32.xlu0 %v4989_v34, %s3863_s17  ;;  %5866 = vst [vmem:[#allocation10_spill] sm:$0xff] %v5020_v40  ;;  %v2420_v19 = vadd.f32 0.9189385, %v2391_v46 }
 0x45d   : > { %v1597_v53 = vadd.f32 %v4837_v12, %v1501_v22  ;;  %v2418_v7 = vadd.f32 0.9189385, %v2387_v52  ;;  %v1891_v12 = vsub.f32 %v4683_v58, %v4813_v17  ;;  %v1399_v52 = vsub.f32 %v4772_v20, %v4620_v59 }
 0x45e   : > { %v5026_v28 = vadd.f32 %v4811_v9, %v2420_v19  ;;  %v1895_v19 = vsub.f32 %v4637_v10, %v4845_v0 }
 0x45f   : > { %3707 = vrsqrt.f32 %v1597_v53  ;;  %v5031_v13 = vadd.f32 %v4803_v41, %v2418_v7  ;;  %v1923_v61 = vmul.f32 %v1891_v12, %v1891_v12  ;;  %vm1693_vm9 = vcmp.eq.f32.partialorder %v1597_v53, inf }
 0x460   : > { %2586 = vrot.lane.b32.xlu0 %v4994_v32, %s3863_s17  ;;  %5867 = vst [vmem:[#allocation8_spill] sm:$0xff] %v5026_v28  ;;  %v1696_v46 = vand.u32 2147483648, %v1597_v53  ;;  %vm1695_vm10 = vcmp.eq.f32.partialorder %v1597_v53, 0.0  ;;  %v1401_v7 = vsub.f32 %v4768_v30, %v4603_v48  ;;  %v1495_v12 = vmul.f32 %v1399_v52, %v1399_v52 }
 0x461   : > { %5868 = vst [vmem:[#allocation6_spill] sm:$0xff] %v5031_v13  ;;  %v1896_v30 = vsub.f32 %v4628_v51, %v4877_v54 }
 0x463   : > { %v1928_v54 = vmul.f32 %v1896_v30, %v1896_v30  ;;  %v5874_v30 = vld [vmem:[#allocation53_spill] sm:$0xff] }
 0x464   : > { %2584 = vrot.lane.b32.xlu0 %v4999_v27, %s3863_s17 }
 0x468   : > { %2582 = vrot.lane.b32.xlu0 %v5004_v2, %s3863_s17 }
 0x46c   : > { %2578 = vrot.lane.b32.xlu0 %v5008_v26, %s3863_s17  ;;  %v3708_v49 = vpop.eup %3707 }
 0x46d   : > { %v1692_v31 = vmul.f32 %v3708_v49, %v1597_v53  ;;  %v1927_v49 = vmul.f32 %v1895_v19, %v1895_v19  ;;  %v5871_v19 = vld [vmem:[#allocation44_spill] sm:$0xff] }
 0x46f   : > { %v1694_v41 = vsel %vm1693_vm9, %v1597_v53, %v1692_v31  ;;  %v1403_v53 = vsub.f32 %v4764_v56, %v4586_v16  ;;  %v1497_v31 = vmul.f32 %v1401_v7, %v1401_v7  ;;  %v1398_v7 = vsub.f32 %v5871_v19, %v4628_v51 }
 0x470   : > { %2574 = vrot.lane.b32.xlu0 %v5015_v15, %s3863_s17  ;;  %v1697_v60 = vsel %vm1695_vm10, %v1696_v46, %v1694_v41  ;;  %v1404_v41 = vsub.f32 %v4782_v8, %v4574_v36  ;;  %v1899_v8 = vsub.f32 %v4603_v48, %v4890_v18 }
 0x471   : > { %v1499_v20 = vmul.f32 %v1403_v53, %v1403_v53  ;;  %v5066_v0 = vadd.f32 %v4800_v3, %v1497_v31  ;;  %v5870_v3 = vld [vmem:[#allocation41_spill] sm:$0xff]  ;;  %v5873_v31 = vld [vmem:[#allocation43_spill] sm:$0xff]  ;;  %v1494_v51 = vmul.f32 %v1398_v7, %v1398_v7  ;;  %v1901_v7 = vsub.f32 %v4586_v16, %v4909_v24 }
 0x472   : > { %v1500_v52 = vmul.f32 %v1404_v41, %v1404_v41  ;;  %v1931_v18 = vmul.f32 %v1899_v8, %v1899_v8  ;;  %v5876_v41 = vld [vmem:[#allocation40_spill] sm:$0xff]  ;;  %v5878_v8 = vld [vmem:[#allocation45_spill] sm:$0xff] }
 0x473   : > { %v5073_v46 = vadd.f32 %v4809_v1, %v1499_v20 }
 0x474   : > { %2570 = vrot.lane.b32.xlu0 %v5020_v40, %s3863_s17 }
 0x475   : > { %vm1679_vm11 = vcmp.eq.f32.partialorder %v5073_v46, inf  ;;  %vm1681_vm15 = vcmp.eq.f32.partialorder %v5073_v46, 0.0 }
 0x478   : > { %2566 = vrot.lane.b32.xlu0 %v5026_v28, %s3863_s17 }
 0x47c   : > { %2562 = vrot.lane.b32.xlu0 %v5031_v13, %s3863_s17 }
 0x484   : > { %v1973_v6 = vpop.permute.xlu1 %1972 }
 0x485   : > { %v5037_v47 = vadd.f32 %v1973_v6, %v1923_v61  ;;  %v1897_v6 = vsub.f32 %v4620_v59, %v4864_v14  ;;  %v5869_v14 = vld [vmem:[#allocation34_spill] sm:$0xff] }
 0x486   : > { %v5039_v9 = vpop.permute.xlu0 %1970 }
 0x487   : > { %v1929_v59 = vmul.f32 %v1897_v6, %v1897_v6 }
 0x488   : > { %v2593_v33 = vpop.permute.xlu1 %2592 }
 0x489   : > { %v2625_v29 = vadd.f32 %v2593_v33, %v4833_v55  ;;  %v5061_v33 = vadd.f32 %v4792_v50, %v1495_v12  ;;  %v5872_v12 = vld [vmem:[#allocation36_spill] sm:$0xff] }
 0x48a   : > { %v5042_v5 = vpop.permute.xlu0 %1976  ;;  %v1400_v20 = vsub.f32 %v5873_v31, %v5872_v12 }
 0x48b   : > { %2800 = vrot.lane.b32.xlu0 %v2625_v29, %s3862_s16  ;;  %3709 = vrsqrt.f32 %v5061_v33 }
 0x48c   : > { %v1496_v19 = vmul.f32 %v1400_v20, %v1400_v20 }
 0x48e   : > { %v5045_v17 = vpop.permute.xlu0 %1974 }
 0x48f   : > { %2668 = vrot.lane.b32.xlu0 %v1697_v60, %s3862_s16  ;;  %v1402_v60 = vsub.f32 %v5870_v3, %v5869_v14 }
 0x491   : > { %v1498_v53 = vmul.f32 %v1402_v60, %v1402_v60 }
 0x492   : > { %v1981_v11 = vpop.permute.xlu0 %1980 }
 0x493   : > { %v5063_v29 = vadd.f32 %v1981_v11, %v1927_v49  ;;  %v1898_v49 = vsub.f32 %v5872_v12, %v4899_v35  ;;  %v5098_v48 = vadd.f32 %v5874_v30, %v1498_v53  ;;  %v1894_v35 = vsub.f32 %v5876_v41, %v4855_v44 }
 0x494   : > { %v5111_v53 = vadd.f32 %v5878_v8, %v1494_v51  ;;  %v5881_v51 = vld [vmem:[#allocation46_spill] sm:$0xff] }
 0x495   : > { %3711 = vrsqrt.f32 %v5063_v29  ;;  %v1930_v60 = vmul.f32 %v1898_v49, %v1898_v49  ;;  %v5879_v49 = vld [vmem:[#allocation52_spill] sm:$0xff]  ;;  %v1926_v16 = vmul.f32 %v1894_v35, %v1894_v35  ;;  %vm2071_vm12 = vcmp.eq.f32.partialorder %v5063_v29, inf }
 0x496   : > { %v5048_v22 = vpop.permute.xlu0 %1978  ;;  %3713 = vrsqrt.f32 %v5066_v0  ;;  %v5125_v20 = vadd.f32 %v5879_v49, %v1496_v19  ;;  %v5882_v49 = vld [vmem:[#allocation57_spill] sm:$0xff]  ;;  %vm2073_vm14 = vcmp.eq.f32.partialorder %v5063_v29, 0.0  ;;  %vm1672_vm5 = vcmp.eq.f32.partialorder %v5098_v48, inf }
 0x497   : > { %3715 = vrsqrt.f32 %v5073_v46  ;;  %v5140_v35 = vadd.f32 %v5048_v22, %v1926_v16 }
 0x498   : > { %v3710_v31 = vpop.eup %3709 }
 0x49a   : > { %v1985_v55 = vpop.permute.xlu0 %1984 }
 0x49b   : > { %v5077_v50 = vadd.f32 %v1985_v55, %v1929_v59  ;;  %v5090_v55 = vadd.f32 %v4853_v25, %v1500_v52  ;;  %v5875_v25 = vld [vmem:[#allocation42_spill] sm:$0xff]  ;;  %v5877_v59 = vld [vmem:[#allocation47_spill] sm:$0xff] }
 0x49c   : > { %v1396_v3 = vsub.f32 %v5877_v59, %v5876_v41 }
 0x49d   : > { %3717 = vrsqrt.f32 %v5077_v50  ;;  %vm1686_vm13 = vcmp.eq.f32.partialorder %v5090_v55, inf  ;;  %vm2085_vm0 = vcmp.eq.f32.partialorder %v5077_v50, inf  ;;  %vm1688_vm6 = vcmp.eq.f32.partialorder %v5090_v55, 0.0 }
 0x49e   : > { %v1983_v61 = vpop.permute.xlu0 %1982  ;;  %vm2087_vm7 = vcmp.eq.f32.partialorder %v5077_v50, 0.0 }
 0x49f   : > { %v5085_v1 = vadd.f32 %v1983_v61, %v1928_v54  ;;  %v1397_v61 = vsub.f32 %v5875_v25, %v4637_v10  ;;  %v1900_v10 = vsub.f32 %v5869_v14, %v4918_v42  ;;  %v5883_v42 = vld [vmem:[#allocation35_spill] sm:$0xff] }
 0x4a1   : > { %3719 = vrsqrt.f32 %v5085_v1  ;;  %v5120_v44 = vmul.f32 %v1397_v61, %v1397_v61  ;;  %v1903_v61 = vsub.f32 %v4561_v63, %v4928_v43  ;;  %v5148_v63 = vmul.f32 %v3710_v31, %v5061_v33 }
 0x4a2   : > { %v1989_v56 = vpop.permute.xlu0 %1988  ;;  %3721 = vrsqrt.f32 %v5090_v55  ;;  %v3712_v30 = vpop.eup %3711  ;;  %vm2078_vm8 = vcmp.eq.f32.partialorder %v5085_v1, inf  ;;  %v2081_v28 = vand.u32 2147483648, %v5085_v1  ;;  %vm2080_vm9 = vcmp.eq.f32.partialorder %v5085_v1, 0.0 }
 0x4a3   : > { %v5108_v54 = vadd.f32 %v1989_v56, %v1931_v18  ;;  %3723 = vrsqrt.f32 %v5098_v48  ;;  %v5122_v56 = vmul.f32 %v1396_v3, %v1396_v3  ;;  %v5880_v18 = vld [vmem:[#allocation37_spill] sm:$0xff]  ;;  %v3714_v14 = vpop.eup %3713  ;;  %v1932_v3 = vmul.f32 %v1900_v10, %v1900_v10 }
 0x4a4   : > { %v5129_v25 = vsub.f32 %v5881_v51, %v5880_v18  ;;  %v3716_v59 = vpop.eup %3715  ;;  %v2070_v19 = vmul.f32 %v3712_v30, %v5063_v29  ;;  %v1935_v22 = vmul.f32 %v1903_v61, %v1903_v61  ;;  %v1905_v51 = vsub.f32 %v5882_v49, %v4952_v4 }
 0x4a5   : > { %3725 = vrsqrt.f32 %v5108_v54  ;;  %v5159_v30 = vmul.f32 %v3714_v14, %v5066_v0  ;;  %v2074_v14 = vand.u32 2147483648, %v5063_v29  ;;  %vm2099_vm10 = vcmp.eq.f32.partialorder %v5108_v54, inf }
 0x4a6   : > { %v1987_v11 = vpop.permute.xlu0 %1986  ;;  %3727 = vrsqrt.f32 %v5111_v53  ;;  %v2072_v16 = vsel %vm2071_vm12, %v5063_v29, %v2070_v19  ;;  %v1937_v49 = vmul.f32 %v1905_v51, %v1905_v51  ;;  %v1904_v19 = vsub.f32 %v5883_v42, %v4963_v21 }
 0x4a7   : > { %v5118_v12 = vadd.f32 %v1987_v11, %v1930_v60  ;;  %v1933_v11 = vmul.f32 %v1901_v7, %v1901_v7  ;;  %v1902_v60 = vsub.f32 %v4574_v36, %v4939_v37  ;;  %vm2101_vm12 = vcmp.eq.f32.partialorder %v5108_v54, 0.0 }
 0x4a8   : > { %v1936_v13 = vmul.f32 %v1904_v19, %v1904_v19 }
 0x4a9   : > { %3729 = vrsqrt.f32 %v5118_v12  ;;  %v1934_v31 = vmul.f32 %v1902_v60, %v1902_v60  ;;  %v1689_v60 = vand.u32 2147483648, %v5090_v55 }
 0x4aa   : > { %v1993_v6 = vpop.permute.xlu0 %1992  ;;  %3731 = vrsqrt.f32 %v5125_v20  ;;  %v3718_v43 = vpop.eup %3717 }
 0x4ab   : > { %v5145_v8 = vadd.f32 %v1993_v6, %v1933_v11  ;;  %v1678_v6 = vmul.f32 %v3716_v59, %v5073_v46  ;;  %3733 = vrsqrt.f32 %v5140_v35  ;;  %v2084_v11 = vmul.f32 %v3718_v43, %v5077_v50  ;;  %v5884_v43 = vld [vmem:[#allocation49_spill] sm:$0xff] }
 0x4ad   : > { %3735 = vrsqrt.f32 %v5145_v8  ;;  %v2086_v21 = vsel %vm2085_vm0, %v5077_v50, %v2084_v11  ;;  %vm2115_vm0 = vcmp.eq.f32.partialorder %v5145_v8, 0.0 }
 0x4ae   : > { %v1991_v52 = vpop.permute.xlu0 %1990 }
 0x4af   : > { %v5150_v7 = vadd.f32 %v1991_v52, %v1932_v3  ;;  %v3720_v52 = vpop.eup %3719 }
 0x4b0   : > { %v3722_v61 = vpop.eup %3721 }
 0x4b1   : > { %3737 = vrsqrt.f32 %v5150_v7  ;;  %v3724_v51 = vpop.eup %3723  ;;  %v1685_v42 = vmul.f32 %v3722_v61, %v5090_v55 }
 0x4b2   : > { %v1997_v24 = vpop.permute.xlu0 %1996  ;;  %v3726_v11 = vpop.eup %3725 }
 0x4b3   : > { %v5167_v4 = vadd.f32 %v1997_v24, %v1935_v22  ;;  %v1680_v24 = vsel %vm1679_vm11, %v5073_v46, %v1678_v6  ;;  %v5885_v22 = vld [vmem:[#allocation39_spill] sm:$0xff]  ;;  %v5886_v6 = vld [vmem:[#allocation54_spill] sm:$0xff]  ;;  %v5200_v61 = vpop.eup %3727  ;;  %vm2092_vm11 = vcmp.eq.f32.partialorder %v5118_v12, inf }
 0x4b4   : > { %v1890_v41 = vsub.f32 %v5885_v22, %v5884_v43  ;;  %v5888_v43 = vld [vmem:[#allocation38_spill] sm:$0xff] }
 0x4b5   : > { %3739 = vrsqrt.f32 %v5167_v4 }
 0x4b6   : > { %v1995_v10 = vpop.permute.xlu0 %1994 }
 0x4b7   : > { %v5171_v59 = vadd.f32 %v1995_v10, %v1934_v31  ;;  %v2075_v10 = vsel %vm2073_vm14, %v2074_v14, %v2072_v16  ;;  %v2077_v31 = vmul.f32 %v3720_v52, %v5085_v1  ;;  %v1893_v16 = vsub.f32 %v5880_v18, %v5886_v6  ;;  %v5887_v14 = vld [vmem:[#allocation55_spill] sm:$0xff] }
 0x4b8   : > { %v1892_v37 = vsub.f32 %v5888_v43, %v5887_v14  ;;  %v2088_v52 = vand.u32 2147483648, %v5077_v50  ;;  %v2151_v62 = vsub.f32 0.2, %v2075_v10  ;;  %v1671_v6 = vmul.f32 %v3724_v51, %v5098_v48  ;;  %v3730_v14 = vpop.eup %3729 }
 0x4b9   : > { %3741 = vrsqrt.f32 %v5171_v59  ;;  %v2079_v18 = vsel %vm2078_vm8, %v5085_v1, %v2077_v31  ;;  %v1687_v50 = vsel %vm1686_vm13, %v5090_v55, %v1685_v42  ;;  %v5211_v19 = vpop.eup %3731  ;;  %v1925_v10 = vmul.f32 %v1893_v16, %v1893_v16 }
 0x4ba   : > { %v2001_v3 = vpop.permute.xlu0 %2000  ;;  %v2098_v31 = vmul.f32 %v3726_v11, %v5108_v54  ;;  %v1924_v51 = vmul.f32 %v1892_v37, %v1892_v37  ;;  %v2082_v40 = vsel %vm2080_vm9, %v2081_v28, %v2079_v18  ;;  %v5889_v42 = vand.u32 2147483648, %v5073_v46  ;;  %v3734_v1 = vpop.eup %3733 }
 0x4bb   : > { %v5188_v29 = vadd.f32 %v2001_v3, %v1937_v49  ;;  %v1922_v3 = vmul.f32 %v1890_v41, %v1890_v41  ;;  %v2089_v49 = vsel %vm2087_vm7, %v2088_v52, %v2086_v21  ;;  %v2167_v21 = vmul.f32 15.0, %v2151_v62  ;;  %v3736_v28 = vpop.eup %3735 }
 0x4bc   : > { %v2153_v52 = vsub.f32 0.2, %v2089_v49  ;;  %v5230_v16 = vadd.f32 %v5045_v17, %v1924_v51  ;;  %v5237_v62 = vsel %vm1672_vm5, %v5098_v48, %v1671_v6  ;;  %v2100_v46 = vsel %vm2099_vm10, %v5108_v54, %v2098_v31 }
 0x4bd   : > { %3743 = vrsqrt.f32 %v5188_v29  ;;  %v5214_v41 = vadd.f32 %v5039_v9, %v1922_v3  ;;  %v5227_v9 = vsel %vm1681_vm15, %v5889_v42, %v1680_v24  ;;  %v5243_v37 = vsel %vm1688_vm6, %v1689_v60, %v1687_v50  ;;  %v5245_v24 = vpop.permute.xlu1 %1544 }
 0x4be   : > { %v1999_v36 = vpop.permute.xlu0 %1998  ;;  %3745 = vrsqrt.f32 %v5037_v47  ;;  %v3738_v17 = vpop.eup %3737  ;;  %v2183_v11 = vsub.f32 0.0, %v2167_v21  ;;  %v2169_v3 = vmul.f32 15.0, %v2153_v52  ;;  %v2102_v49 = vand.u32 2147483648, %v5108_v54 }
 0x4bf   : > { %v5206_v45 = vadd.f32 %v1999_v36, %v1936_v13  ;;  %v5220_v13 = vadd.f32 %v5042_v5, %v1925_v10  ;;  %v2091_v36 = vmul.f32 %v3730_v14, %v5118_v12  ;;  %v2152_v5 = vsub.f32 0.2, %v2082_v40 }
 0x4c0   : > { %v2063_v18 = vmul.f32 %v3734_v1, %v5140_v35  ;;  %v2103_v55 = vsel %vm2101_vm12, %v2102_v49, %v2100_v46  ;;  %v2095_v60 = vand.u32 2147483648, %v5118_v12  ;;  %v2112_v6 = vmul.f32 %v3736_v28, %v5145_v8 }
 0x4c1   : > { %3747 = vrsqrt.f32 %v5206_v45  ;;  %v2093_v40 = vsel %vm2092_vm11, %v5118_v12, %v2091_v36  ;;  %vm2064_vm13 = vcmp.eq.f32.partialorder %v5140_v35, inf  ;;  %v2168_v50 = vmul.f32 15.0, %v2152_v5  ;;  %v5267_v28 = vpop.permute.xlu1 %1542 }
 0x4c2   : > { %3749 = vrsqrt.f32 %v5214_v41  ;;  %v3740_v14 = vpop.eup %3739  ;;  %vm2094_vm14 = vcmp.eq.f32.partialorder %v5118_v12, 0.0  ;;  %v2105_v10 = vmul.f32 %v3738_v17, %v5150_v7  ;;  %v2204_v51 = vmul.f32 1.442695, %v2183_v11  ;;  %v5260_v36 = vpop.permute.xlu0 %1546 }
 0x4c3   : > { %3751 = vrsqrt.f32 %v5220_v13  ;;  %v2185_v21 = vsub.f32 0.0, %v2169_v3  ;;  %v2096_v52 = vsel %vm2094_vm14, %v2095_v60, %v2093_v40  ;;  %v5263_v42 = vsel %vm2064_vm13, %v5140_v35, %v2063_v18 }
 0x4c4   : > { %3753 = vrsqrt.f32 %v5230_v16  ;;  %v2155_v1 = vsub.f32 0.2, %v2103_v55  ;;  %vm2113_vm15 = vcmp.eq.f32.partialorder %v5145_v8, inf  ;;  %v2116_v5 = vand.u32 2147483648, %v5145_v8 }
 0x4c5   : > { %v2114_v12 = vsel %vm2113_vm15, %v5145_v8, %v2112_v6  ;;  %vm2106_vm5 = vcmp.eq.f32.partialorder %v5150_v7, inf  ;;  %v2126_v46 = vmul.f32 %v3740_v14, %v5167_v4  ;;  %v2184_v11 = vsub.f32 0.0, %v2168_v50 }
 0x4c6   : > { %v3742_v31 = vpop.eup %3741  ;;  %v2154_v3 = vsub.f32 0.2, %v2096_v52  ;;  %v2107_v49 = vsel %vm2106_vm5, %v5150_v7, %v2105_v10  ;;  %3755 = vpow2.f32 %v2204_v51  ;;  %v2208_v40 = vmul.f32 1.442695, %v2185_v21 }
 0x4c7   : > { %v2119_v18 = vmul.f32 %v3742_v31, %v5171_v59  ;;  %vm2108_vm6 = vcmp.eq.f32.partialorder %v5150_v7, 0.0  ;;  %v2109_v55 = vand.u32 2147483648, %v5150_v7  ;;  %v2171_v6 = vmul.f32 15.0, %v2155_v1 }
 0x4c8   : > { %v2117_v54 = vsel %vm2115_vm0, %v2116_v5, %v2114_v12  ;;  %vm2127_vm7 = vcmp.eq.f32.partialorder %v5167_v4, inf  ;;  %vm2129_vm8 = vcmp.eq.f32.partialorder %v5167_v4, 0.0  ;;  %vm2120_vm9 = vcmp.eq.f32.partialorder %v5171_v59, inf  ;;  %v5292_v12 = vpop.permute.xlu1 %1540 }
 0x4c9   : > { %v2110_v50 = vsel %vm2108_vm6, %v2109_v55, %v2107_v49  ;;  %v2128_v10 = vsel %vm2127_vm7, %v5167_v4, %v2126_v46  ;;  %v2206_v51 = vmul.f32 1.442695, %v2184_v11  ;;  %v2170_v21 = vmul.f32 15.0, %v2154_v3 }
 0x4ca   : > { %v3744_v17 = vpop.eup %3743  ;;  %v2130_v52 = vand.u32 2147483648, %v5167_v4  ;;  %v2121_v8 = vsel %vm2120_vm9, %v5171_v59, %v2119_v18  ;;  %v2157_v5 = vsub.f32 0.2, %v2117_v54  ;;  %vm2122_vm10 = vcmp.eq.f32.partialorder %v5171_v59, 0.0 }
 0x4cb   : > { %v5283_v14 = vpop.eup %3745  ;;  %v2140_v31 = vmul.f32 %v3744_v17, %v5188_v29  ;;  %v2123_v46 = vand.u32 2147483648, %v5171_v59  ;;  %v2156_v17 = vsub.f32 0.2, %v2110_v50  ;;  %vm2141_vm11 = vcmp.eq.f32.partialorder %v5188_v29, inf }
 0x4cc   : > { %v2131_v11 = vsel %vm2129_vm8, %v2130_v52, %v2128_v10  ;;  %v2187_v57 = vsub.f32 0.0, %v2171_v6  ;;  %vm2134_vm12 = vcmp.eq.f32.partialorder %v5206_v45, inf  ;;  %v2186_v59 = vsub.f32 0.0, %v2170_v21 }
 0x4cd   : > { %v2142_v54 = vsel %vm2141_vm11, %v5188_v29, %v2140_v31  ;;  %vm2143_vm13 = vcmp.eq.f32.partialorder %v5188_v29, 0.0  ;;  %v2144_v50 = vand.u32 2147483648, %v5188_v29  ;;  %v2173_v10 = vmul.f32 15.0, %v2157_v5  ;;  %v5313_v29 = vpop.permute.xlu1 %1538 }
 0x4ce   : > { %v3748_v7 = vpop.eup %3747  ;;  %vm2136_vm14 = vcmp.eq.f32.partialorder %v5206_v45, 0.0  ;;  %v2172_v31 = vmul.f32 15.0, %v2156_v17  ;;  %vm1674_vm15 = vcmp.eq.f32.partialorder %v5098_v48, 0.0  ;;  %vm1665_vm0 = vcmp.eq.f32.partialorder %v5066_v0, inf }
 0x4cf   : > { %v5277_v60 = vpop.permute.xlu0 %1329  ;;  %v5290_v1 = vpop.eup %3749  ;;  %v2133_v49 = vmul.f32 %v3748_v7, %v5206_v45  ;;  %v2159_v7 = vsub.f32 0.2, %v2131_v11  ;;  %vm2066_vm5 = vcmp.eq.f32.partialorder %v5140_v35, 0.0  ;;  %3757 = vpow2.f32 %v2208_v40 }
 0x4d0   : > { %5890 = vst [vmem:[#allocation4_spill] sm:$0xff] %v5277_v60  ;;  %v3752_v18 = vpop.eup %3751  ;;  %v2124_v60 = vsel %vm2122_vm10, %v2123_v46, %v2121_v8  ;;  %v2145_v8 = vsel %vm2143_vm13, %v2144_v50, %v2142_v54  ;;  %v2212_v5 = vmul.f32 1.442695, %v2187_v57  ;;  %3759 = vpow2.f32 %v2206_v51 }
 0x4d1   : > { %v3754_v22 = vpop.eup %3753  ;;  %v2135_v4 = vsel %vm2134_vm12, %v5206_v45, %v2133_v49  ;;  %v2158_v52 = vsub.f32 0.2, %v2124_v60  ;;  %v2056_v49 = vmul.f32 %v3752_v18, %v5220_v13  ;;  %v2189_v40 = vsub.f32 0.0, %v2173_v10 }
 0x4d2   : > { %v2175_v57 = vmul.f32 15.0, %v2159_v7  ;;  %v2161_v17 = vsub.f32 0.2, %v2145_v8  ;;  %v2188_v18 = vsub.f32 0.0, %v2172_v31  ;;  %vm1667_vm6 = vcmp.eq.f32.partialorder %v5066_v0, 0.0 }
 0x4d3   : > { %v2591_v55 = vpop.permute.xlu0 %2590  ;;  %v2174_v54 = vmul.f32 15.0, %v2158_v52  ;;  %vm1658_vm7 = vcmp.eq.f32.partialorder %v5125_v20, inf  ;;  %vm2057_vm8 = vcmp.eq.f32.partialorder %v5220_v13, inf  ;;  %3761 = vpow2.f32 %v2212_v5 }
 0x4d4   : > { %v2624_v3 = vadd.f32 %v2591_v55, %v4983_v38  ;;  %v2137_v38 = vand.u32 2147483648, %v5206_v45  ;;  %v5891_v45 = vand.u32 2147483648, %v5140_v35  ;;  %v2210_v55 = vmul.f32 1.442695, %v2186_v59 }
 0x4d5   : > { %v2049_v51 = vmul.f32 %v3754_v22, %v5230_v16  ;;  %v2216_v50 = vmul.f32 1.442695, %v2189_v40  ;;  %vm1651_vm9 = vcmp.eq.f32.partialorder %v5061_v33, inf  ;;  %v2214_v10 = vmul.f32 1.442695, %v2188_v18 }
 0x4d6   : > { %2798 = vrot.lane.b32.xlu1 %v2624_v3, %s3862_s16  ;;  %v2138_v46 = vsel %vm2136_vm14, %v2137_v38, %v2135_v4  ;;  %v2068_v60 = vsel %vm2066_vm5, %v5891_v45, %v5263_v42  ;;  %v3756_v3 = vpop.eup %3755  ;;  %v2191_v4 = vsub.f32 0.0, %v2175_v57  ;;  %v2190_v7 = vsub.f32 0.0, %v2174_v54 }
 0x4d7   : > { %v2589_v6 = vpop.permute.xlu0 %2588  ;;  %v2160_v35 = vsub.f32 0.2, %v2138_v46  ;;  %v2150_v59 = vsub.f32 0.2, %v2068_v60  ;;  %vm1660_vm10 = vcmp.eq.f32.partialorder %v5125_v20, 0.0  ;;  %vm1644_vm11 = vcmp.eq.f32.partialorder %v5111_v53, inf }
 0x4d8   : > { %v2623_v21 = vadd.f32 %v2589_v6, %v4989_v34  ;;  %v5321_v34 = vadd.f32 %v5260_v36, %v5120_v44  ;;  %v2060_v44 = vand.u32 2147483648, %v5220_v13  ;;  %v2058_v36 = vsel %vm2057_vm8, %v5220_v13, %v2056_v49 }
 0x4d9   : > { %v2176_v22 = vmul.f32 15.0, %v2160_v35  ;;  %vm2059_vm12 = vcmp.eq.f32.partialorder %v5220_v13, 0.0  ;;  %v1666_v31 = vsel %vm1665_vm0, %v5066_v0, %v5159_v30  ;;  %vm2050_vm13 = vcmp.eq.f32.partialorder %v5230_v16, inf }
 0x4da   : > { %2666 = vrot.lane.b32.xlu1 %v5243_v37, %s3862_s16  ;;  %2796 = vrot.lane.b32.xlu0 %v2623_v21, %s3862_s16  ;;  %v5333_v37 = vadd.f32 %v5245_v24, %v5122_v56  ;;  %3763 = vrsqrt.f32 %v5321_v34  ;;  %v2177_v56 = vmul.f32 15.0, %v2161_v17  ;;  %v2061_v52 = vsel %vm2059_vm12, %v2060_v44, %v2058_v36 }
 0x4db   : > { %v2587_v11 = vpop.permute.xlu0 %2586  ;;  %3765 = vpow2.f32 %v2210_v55  ;;  %v2166_v13 = vmul.f32 15.0, %v2150_v59  ;;  %vm1653_vm14 = vcmp.eq.f32.partialorder %v5061_v33, 0.0  ;;  %v2192_v21 = vsub.f32 0.0, %v2176_v22 }
 0x4dc   : > { %v2622_v42 = vadd.f32 %v2587_v11, %v4994_v32  ;;  %v5341_v32 = vpop.permute.xlu1 %1536  ;;  %3767 = vrsqrt.f32 %v5333_v37  ;;  %v2193_v30 = vsub.f32 0.0, %v2177_v56  ;;  %v2053_v46 = vand.u32 2147483648, %v5230_v16  ;;  %v3758_v57 = vpop.eup %3757 }
 0x4dd   : > { %3769 = vpow2.f32 %v2216_v50  ;;  %v5893_v45 = vand.u32 2147483648, %v5066_v0  ;;  %v1643_v40 = vmul.f32 %v5200_v61, %v5111_v53  ;;  %v2149_v17 = vsub.f32 0.2, %v2061_v52  ;;  %v3760_v18 = vpop.eup %3759 }
 0x4de   : > { %2664 = vrot.lane.b32.xlu0 %v5227_v9, %s3862_s16  ;;  %2794 = vrot.lane.b32.xlu1 %v2622_v42, %s3862_s16  ;;  %v5892_v9 = vand.u32 2147483648, %v5098_v48  ;;  %v2051_v48 = vsel %vm2050_vm13, %v5230_v16, %v2049_v51  ;;  %3771 = vpow2.f32 %v2214_v10  ;;  %v2182_v11 = vsub.f32 0.0, %v2166_v13 }
 0x4df   : > { %v2585_v24 = vpop.permute.xlu0 %2584  ;;  %v1669_v60 = vsel %vm1667_vm6, %v5893_v45, %v1666_v31  ;;  %v2224_v54 = vmul.f32 1.442695, %v2193_v30  ;;  %v1661_v35 = vand.u32 2147483648, %v5125_v20  ;;  %v2222_v61 = vmul.f32 1.442695, %v2192_v21 }
 0x4e0   : > { %v2621_v38 = vadd.f32 %v2585_v24, %v4999_v27  ;;  %v1676_v6 = vsel %vm1674_vm15, %v5892_v9, %v5237_v62  ;;  %v1657_v27 = vmul.f32 %v5211_v19, %v5125_v20  ;;  %v2220_v62 = vmul.f32 1.442695, %v2191_v4  ;;  %v2581_v49 = vpop.permute.xlu1 %2580 }
 0x4e1   : > { %v2218_v19 = vmul.f32 1.442695, %v2190_v7  ;;  %vm2052_vm15 = vcmp.eq.f32.partialorder %v5230_v16, 0.0  ;;  %v2619_v42 = vadd.f32 %v2581_v49, %v4901_v39  ;;  %v1652_v16 = vsel %vm1651_vm9, %v5061_v33, %v5148_v63  ;;  %v3762_v39 = vpop.eup %3761 }
 0x4e2   : > { %2662 = vrot.lane.b32.xlu1 %v1676_v6, %s3862_s16  ;;  %2792 = vrot.lane.b32.xlu0 %v2621_v38, %s3862_s16  ;;  %v1659_v55 = vsel %vm1658_vm7, %v5125_v20, %v1657_v27  ;;  %v2054_v0 = vsel %vm2052_vm15, %v2053_v46, %v2051_v48  ;;  %3773 = vpow2.f32 %v2220_v62  ;;  %v1645_v51 = vsel %vm1644_vm11, %v5111_v53, %v1643_v40 }
 0x4e3   : > { %v2583_v8 = vpop.permute.xlu0 %2582  ;;  %3775 = vpow2.f32 %v2218_v19  ;;  %v1662_v36 = vsel %vm1660_vm10, %v1661_v35, %v1659_v55  ;;  %vm1646_vm0 = vcmp.eq.f32.partialorder %v5111_v53, 0.0  ;;  %v2165_v59 = vmul.f32 15.0, %v2149_v17 }
 0x4e4   : > { %v2620_v5 = vadd.f32 %v2583_v8, %v5004_v2  ;;  %v2231_v2 = vadd.f32 1.0, %v3756_v3  ;;  %v2042_v3 = vmul.f32 %v5283_v14, %v5037_v47  ;;  %v2148_v50 = vsub.f32 0.2, %v2054_v0  ;;  %v2577_v31 = vpop.permute.xlu1 %2576 }
 0x4e5   : > { %v2202_v4 = vmul.f32 1.442695, %v2182_v11  ;;  %v2233_v14 = vadd.f32 1.0, %v3758_v57  ;;  %v5894_v20 = vand.u32 2147483648, %v5061_v33  ;;  %v1647_v24 = vand.u32 2147483648, %v5111_v53 }
 0x4e6   : > { %2660 = vrot.lane.b32.xlu0 %v1669_v60, %s3862_s16  ;;  %2790 = vrot.lane.b32.xlu1 %v2620_v5, %s3862_s16  ;;  %3777 = vrcp.f32 %v2231_v2  ;;  %vm2043_vm5 = vcmp.eq.f32.partialorder %v5037_v47, inf  ;;  %v2232_v7 = vadd.f32 1.0, %v3760_v18  ;;  %v2046_v9 = vand.u32 2147483648, %v5037_v47 }
 0x4e7   : > { %v2579_v44 = vpop.permute.xlu0 %2578  ;;  %v3764_v63 = vpop.eup %3763  ;;  %3779 = vpow2.f32 %v2224_v54  ;;  %v1655_v56 = vsel %vm1653_vm14, %v5894_v20, %v1652_v16  ;;  %v2044_v38 = vsel %vm2043_vm5, %v5037_v47, %v2042_v3  ;;  %v2035_v6 = vmul.f32 %v5290_v1, %v5214_v41  ;;  %v5895_v54 = vld [vmem:[#allocation48_spill] sm:$0xff] }
 0x4e8   : > { %v3766_v10 = vpop.eup %3765  ;;  %3781 = vpow2.f32 %v2222_v61  ;;  %v2618_v22 = vadd.f32 %v2579_v44, %v5008_v26  ;;  %v1648_v33 = vsel %vm1646_vm0, %v1647_v24, %v1645_v51  ;;  %v2181_v27 = vsub.f32 0.0, %v2165_v59 }
 0x4e9   : > { %v2164_v52 = vmul.f32 15.0, %v2148_v50  ;;  %3783 = vpow2.f32 %v2202_v4  ;;  %v1636_v26 = vmul.f32 %v3764_v63, %v5321_v34  ;;  %v3768_v13 = vpop.eup %3767  ;;  %vm2045_vm6 = vcmp.eq.f32.partialorder %v5037_v47, 0.0 }
 0x4ea   : > { %2788 = vrot.lane.b32.xlu0 %v2619_v42, %s3862_s16  ;;  %2658 = vrot.lane.b32.xlu1 %v1662_v36, %s3862_s16  ;;  %vm2036_vm7 = vcmp.eq.f32.partialorder %v5214_v41, inf  ;;  %3785 = vrcp.f32 %v2233_v14  ;;  %v2235_v1 = vadd.f32 1.0, %v3762_v39  ;;  %v3770_v48 = vpop.eup %3769  ;;  %v2047_v62 = vsel %vm2045_vm6, %v2046_v9, %v2044_v38 }
 0x4eb   : > { %3787 = vrcp.f32 %v2232_v7  ;;  %v2617_v53 = vadd.f32 %v2577_v31, %v4911_v23  ;;  %v2234_v30 = vadd.f32 1.0, %v3766_v10  ;;  %v3772_v8 = vpop.eup %3771  ;;  %v2037_v19 = vsel %vm2036_vm7, %v5214_v41, %v2035_v6  ;;  %v2575_v5 = vpop.permute.xlu0 %2574  ;;  %v5896_v10 = vld [vmem:[#allocation50_spill] sm:$0xff]  ;;  %v5897_v6 = vld [vmem:[#allocation39_spill] sm:$0xff]  ;;  %v5898_v31 = vld [vmem:[#allocation4_spill] sm:$0xff] }
 0x4ec   : > { %vm2038_vm8 = vcmp.eq.f32.partialorder %v5214_v41, 0.0  ;;  %v2039_v21 = vand.u32 2147483648, %v5214_v41  ;;  %vm1637_vm9 = vcmp.eq.f32.partialorder %v5321_v34, inf  ;;  %v2200_v47 = vmul.f32 1.442695, %v2181_v27 }
 0x4ed   : > { %v2180_v46 = vsub.f32 0.0, %v2164_v52  ;;  %v1638_v49 = vsel %vm1637_vm9, %v5321_v34, %v1636_v26  ;;  %v1629_v23 = vmul.f32 %v3768_v13, %v5333_v37  ;;  %v2147_v45 = vsub.f32 0.2, %v2047_v62 }
 0x4ee   : > { %2656 = vrot.lane.b32.xlu0 %v1655_v56, %s3862_s16  ;;  %2786 = vrot.lane.b32.xlu1 %v2618_v22, %s3862_s16  ;;  %3789 = vrcp.f32 %v2235_v1  ;;  %v2237_v60 = vadd.f32 1.0, %v3770_v48  ;;  %v1640_v55 = vand.u32 2147483648, %v5321_v34  ;;  %v2236_v57 = vadd.f32 1.0, %v3772_v8 }
 0x4ef   : > { %v3774_v40 = vpop.eup %3773  ;;  %3791 = vrcp.f32 %v2234_v30  ;;  %v2616_v17 = vadd.f32 %v2575_v5, %v5015_v15  ;;  %vm1639_vm10 = vcmp.eq.f32.partialorder %v5321_v34, 0.0  ;;  %v1491_v11 = vmul.f32 %v5129_v25, %v5129_v25 }
 0x4f0   : > { %v3776_v2 = vpop.eup %3775  ;;  %v2040_v18 = vsel %vm2038_vm8, %v2039_v21, %v2037_v19  ;;  %v1641_v0 = vsel %vm1639_vm10, %v1640_v55, %v1638_v49  ;;  %vm1630_vm11 = vcmp.eq.f32.partialorder %v5333_v37, inf  ;;  %v1394_v35 = vsub.f32 %v5895_v54, %v5888_v43  ;;  %v2571_v55 = vpop.permute.xlu0 %2570 }
 0x4f1   : > { %3793 = vpow2.f32 %v2200_v47  ;;  %v2198_v42 = vmul.f32 1.442695, %v2180_v46  ;;  %v1631_v15 = vsel %vm1630_vm11, %v5333_v37, %v1629_v23  ;;  %v2163_v61 = vmul.f32 15.0, %v2147_v45  ;;  %v2573_v47 = vpop.permute.xlu1 %2572  ;;  %v5899_v23 = vld [vmem:[#allocation51_spill] sm:$0xff] }
 0x4f2   : > { %2784 = vrot.lane.b32.xlu0 %v2617_v53, %s3862_s16  ;;  %2654 = vrot.lane.b32.xlu1 %v1648_v33, %s3862_s16  ;;  %3795 = vrcp.f32 %v2237_v60  ;;  %v2239_v25 = vadd.f32 1.0, %v3774_v40  ;;  %v1633_v41 = vand.u32 2147483648, %v5333_v37  ;;  %v2146_v3 = vsub.f32 0.2, %v2040_v18 }
 0x4f3   : > { %v3778_v34 = vpop.eup %3777  ;;  %3797 = vrcp.f32 %v2236_v57  ;;  %v2238_v44 = vadd.f32 1.0, %v3776_v2  ;;  %vm1632_vm12 = vcmp.eq.f32.partialorder %v5333_v37, 0.0  ;;  %v5438_v51 = vadd.f32 %v5267_v28, %v1491_v11  ;;  %v5900_v11 = vld [vmem:[#allocation10_spill] sm:$0xff] }
 0x4f4   : > { %v3780_v16 = vpop.eup %3779  ;;  %v1634_v36 = vsel %vm1632_vm12, %v1633_v41, %v1631_v15  ;;  %3799 = vpow2.f32 %v2198_v42  ;;  %v2179_v59 = vsub.f32 0.0, %v2163_v61  ;;  %v1490_v63 = vmul.f32 %v1394_v35, %v1394_v35 }
 0x4f5   : > { %v3782_v43 = vpop.eup %3781  ;;  %3801 = vrcp.f32 %v2239_v25  ;;  %v2241_v50 = vadd.f32 1.0, %v3780_v16  ;;  %v2162_v14 = vmul.f32 15.0, %v2146_v3  ;;  %v1393_v7 = vsub.f32 %v5896_v10, %v4683_v58  ;;  %v2569_v25 = vpop.permute.xlu1 %2568 }
 0x4f6   : > { %2652 = vrot.lane.b32.xlu0 %v1641_v0, %s3862_s16  ;;  %2782 = vrot.lane.b32.xlu1 %v2616_v17, %s3862_s16  ;;  %v3784_v39 = vpop.eup %3783  ;;  %3803 = vrcp.f32 %v2238_v44  ;;  %v2240_v37 = vadd.f32 1.0, %v3782_v43  ;;  %v5444_v28 = vadd.f32 %v5292_v12, %v1490_v63  ;;  %v2196_v56 = vmul.f32 1.442695, %v2179_v59  ;;  %v5901_v44 = vld [vmem:[#allocation56_spill] sm:$0xff] }
 0x4f7   : > { %v3786_v4 = vpop.eup %3785  ;;  %3805 = vrsqrt.f32 %v5438_v51  ;;  %v2178_v22 = vsub.f32 0.0, %v2162_v14  ;;  %v2230_v38 = vadd.f32 1.0, %v3784_v39  ;;  %v1392_v12 = vsub.f32 %v5898_v31, %v5897_v6  ;;  %v5904_v6 = vld [vmem:[#allocation6_spill] sm:$0xff] }
 0x4f8   : > { %v3788_v20 = vpop.eup %3787  ;;  %3807 = vrcp.f32 %v2241_v50  ;;  %v1489_v52 = vmul.f32 %v1393_v7, %v1393_v7  ;;  %v2615_v45 = vadd.f32 %v2573_v47, %v5899_v23  ;;  %vm1623_vm13 = vcmp.eq.f32.partialorder %v5438_v51, inf  ;;  %v5903_v7 = vld [vmem:[#allocation16_spill] sm:$0xff] }
 0x4f9   : > { %3809 = vrcp.f32 %v2240_v37  ;;  %v2194_v26 = vmul.f32 1.442695, %v2178_v22  ;;  %v1488_v1 = vmul.f32 %v1392_v12, %v1392_v12  ;;  %v1626_v17 = vand.u32 2147483648, %v5438_v51 }
 0x4fa   : > { %2716 = vrot.lane.b32.xlu0 %v3778_v34, %s3864_s6  ;;  %2650 = vrot.lane.b32.xlu1 %v1634_v36, %s3862_s16  ;;  %3811 = vrsqrt.f32 %v5444_v28  ;;  %v5456_v13 = vadd.f32 %v5313_v29, %v1489_v52  ;;  %v2614_v18 = vadd.f32 %v2571_v55, %v5900_v11  ;;  %vm1625_vm14 = vcmp.eq.f32.partialorder %v5438_v51, 0.0 }
 0x4fb   : > { %v3790_v24 = vpop.eup %3789  ;;  %3813 = vpow2.f32 %v2196_v56  ;;  %v5462_v8 = vadd.f32 %v5341_v32, %v1488_v1  ;;  %vm1616_vm15 = vcmp.eq.f32.partialorder %v5444_v28, inf  ;;  %v1619_v15 = vand.u32 2147483648, %v5444_v28 }
 0x4fc   : > { %v3792_v9 = vpop.eup %3791  ;;  %3815 = vrcp.f32 %v2230_v38  ;;  %vm1618_vm0 = vcmp.eq.f32.partialorder %v5444_v28, 0.0  ;;  %v2613_v43 = vadd.f32 %v2569_v25, %v5901_v44  ;;  %vm1609_vm5 = vcmp.eq.f32.partialorder %v5456_v13, inf }
 0x4fd   : > { %3817 = vpow2.f32 %v2194_v26  ;;  %v1612_v50 = vand.u32 2147483648, %v5456_v13  ;;  %vm1611_vm6 = vcmp.eq.f32.partialorder %v5456_v13, 0.0  ;;  %vm1602_vm7 = vcmp.eq.f32.partialorder %v5462_v8, inf }
 0x4fe   : > { %2720 = vrot.lane.b32.xlu0 %v3786_v4, %s3864_s6  ;;  %2718 = vrot.lane.b32.xlu1 %v3788_v20, %s3864_s6  ;;  %v3794_v33 = vpop.eup %3793  ;;  %3819 = vrsqrt.f32 %v5456_v13  ;;  %v5902_v4 = vld [vmem:[#allocation8_spill] sm:$0xff]  ;;  %v1605_v20 = vand.u32 2147483648, %v5462_v8  ;;  %vm1604_vm8 = vcmp.eq.f32.partialorder %v5462_v8, 0.0  ;;  %vm2834_vm9 = vcmask 195584  }
 0x4ff   : > { %v3796_v27 = vpop.eup %3795  ;;  %v2229_v53 = vadd.f32 1.0, %v3794_v33  ;;  %vm3073_vm10 = vcmask 154624  }
 0x500   : > { %v3798_v58 = vpop.eup %3797 }
 0x501   : > { %v3800_v48 = vpop.eup %3799  ;;  %3821 = vrcp.f32 %v2229_v53 }
 0x502   : > { %2724 = vrot.lane.b32.xlu0 %v3790_v24, %s3864_s6  ;;  %2722 = vrot.lane.b32.xlu1 %v3792_v9, %s3864_s6  ;;  %v3802_v62 = vpop.eup %3801  ;;  %v2228_v21 = vadd.f32 1.0, %v3800_v48  ;;  %3823 = vrsqrt.f32 %v5462_v8  ;;  %v2565_v24 = vpop.permute.xlu1 %2564 }
 0x503   : > { %v3804_v30 = vpop.eup %3803  ;;  %v2611_v22 = vadd.f32 %v2565_v24, %v5903_v7 }
 0x504   : > { %v3806_v29 = vpop.eup %3805  ;;  %3825 = vrcp.f32 %v2228_v21 }
 0x505   : > { %v3808_v19 = vpop.eup %3807  ;;  %v1622_v46 = vmul.f32 %v3806_v29, %v5438_v51 }
 0x506   : > { %2728 = vrot.lane.b32.xlu0 %v3796_v27, %s3864_s6  ;;  %2726 = vrot.lane.b32.xlu1 %v3798_v58, %s3864_s6  ;;  %v3810_v5 = vpop.eup %3809  ;;  %v2673_v12 = vpop.permute.xlu1 %2672 }
 0x507   : > { %v3812_v32 = vpop.eup %3811  ;;  %v1624_v40 = vsel %vm1623_vm13, %v5438_v51, %v1622_v46  ;;  %v2567_v51 = vpop.permute.xlu0 %2566 }
 0x508   : > { %v3814_v49 = vpop.eup %3813  ;;  %v1615_v57 = vmul.f32 %v3812_v32, %v5444_v28  ;;  %v1627_v54 = vsel %vm1625_vm14, %v1626_v17, %v1624_v40  ;;  %v2612_v63 = vadd.f32 %v2567_v51, %v5902_v4  ;;  %v5909_v4 = vld [vmem:[#allocation29_spill] sm:$0xff] }
 0x509   : > { %v3816_v60 = vpop.eup %3815  ;;  %v2227_v2 = vadd.f32 1.0, %v3814_v49 }
 0x50a   : > { %2732 = vrot.lane.b32.xlu0 %v3802_v62, %s3864_s6  ;;  %2730 = vrot.lane.b32.xlu1 %v3804_v30, %s3864_s6  ;;  %v3818_v0 = vpop.eup %3817  ;;  %v1617_v35 = vsel %vm1616_vm15, %v5444_v28, %v1615_v57  ;;  %v2867_v28 = vld [vmem:[%s5683_s4] sm:$0xff]  ;;  %v2671_v27 = vpop.permute.xlu1 %2670 }
 0x50b   : > { %v3820_v42 = vpop.eup %3819  ;;  %3827 = vrcp.f32 %v2227_v2  ;;  %v2226_v34 = vadd.f32 1.0, %v3818_v0  ;;  %v1620_v41 = vsel %vm1618_vm0, %v1619_v15, %v1617_v35  ;;  %3486 = vmatprep.mubr.f32.mxu0 %v2867_v28  ;;  %v2563_v9 = vpop.permute.xlu0 %2562  ;;  %v5905_v0 = vld [vmem:[#allocation33_spill] sm:$0xff]  ;;  %v5906_v35 = vld [vmem:[#allocation32_spill] sm:$0xff] }
 0x50c   : > { %v1608_v16 = vmul.f32 %v3820_v42, %v5456_v13  ;;  %v2610_v31 = vadd.f32 %v2563_v9, %v5904_v6  ;;  %v2832_v42 = vsel %vm974_vm3, %v5906_v35, %v2671_v27  ;;  %v5918_v35 = vld [vmem:[#allocation20_spill] sm:$0xff] }
 0x50d   : > { %3829 = vrcp.f32 %v2226_v34 }
 0x50e   : > { %2736 = vrot.lane.b32.xlu0 %v3808_v19, %s3864_s6  ;;  %2734 = vrot.lane.b32.xlu1 %v3810_v5, %s3864_s6  ;;  %v3822_v61 = vpop.eup %3821  ;;  %v1610_v39 = vsel %vm1609_vm5, %v5456_v13, %v1608_v16 }
 0x50f   : > { %v3824_v3 = vpop.eup %3823  ;;  %v1613_v14 = vsel %vm1611_vm6, %v1612_v50, %v1610_v39  ;;  %v2801_v33 = vpop.permute.xlu0 %2800 }
 0x510   : > { %v1601_v59 = vmul.f32 %v3824_v3, %v5462_v8 }
 0x511   : > { %v3826_v36 = vpop.eup %3825 }
 0x512   : > { %2780 = vrot.lane.b32.xlu0 %v2615_v45, %s3862_s16  ;;  %2714 = vrot.lane.b32.xlu1 %v3816_v60, %s3864_s6  ;;  %v1603_v37 = vsel %vm1602_vm7, %v5462_v8, %v1601_v59 }
 0x513   : > { %v1606_v10 = vsel %vm1604_vm8, %v1605_v20, %v1603_v37  ;;  %v2669_v52 = vpop.permute.xlu0 %2668  ;;  %v5910_v20 = vld [vmem:[#allocation28_spill] sm:$0xff] }
 0x516   : > { %2648 = vrot.lane.b32.xlu0 %v1627_v54, %s3862_s16  ;;  %2778 = vrot.lane.b32.xlu1 %v2614_v18, %s3862_s16  ;;  %v2833_v54 = vsel %vm974_vm3, %v5905_v0, %v2673_v12 }
 0x518   : > { %v3828_v56 = vpop.eup %3827 }
 0x51a   : > { %2712 = vrot.lane.b32.xlu0 %v3822_v61, %s3864_s6  ;;  %2646 = vrot.lane.b32.xlu1 %v1620_v41, %s3862_s16  ;;  %v3830_v38 = vpop.eup %3829  ;;  %v5907_v41 = vld [vmem:[#allocation31_spill] sm:$0xff] }
 0x51b   : > { %v2831_v16 = vsel %vm974_vm3, %v5907_v41, %v2669_v52 }
 0x51e   : > { %2776 = vrot.lane.b32.xlu0 %v2613_v43, %s3862_s16  ;;  %2710 = vrot.lane.b32.xlu1 %v3826_v36, %s3864_s6  ;;  %v5908_v43 = vld [vmem:[#allocation30_spill] sm:$0xff] }
 0x522   : > { %2644 = vrot.lane.b32.xlu0 %v1613_v14, %s3862_s16  ;;  %2774 = vrot.lane.b32.xlu1 %v2612_v63, %s3862_s16 }
 0x526   : > { %2708 = vrot.lane.b32.xlu0 %v3828_v56, %s3864_s6  ;;  %2642 = vrot.lane.b32.xlu1 %v1606_v10, %s3862_s16 }
 0x52a   : > { %2772 = vrot.lane.b32.xlu0 %v2611_v22, %s3862_s16  ;;  %2706 = vrot.lane.b32.xlu1 %v3830_v38, %s3864_s6  ;;  %v5911_v22 = vld [vmem:[#allocation27_spill] sm:$0xff] }
 0x52e   : > { %2770 = vrot.lane.b32.xlu0 %v2610_v31, %s3862_s16  ;;  %v5912_v31 = vld [vmem:[#allocation26_spill] sm:$0xff] }
 0x548   : > { %v2799_v26 = vpop.permute.xlu1 %2798 }
 0x54c   : > { %v2667_v58 = vpop.permute.xlu1 %2666  ;;  %v2797_v13 = vpop.permute.xlu0 %2796 }
 0x54d   : > { %v2830_v36 = vsel %vm974_vm3, %v5908_v43, %v2667_v58  ;;  %v5913_v58 = vld [vmem:[#allocation25_spill] sm:$0xff]  ;;  %v5920_v43 = vld [vmem:[#allocation18_spill] sm:$0xff] }
 0x550   : > { %v2795_v1 = vpop.permute.xlu1 %2794  ;;  %v2665_v48 = vpop.permute.xlu0 %2664 }
 0x551   : > { %v2829_v63 = vsel %vm974_vm3, %v5909_v4, %v2665_v48  ;;  %v2869_v4 = vld [vmem:[%s5683_s4 + $0x10] sm:$0xff] }
 0x554   : > { %v2663_v62 = vpop.permute.xlu1 %2662  ;;  %v2793_v53 = vpop.permute.xlu0 %2792 }
 0x555   : > { %v2828_v28 = vsel %vm974_vm3, %v5910_v20, %v2663_v62  ;;  %v5914_v62 = vld [vmem:[#allocation24_spill] sm:$0xff] }
 0x556   : > { %v2873_v20 = vld [vmem:[%s5683_s4 + $0x30] sm:$0xff] }
 0x558   : > { %v2791_v30 = vpop.permute.xlu1 %2790  ;;  %v2661_v8 = vpop.permute.xlu0 %2660 }
 0x559   : > { %v2827_v38 = vsel %vm974_vm3, %v5911_v22, %v2661_v8 }
 0x55c   : > { %v2659_v29 = vpop.permute.xlu1 %2658  ;;  %v2789_v19 = vpop.permute.xlu0 %2788 }
 0x55d   : > { %v2826_v12 = vsel %vm974_vm3, %v5912_v31, %v2659_v29 }
 0x560   : > { %v5513_v21 = vpop.permute.xlu1 %2786  ;;  %v2657_v5 = vpop.permute.xlu0 %2656 }
 0x564   : > { %v2655_v47 = vpop.permute.xlu1 %2654  ;;  %v5515_v46 = vpop.permute.xlu0 %2784 }
 0x568   : > { %v5517_v32 = vpop.permute.xlu1 %2782  ;;  %v5519_v49 = vpop.permute.xlu0 %2652 }
 0x56c   : > { %v5521_v23 = vpop.permute.xlu1 %2650  ;;  %v5523_v45 = vpop.permute.xlu0 %2716 }
 0x570   : > { %v2719_v60 = vpop.permute.xlu1 %2718  ;;  %v2721_v55 = vpop.permute.xlu0 %2720 }
 0x574   : > { %v2723_v40 = vpop.permute.xlu1 %2722  ;;  %v2725_v57 = vpop.permute.xlu0 %2724 }
 0x575   : > { %v2844_v6 = vsel %vm2834_vm9, %v2827_v38, %v2725_v57 }
 0x578   : > { %v2727_v17 = vpop.permute.xlu1 %2726  ;;  %v2729_v2 = vpop.permute.xlu0 %2728 }
 0x579   : > { %v2846_v37 = vsel %vm2834_vm9, %v2829_v63, %v2729_v2  ;;  %v2845_v7 = vsel %vm2834_vm9, %v2828_v28, %v2727_v17  ;;  %v2870_v63 = vld [vmem:[%s5683_s4 + $0x18] sm:$0xff] }
 0x57a   : > { %v2862_v9 = vsel %vm474_vm2, %v2846_v37, %v2793_v53  ;;  %v2861_v52 = vsel %vm474_vm2, %v2845_v7, %v2791_v30  ;;  %v2824_v53 = vsel %vm974_vm3, %v5914_v62, %v2655_v47  ;;  %v2872_v37 = vld [vmem:[%s5683_s4 + $0x28] sm:$0xff]  ;;  %v2874_v28 = vld [vmem:[%s5683_s4 + $0x38] sm:$0xff] }
 0x57c   : > { %v2731_v11 = vpop.permute.xlu1 %2730  ;;  %v2733_v18 = vpop.permute.xlu0 %2732 }
 0x57d   : > { %v2848_v44 = vsel %vm2834_vm9, %v2831_v16, %v2733_v18  ;;  %v2847_v50 = vsel %vm2834_vm9, %v2830_v36, %v2731_v11 }
 0x57e   : > { %v2864_v14 = vsel %vm474_vm2, %v2848_v44, %v2797_v13  ;;  %v2863_v10 = vsel %vm474_vm2, %v2847_v50, %v2795_v1  ;;  %v2825_v13 = vsel %vm974_vm3, %v5913_v58, %v2657_v5  ;;  %v2860_v1 = vsel %vm474_vm2, %v2844_v6, %v2789_v19  ;;  %v5915_v19 = vld [vmem:[#allocation23_spill] sm:$0xff] }
 0x57f   : > { %v2842_v48 = vsel %vm2834_vm9, %v2825_v13, %v2721_v55  ;;  %v2823_v55 = vsel %vm974_vm3, %v5915_v19, %v5519_v49  ;;  %v5917_v49 = vld [vmem:[#allocation21_spill] sm:$0xff]  ;;  %v2868_v50 = vld [vmem:[%s5683_s4 + $0x8] sm:$0xff] }
 0x580   : > { %v2735_v15 = vpop.permute.xlu1 %2734  ;;  %v2737_v34 = vpop.permute.xlu0 %2736  ;;  %v2858_v5 = vsel %vm474_vm2, %v2842_v48, %v5515_v46 }
 0x581   : > { %v2849_v61 = vsel %vm2834_vm9, %v2832_v42, %v2735_v15  ;;  %v2850_v25 = vsel %vm2834_vm9, %v2833_v54, %v2737_v34  ;;  %v5919_v34 = vld [vmem:[#allocation19_spill] sm:$0xff] }
 0x582   : > { %v2866_v3 = vsel %vm474_vm2, %v2850_v25, %v2801_v33  ;;  %v2865_v59 = vsel %vm474_vm2, %v2849_v61, %v2799_v26  ;;  %v2843_v26 = vsel %vm2834_vm9, %v2826_v12, %v2723_v40  ;;  %v2841_v40 = vsel %vm2834_vm9, %v2824_v53, %v2719_v60  ;;  %v5916_v60 = vld [vmem:[#allocation22_spill] sm:$0xff] }
 0x583   : > { %3454 = vmatprep.subr.mxu0 %v2866_v3  ;;  %v2859_v30 = vsel %vm474_vm2, %v2843_v26, %v5513_v21  ;;  %v2857_v17 = vsel %vm474_vm2, %v2841_v40, %v5517_v32  ;;  %v2840_v21 = vsel %vm2834_vm9, %v2823_v55, %v5523_v45  ;;  %v2822_v2 = vsel %vm974_vm3, %v5916_v60, %v5521_v23 }
 0x584   : > { %v2715_v51 = vpop.permute.xlu1 %2714  ;;  %3455 = vmatpush3.msra.mxu0 %v2866_v3  ;;  %v2781_v39 = vpop.permute.xlu0 %2780 }
 0x585   : > { %3456 = vmatprep.subr.mxu0 %v2865_v59  ;;  %v2856_v46 = vsel %vm474_vm2, %v2840_v21, %v2781_v39  ;;  %v2839_v11 = vsel %vm2834_vm9, %v2822_v2, %v2715_v51 }
 0x586   : > { %3457 = vmatpush3.msra.mxu0 %v2865_v59 }
 0x587   : > { %3458 = vmatprep.subr.mxu0 %v2864_v14 }
 0x588   : > { %v2779_v56 = vpop.permute.xlu1 %2778  ;;  %3459 = vmatpush3.msra.mxu0 %v2864_v14  ;;  %v2649_v24 = vpop.permute.xlu0 %2648  ;;  %v2871_v14 = vld [vmem:[%s5683_s4 + $0x20] sm:$0xff] }
 0x589   : > { %3460 = vmatprep.subr.mxu0 %v2863_v10  ;;  %v2821_v18 = vsel %vm974_vm3, %v5917_v49, %v2649_v24  ;;  %v2855_v54 = vsel %vm474_vm2, %v2839_v11, %v2779_v56 }
 0x58a   : > { %3461 = vmatpush3.msra.mxu0 %v2863_v10 }
 0x58b   : > { %3462 = vmatprep.subr.mxu0 %v2862_v9 }
 0x58c   : > { %v2647_v33 = vpop.permute.xlu1 %2646  ;;  %3463 = vmatpush3.msra.mxu0 %v2862_v9  ;;  %v2713_v27 = vpop.permute.xlu0 %2712 }
 0x58d   : > { %3464 = vmatprep.subr.mxu0 %v2861_v52  ;;  %v2838_v45 = vsel %vm2834_vm9, %v2821_v18, %v2713_v27  ;;  %v2820_v23 = vsel %vm974_vm3, %v5918_v35, %v2647_v33 }
 0x58e   : > { %3465 = vmatpush3.msra.mxu0 %v2861_v52 }
 0x58f   : > { %3466 = vmatprep.subr.mxu0 %v2860_v1 }
 0x590   : > { %v2711_v8 = vpop.permute.xlu1 %2710  ;;  %3467 = vmatpush3.msra.mxu0 %v2860_v1  ;;  %v2777_v29 = vpop.permute.xlu0 %2776 }
 0x591   : > { %3468 = vmatprep.subr.mxu0 %v2859_v30  ;;  %v2854_v42 = vsel %vm474_vm2, %v2838_v45, %v2777_v29  ;;  %v2837_v15 = vsel %vm2834_vm9, %v2820_v23, %v2711_v8 }
 0x592   : > { %3469 = vmatpush3.msra.mxu0 %v2859_v30 }
 0x593   : > { %3470 = vmatprep.subr.mxu0 %v2858_v5 }
 0x594   : > { %v2775_v57 = vpop.permute.xlu1 %2774  ;;  %3471 = vmatpush3.msra.mxu0 %v2858_v5  ;;  %v2645_v47 = vpop.permute.xlu0 %2644 }
 0x595   : > { %3472 = vmatprep.subr.mxu0 %v2857_v17  ;;  %v2819_v61 = vsel %vm974_vm3, %v5919_v34, %v2645_v47  ;;  %v2853_v16 = vsel %vm474_vm2, %v2837_v15, %v2775_v57 }
 0x596   : > { %3473 = vmatpush3.msra.mxu0 %v2857_v17 }
 0x597   : > { %3474 = vmatprep.subr.mxu0 %v2856_v46 }
 0x598   : > { %v2643_v0 = vpop.permute.xlu1 %2642  ;;  %3475 = vmatpush3.msra.mxu0 %v2856_v46  ;;  %v2709_v32 = vpop.permute.xlu0 %2708 }
 0x599   : > { %3476 = vmatprep.subr.mxu0 %v2855_v54  ;;  %v2836_v25 = vsel %vm2834_vm9, %v2819_v61, %v2709_v32  ;;  %v2818_v36 = vsel %vm974_vm3, %v5920_v43, %v2643_v0 }
 0x59a   : > { %3477 = vmatpush3.msra.mxu0 %v2855_v54 }
 0x59b   : > { %3478 = vmatprep.subr.mxu0 %v2854_v42 }
 0x59c   : > { %3479 = vmatpush3.msra.mxu0 %v2854_v42  ;;  %v2773_v41 = vpop.permute.xlu0 %2772  ;;  %v2707_v3 = vpop.permute.xlu1 %2706 }
 0x59d   : > { %3480 = vmatprep.subr.mxu0 %v2853_v16  ;;  %v2852_v44 = vsel %vm474_vm2, %v2836_v25, %v2773_v41  ;;  %v2835_v51 = vsel %vm2834_vm9, %v2818_v36, %v2707_v3 }
 0x59e   : > { %3481 = vmatpush3.msra.mxu0 %v2853_v16 }
 0x59f   : > { %3482 = vmatprep.subr.mxu0 %v2852_v44 }
 0x5a0   : > { %3483 = vmatpush3.msra.mxu0 %v2852_v44  ;;  %v2771_v39 = vpop.permute.xlu0 %2770 }
 0x5a1   : > { %v2851_v59 = vsel %vm474_vm2, %v2835_v51, %v2771_v39  ;;  %vm3068_vm2 = vcmask 146432  }
 0x5a2   : > { %3484 = vmatprep.subr.mxu0 %v2851_v59 }
 0x5a3   : > { %3485 = vmatpush3.msra.mxu0 %v2851_v59 }
 0x5a4   : > { %3487 = vmatmul.mubr.f32.vlgmr.msra.gmra.mxu0 %v2868_v50 }
 0x5a5   : > { %3489 = vmatprep.mubr.f32.mxu0 %v2869_v4 }
 0x5a8   : > { %3490 = vmatmul.mubr.f32.gmra.mxu0 %v2870_v63 }
 0x5a9   : > { %3492 = vmatprep.mubr.f32.mxu0 %v2871_v14 }
 0x5ac   : > { %3493 = vmatmul.mubr.f32.gmra.mxu0 %v2872_v37 }
 0x5ad   : > { %3495 = vmatprep.mubr.f32.mxu0 %v2873_v20 }
 0x5b0   : > { %3496 = vmatmul.mubr.f32.gmra.mxu0 %v2874_v28 }
 0x664   : > { %v5616_v56 = vpop.f32.mrf.mxu0 }
 0x665   : > { %2986 = vrot.lane.b32.xlu0 %v5616_v56, %s3858_s13 }
 0x666   : > { %v5620_v24 = vpop.f32.mrf.mxu0 }
 0x667   : > { %2984 = vrot.lane.b32.xlu1 %v5620_v24, %s3858_s13 }
 0x668   : > { %v5624_v10 = vpop.f32.mrf.mxu0 }
 0x669   : > { %3038 = vrot.lane.b32.xlu0 %v5616_v56, %s3855_s7 }
 0x66a   : > { %v5628_v7 = vpop.f32.mrf.mxu0 }
 0x66b   : > { %3036 = vrot.lane.b32.xlu1 %v5620_v24, %s3855_s7 }
 0x66c   : > { %v3494_v22 = vpop.f32.mrf.mxu0 }
 0x66d   : > { %2990 = vrot.lane.b32.xlu0 %v5624_v10, %s3858_s13 }
 0x66e   : > { %v2961_v38 = vpop.f32.mrf.mxu0 }
 0x66f   : > { %2988 = vrot.lane.b32.xlu1 %v5628_v7, %s3858_s13 }
 0x670   : > { %v3497_v9 = vpop.f32.mrf.mxu0 }
 0x671   : > { %3014 = vrot.lane.b32.xlu0 %v3494_v22, %s3865_s28 }
 0x672   : > { %v2971_v6 = vpop.f32.mrf.mxu0 }
 0x673   : > { %3012 = vrot.lane.b32.xlu1 %v2961_v38, %s3865_s28 }
 0x675   : > { %3018 = vrot.lane.b32.xlu0 %v3497_v9, %s3865_s28 }
 0x677   : > { %3016 = vrot.lane.b32.xlu1 %v2971_v6, %s3865_s28 }
 0x679   : > { %3042 = vrot.lane.b32.xlu0 %v5624_v10, %s3855_s7 }
 0x67b   : > { %3040 = vrot.lane.b32.xlu1 %v5628_v7, %s3855_s7  ;;  %s3194_s7 = sshll.u32 %s5922_s19, 5 }
 0x67c   : > { %s224_s30 = scalar_lea.vmem %s5684_s5, %s3194_s7 }
 0x6d7   : > { %v2987_v31 = vpop.permute.xlu0 %2986 }
 0x6d8   : > { %v2999_v12 = vsel %vm1712_vm4, %v2987_v31, 0.0 }
 0x6d9   : > { %v2985_v33 = vpop.permute.xlu1 %2984  ;;  %3000 = vadd.xlane.f32.xlu0 %v2999_v12 }
 0x6da   : > { %v2996_v1 = vsel %vm1712_vm4, %v2985_v33, 0.0 }
 0x6db   : > { %v3039_v27 = vpop.permute.xlu0 %3038 }
 0x6dc   : > { %v3051_v52 = vsel %vm1712_vm4, %v3039_v27, 0.0 }
 0x6dd   : > { %v3037_v26 = vpop.permute.xlu1 %3036  ;;  %3052 = vadd.xlane.f32.xlu1 %v3051_v52 }
 0x6de   : > { %v3048_v58 = vsel %vm1712_vm4, %v3037_v26, 0.0 }
 0x6df   : > { %v2991_v13 = vpop.permute.xlu0 %2990  ;;  %3049 = vadd.xlane.f32.xlu0 %v3048_v58 }
 0x6e0   : > { %v3005_v8 = vsel %vm1712_vm4, %v2991_v13, 0.0 }
 0x6e1   : > { %v2989_v48 = vpop.permute.xlu1 %2988  ;;  %2997 = vadd.xlane.f32.xlu1 %v2996_v1 }
 0x6e2   : > { %v3002_v62 = vsel %vm1712_vm4, %v2989_v48, 0.0 }
 0x6e3   : > { %v3015_v53 = vpop.permute.xlu0 %3014  ;;  %3003 = vadd.xlane.f32.xlu0 %v3002_v62 }
 0x6e4   : > { %v3027_v5 = vsel %vm1712_vm4, %v3015_v53, 0.0 }
 0x6e5   : > { %v3013_v29 = vpop.permute.xlu1 %3012  ;;  %3006 = vadd.xlane.f32.xlu1 %v3005_v8 }
 0x6e6   : > { %v3024_v30 = vsel %vm1712_vm4, %v3013_v29, 0.0 }
 0x6e7   : > { %3025 = vadd.xlane.f32.xlu0 %v3024_v30  ;;  %v3019_v40 = vpop.permute.xlu0 %3018 }
 0x6e8   : > { %v3033_v57 = vsel %vm1712_vm4, %v3019_v40, 0.0 }
 0x6e9   : > { %3028 = vadd.xlane.f32.xlu1 %v3027_v5  ;;  %v3017_v19 = vpop.permute.xlu1 %3016 }
 0x6ea   : > { %v3030_v55 = vsel %vm1712_vm4, %v3017_v19, 0.0 }
 0x6eb   : > { %3031 = vadd.xlane.f32.xlu0 %v3030_v55  ;;  %v3043_v47 = vpop.permute.xlu0 %3042 }
 0x6ec   : > { %v3057_v60 = vsel %vm1712_vm4, %v3043_v47, 0.0 }
 0x6ed   : > { %3034 = vadd.xlane.f32.xlu1 %v3033_v57  ;;  %v3041_v17 = vpop.permute.xlu1 %3040 }
 0x6ee   : > { %v3054_v21 = vsel %vm1712_vm4, %v3041_v17, 0.0 }
 0x6ef   : > { %3055 = vadd.xlane.f32.xlu0 %v3054_v21 }
 0x6f1   : > { %3058 = vadd.xlane.f32.xlu1 %v3057_v60 }
 0x762   : > { %v3001_v2 = vpop.xlane.xlu0 %3000 }
 0x763   : > { %v3061_v35 = vsel %vm974_vm3, %v5616_v56, %v3001_v2 }
 0x766   : > { %v3053_v46 = vpop.xlane.xlu1 %3052 }
 0x768   : > { %v3050_v11 = vpop.xlane.xlu0 %3049 }
 0x76a   : > { %v2998_v49 = vpop.xlane.xlu1 %2997 }
 0x76b   : > { %v3060_v32 = vsel %vm974_vm3, %v5620_v24, %v2998_v49 }
 0x76c   : > { %v3004_v18 = vpop.xlane.xlu0 %3003 }
 0x76d   : > { %v3062_v41 = vsel %vm974_vm3, %v5628_v7, %v3004_v18 }
 0x76e   : > { %v3007_v0 = vpop.xlane.xlu1 %3006 }
 0x76f   : > { %v3063_v44 = vsel %vm974_vm3, %v5624_v10, %v3007_v0 }
 0x770   : > { %v3026_v54 = vpop.xlane.xlu0 %3025 }
 0x771   : > { %v3064_v45 = vsel %vm245_vm1, %v3060_v32, %v3026_v54 }
 0x772   : > { %v3069_v23 = vsel %vm3068_vm2, %v3064_v45, %v3050_v11  ;;  %v3029_v42 = vpop.xlane.xlu1 %3028 }
 0x773   : > { %3074 = vst.msk [vmem:[%s224_s30] sm:$0xff] %vm3073_vm10, %v3069_v23  ;;  %v3065_v15 = vsel %vm245_vm1, %v3061_v35, %v3029_v42 }
 0x774   : > { %v3070_v34 = vsel %vm3068_vm2, %v3065_v15, %v3053_v46  ;;  %v3032_v61 = vpop.xlane.xlu0 %3031 }
 0x775   : > { %3075 = vst.msk [vmem:[%s224_s30 + $0x8] sm:$0xff] %vm3073_vm10, %v3070_v34  ;;  %v3066_v16 = vsel %vm245_vm1, %v3062_v41, %v3032_v61 }
 0x776   : > { %v3035_v25 = vpop.xlane.xlu1 %3034 }
 0x777   : > { %v3067_v36 = vsel %vm245_vm1, %v3063_v44, %v3035_v25 }
 0x778   : > { %v3056_v3 = vpop.xlane.xlu0 %3055 }
 0x779   : > { %v3071_v43 = vsel %vm3068_vm2, %v3066_v16, %v3056_v3 }
 0x77a   : > { %3076 = vst.msk [vmem:[%s224_s30 + $0x10] sm:$0xff] %vm3073_vm10, %v3071_v43  ;;  %v3059_v51 = vpop.xlane.xlu1 %3058 }
 0x77b   : > { %v3072_v39 = vsel %vm3068_vm2, %v3067_v36, %v3059_v51 }
 0x77c   : > { %3077 = vst.msk [vmem:[%s224_s30 + $0x18] sm:$0xff] %vm3073_vm10, %v3072_v39 }
 0x77d PF: > { %s15_s18 = sadd.s32 1, %s3853_s18  }
 0x77e   : > { %p12_p4 = scmp.ge.s32.totalorder %s15_s18, 4  }
 0x780   :  { %14 = sbr.rel (!%p12_p4) target bundleno = 1 (0x1), region = 70 }

</bundles_post_ra>
